<compile_context>
chip_gen: v7x
topology: tpu7x:2x2x1
jax: 0.10.0
libtpu: 0.0.40
codegen_flags: <defaults>
</compile_context>

<pallas_src>
import functools
import math
import cmath

import jax
import jax.numpy as jnp
from jax import lax
from jax.experimental import pallas as pl
from jax.experimental.pallas import tpu as pltpu

# ----------------------- synthetic PUSCH configuration -----------------------
B = 2        # batch size
NRX = 1      # num_rx
A = 4        # num_rx_ant
NTX = 2      # num_tx
NTA = 2      # num_tx_ant
NL = 2       # num_layers per tx (codebook precoding NTA -> NL)
S = NTX * NL # total number of streams
T = 4        # num_ofdm_symbols
F = 512      # num_subcarriers
NBITS = 2    # bits per symbol (QPSK)

SUB = 8                 # resource elements on the sublane axis of one sub-tile
LANE = 128              # REs on the lane axis (keep at 128: vreg-pressure bound, not DMA)
TILE_RE = SUB * LANE    # REs per (8,128) sub-tile
MAX_GRID = 2            # >=2 "parallel" steps keeps both v7x TensorCores busy;
                        # on v6e/v5e (1 TC) the extra step only costs ~0.35us.

# Input dtype of the h_eff / y planes in HBM.  On v5e/v6e (memory-bound once the
# precoding is hoisted) jnp.bfloat16 halves the channel bytes; the kernel upcasts on
# load.  Kept float32 here for numerical headroom and layout simplicity.
IN_DTYPE = jnp.float32


def _cmul(ar, ai, br, bi):
    """Complex multiply on (re, im) pairs."""
    return ar * br - ai * bi, ar * bi + ai * br


def pusch_rx_kernel(no_sm, h_ref, y_ref, llr_ref, *, K):
    """Per-RE LMMSE MIMO detection + max-log QPSK LLRs on precoded channels.

    no_sm   : (n_blocks*K,) f32 in SMEM       noise variance per (8,128) sub-tile
    h_ref   : (2*A*S, K, SUB, LANE)           h_eff; rows [0:A*S]=re, [A*S:]=im
    y_ref   : (2*A,   K, SUB, LANE)           received signal; rows [0:A]=re, [A:]=im
    llr_ref : (S*NBITS, K, SUB, LANE)         LLRs, row = stream*NBITS + bit
    """
    pid = pl.program_id(0)
    eps = 1e-6
    scale = 2.0 * math.sqrt(2.0)
    HOFF = A * S
    YOFF = A

    def subtile(t, carry):
        no = no_sm[pid * K + t]     # scalar noise variance for this sub-tile (SMEM)

        # ---- Gram matrix G = Heff^H Heff + no*I (lower triangle + real diagonal)
        #      and matched filter z = Heff^H y, streamed over rx antennas so only
        #      one antenna's rows are live at a time. ----
        Gd = [None] * S
        Glr = [[None] * S for _ in range(S)]
        Gli = [[None] * S for _ in range(S)]
        zr = [None] * S
        zi = [None] * S
        for a in range(A):
            ya_r = y_ref[a, t, :, :].astype(jnp.float32)
            ya_i = y_ref[YOFF + a, t, :, :].astype(jnp.float32)
            Hr = [h_ref[a * S + s, t, :, :].astype(jnp.float32) for s in range(S)]
            Hi = [h_ref[HOFF + a * S + s, t, :, :].astype(jnp.float32) for s in range(S)]
            for i in range(S):
                pw = Hr[i] * Hr[i] + Hi[i] * Hi[i]
                Gd[i] = (no + pw) if a == 0 else Gd[i] + pw
                for j in range(i):
                    # conj(Heff[a,i]) * Heff[a,j]  (lower triangle; G Hermitian)
                    gr = Hr[i] * Hr[j] + Hi[i] * Hi[j]
                    gi = Hr[i] * Hi[j] - Hi[i] * Hr[j]
                    if a == 0:
                        Glr[i][j], Gli[i][j] = gr, gi
                    else:
                        Glr[i][j] = Glr[i][j] + gr
                        Gli[i][j] = Gli[i][j] + gi
                # conj(Heff[a,i]) * y[a]
                mr = Hr[i] * ya_r + Hi[i] * ya_i
                mi = Hr[i] * ya_i - Hi[i] * ya_r
                if a == 0:
                    zr[i], zi[i] = mr, mi
                else:
                    zr[i] = zr[i] + mr
                    zi[i] = zi[i] + mi

        # ---- right-looking LDL^H:  G = L D L^H (L unit lower, D real > 0).
        #      dvec is folded into the trailing update so only invd stays live,
        #      and each Gram column dies right after its L column is formed.
        #      The (regularized) invd is used consistently everywhere. ----
        # TODO(synk): use approx=False (or one Newton step) for the pivot reciprocals
        #             if these LLRs ever feed a real LDPC decoder.
        Lr = [[None] * S for _ in range(S)]
        Li = [[None] * S for _ in range(S)]
        invd = [None] * S
        for j in range(S):
            invd[j] = pl.reciprocal(Gd[j] + eps, approx=True)   # EUP slot
            for i in range(j + 1, S):
                Lr[i][j] = Glr[i][j] * invd[j]
                Li[i][j] = Gli[i][j] * invd[j]
            for i in range(j + 1, S):
                # Gd[i] -= |L[i][j]|^2 d[j]  ==  |Gl[i][j]|^2 / d[j]
                Gd[i] = Gd[i] - (Glr[i][j] * Glr[i][j] + Gli[i][j] * Gli[i][j]) * invd[j]
                for m in range(j + 1, i):
                    # Gl[i][m] -= L[i][j] * conj(Gl[m][j])   (Gl[m][j] = L[m][j] d[j])
                    cr, ci = _cmul(Lr[i][j], Li[i][j], Glr[m][j], -Gli[m][j])
                    Glr[i][m] = Glr[i][m] - cr
                    Gli[i][m] = Gli[i][m] - ci

        # ---- M = L^{-1} (unit lower triangular), forward substitution ----
        Mr = [[None] * S for _ in range(S)]
        Mi = [[None] * S for _ in range(S)]
        for j in range(S):
            for i in range(j + 1, S):
                tr, ti = Lr[i][j], Li[i][j]
                for k in range(j + 1, i):
                    cr, ci = _cmul(Lr[i][k], Li[i][k], Mr[k][j], Mi[k][j])
                    tr = tr + cr
                    ti = ti + ci
                Mr[i][j] = -tr
                Mi[i][j] = -ti

        # ---- v = D^{-1} (M z) ----
        vr = [None] * S
        vi = [None] * S
        for i in range(S):
            tr, ti = zr[i], zi[i]
            for j in range(i):
                cr, ci = _cmul(Mr[i][j], Mi[i][j], zr[j], zi[j])
                tr = tr + cr
                ti = ti + ci
            vr[i] = tr * invd[i]
            vi[i] = ti * invd[i]

        # ---- x = G^-1 z = M^H v,  diag(G^-1)_s = sum_k |M[k][s]|^2 / d[k],
        #      max-log QPSK LLR = 2*sqrt(2) * x / (no * diag(G^-1))
        #      (the LMMSE bias factor 1 - no*diag cancels between x_hat and no_eff) ----
        for s in range(S):
            xr, xi = vr[s], vi[s]
            ainv = invd[s]
            for k in range(s + 1, S):
                cr, ci = _cmul(Mr[k][s], -Mi[k][s], vr[k], vi[k])
                xr = xr + cr
                xi = xi + ci
                ainv = ainv + (Mr[k][s] * Mr[k][s] + Mi[k][s] * Mi[k][s]) * invd[k]
            g = scale * pl.reciprocal(no * ainv + eps, approx=True)
            # each store is a full (SUB, LANE) unmasked tile
            llr_ref[NBITS * s, t, :, :] = xr * g
            llr_ref[NBITS * s + 1, t, :, :] = xi * g
        return carry

    lax.fori_loop(0, K, subtile, 0)


@jax.jit
def pusch_receiver(y, h, no, w):
    """Perfect-CSI frequency-domain PUSCH receiver.

    y  : [B, num_rx=1, A, T, F] complex64
    h  : [B, num_rx=1, A, NTX, NTA, T, F] complex64
    no : [B] float32 (noise variance)
    w  : [NTX, NTA, NL] complex codebook precoder

    Returns b_hat : [B, NTX, T*F*NL*NBITS] float32 (hard-decided bits).
    """
    B_, _, A_, T_, F_ = y.shape
    N_ = B_ * T_ * F_

    # ---- codebook precoding hoisted out of the kernel (single XLA einsum):
    #      h_eff[b,a,tx,l,t,f] = sum_ta h[b,0,a,tx,ta,t,f] * w[tx,ta,l]
    w_arr = jnp.asarray(w, jnp.complex64)
    heff = jnp.einsum("baxctf,xcl->baxltf", h[:, 0], w_arr)      # [B,A,NTX,NL,T,F]

    # ---- glue: flatten to kernel layout (rows x resource elements), stack re/im ----
    h2 = jnp.transpose(heff, (1, 2, 3, 0, 4, 5)).reshape(A_ * S, N_)   # row = a*S + s
    y2 = jnp.transpose(y[:, 0], (1, 0, 2, 3)).reshape(A_, N_)
    h_ri = jnp.concatenate([jnp.real(h2), jnp.imag(h2)], axis=0).astype(IN_DTYPE)
    y_ri = jnp.concatenate([jnp.real(y2), jnp.imag(y2)], axis=0).astype(IN_DTYPE)

    # ---- grid sizing: few big blocks of K (8,128) sub-tiles each, grid kept >= 2 ----
    n_sub = -(-N_ // TILE_RE)
    n_blocks = MAX_GRID if n_sub >= MAX_GRID else 1
    K = -(-n_sub // n_blocks)
    n_sub_pad = n_blocks * K
    Npad = n_sub_pad * TILE_RE
    pad = Npad - N_
    if pad:
        h_ri = jnp.pad(h_ri, ((0, 0), (0, pad)))
        y_ri = jnp.pad(y_ri, ((0, 0), (0, pad)))

    def plane(x):
        return x.reshape(x.shape[0], n_sub_pad, SUB, LANE)

    h4, y4 = plane(h_ri), plane(y_ri)

    # per-sub-tile noise variance via scalar prefetch (SMEM).  A sub-tile never
    # straddles two batches as long as T*F is a multiple of TILE_RE (true here).
    no_vec = jnp.asarray(no, jnp.float32).reshape(-1)
    sub_b = jnp.asarray(
        [min(g * TILE_RE // (T_ * F_), B_ - 1) for g in range(n_sub_pad)],
        dtype=jnp.int32)
    no_sub = no_vec[sub_b]                                        # (n_sub_pad,) f32

    kernel = functools.partial(pusch_rx_kernel, K=K)

    def spec(rows):
        return pl.BlockSpec((rows, K, SUB, LANE), lambda i, no_sm: (0, i, 0, 0))

    llr4 = pl.pallas_call(
        kernel,
        out_shape=jax.ShapeDtypeStruct((S * NBITS, n_sub_pad, SUB, LANE), jnp.float32),
        grid_spec=pltpu.PrefetchScalarGridSpec(
            num_scalar_prefetch=1,
            grid=(n_blocks,),
            in_specs=[spec(2 * A_ * S), spec(2 * A_)],
            out_specs=spec(S * NBITS)),
        compiler_params=pltpu.CompilerParams(
            dimension_semantics=("parallel",)),
    )(no_sub, h4, y4)

    # ---- glue: hard decision FIRST (int8) on the kernel layout, then the
    #      LayerDemapper permutation -> the strided transpose moves 4x fewer bytes.
    # TODO(synk): the LDPC/CRC transport-block decoder has no clean Pallas equivalent;
    #             it is replaced by a hard decision on the LLRs.
    llr2d = llr4.reshape(S * NBITS, Npad)[:, :N_]      # drop padded REs before deciding
    hard = (llr2d > 0).astype(jnp.int8)
    hard = hard.reshape(NTX, NL, NBITS, B_, T_, F_)
    hard = jnp.transpose(hard, (3, 0, 4, 5, 1, 2))     # [B, NTX, T, F, NL, NBITS]
    b_hat = hard.reshape(B_, NTX, T_ * F_ * NL * NBITS).astype(jnp.float32)
    return b_hat


if __name__ == "__main__":
    key = jax.random.PRNGKey(0)
    kb, kh, kn = jax.random.split(key, 3)

    # deterministic codebook precoder w[tx][ta][l]
    w = [[[cmath.exp(2j * math.pi * (ta * l) / NTA + 1j * math.pi * tx / 4)
           / math.sqrt(NTA)
           for l in range(NL)] for ta in range(NTA)] for tx in range(NTX)]
    w_arr = jnp.array(w, dtype=jnp.complex64)               # [NTX, NTA, NL]

    # transmitted bits and QPSK symbols (bit=1 -> +1/sqrt(2), bit=0 -> -1/sqrt(2))
    bits = jax.random.bernoulli(kb, 0.5, (B, NTX, T, F, NL, NBITS))
    bf = bits.astype(jnp.float32)
    sym = ((2.0 * bf[..., 0] - 1.0) + 1j * (2.0 * bf[..., 1] - 1.0)) / math.sqrt(2.0)
    x_sym = jnp.transpose(sym, (0, 1, 4, 2, 3)).astype(jnp.complex64)  # [B,NTX,NL,T,F]

    # random frequency-domain channel  h : [B, 1, A, NTX, NTA, T, F]
    kh1, kh2, kn1, kn2 = jax.random.split(kh, 4)
    h0 = (jax.random.normal(kh1, (B, A, NTX, NTA, T, F))
          + 1j * jax.random.normal(kh2, (B, A, NTX, NTA, T, F))) / math.sqrt(2.0)
    h0 = h0.astype(jnp.complex64)
    h = h0[:, None]

    # effective channel after precoding and received signal
    heff = jnp.einsum("baxctf,xcl->baxltf", h0, w_arr)        # [B,A,NTX,NL,T,F]
    no_val = 1e-3
    noise = (jax.random.normal(kn1, (B, A, T, F))
             + 1j * jax.random.normal(kn2, (B, A, T, F))) * math.sqrt(no_val / 2.0)
    y0 = jnp.einsum("baxltf,bxltf->batf", heff, x_sym) + noise.astype(jnp.complex64)
    y = y0[:, None].astype(jnp.complex64)                     # [B,1,A,T,F]

    no = jnp.full((B,), no_val, dtype=jnp.float32)

    b_hat = jax.block_until_ready(pusch_receiver(y, h, no, w_arr))

    assert b_hat.shape == (B, NTX, T * F * NL * NBITS)
    bits_flat = bits.reshape(B, NTX, -1).astype(jnp.float32)
    ber = float(jnp.mean(jnp.abs(b_hat - bits_flat)))
    assert ber < 0.1, f"unexpected BER {ber}"
    print("KERNEL_OK")
</pallas_src>

<mosaic_0001>
module attributes {stable_mosaic.version = 11 : i64} {
  func.func @pusch_rx_kernel(%arg0: i32, %arg1: memref<4xf32, #tpu.memory_space<smem>>, %arg2: memref<32x2x8x128xf32, #tpu.memory_space<vmem>>, %arg3: memref<8x2x8x128xf32, #tpu.memory_space<vmem>>, %arg4: memref<8x2x8x128xf32, #tpu.memory_space<vmem>>) attributes {dimension_semantics = [#tpu.dimension_semantics<parallel>], iteration_bounds = array<i64: 2>, scalar_prefetch = 1 : i64, scratch_operands = 0 : i64, tpu.core_type = #tpu.core_type<tc>, window_params = [{transform_indices = @transform_0, window_bounds = array<i64: 32, 2, 8, 128>}, {transform_indices = @transform_1, window_bounds = array<i64: 8, 2, 8, 128>}, {transform_indices = @transform_2, window_bounds = array<i64: 8, 2, 8, 128>}]} {
    %c0_i32 = arith.constant 0 : i32
    %c2_i32 = arith.constant 2 : i32
    %0 = arith.addi %c0_i32, %c2_i32 : i32
    %c1_i32 = arith.constant 1 : i32
    scf.for %arg5 = %c0_i32 to %0 step %c1_i32  : i32 {
      %c2_i32_1 = arith.constant 2 : i32
      %1 = arith.muli %arg0, %c2_i32_1 : i32
      %2 = arith.addi %1, %arg5 : i32
      %3 = arith.index_cast %2 : i32 to index
      %4 = memref.load %arg1[%3] : memref<4xf32, #tpu.memory_space<smem>>
      %c0 = arith.constant 0 : index
      %5 = arith.index_cast %arg5 : i32 to index
      %c0_2 = arith.constant 0 : index
      %c0_3 = arith.constant 0 : index
      %6 = vector.load %arg3[%c0, %5, %c0_2, %c0_3] : memref<8x2x8x128xf32, #tpu.memory_space<vmem>>, vector<1x1x8x128xf32>
      %7 = vector.shape_cast %6 : vector<1x1x8x128xf32> to vector<8x128xf32>
      %c4 = arith.constant 4 : index
      %8 = arith.index_cast %arg5 : i32 to index
      %c0_4 = arith.constant 0 : index
      %c0_5 = arith.constant 0 : index
      %9 = vector.load %arg3[%c4, %8, %c0_4, %c0_5] : memref<8x2x8x128xf32, #tpu.memory_space<vmem>>, vector<1x1x8x128xf32>
      %10 = vector.shape_cast %9 : vector<1x1x8x128xf32> to vector<8x128xf32>
      %c0_6 = arith.constant 0 : index
      %11 = arith.index_cast %arg5 : i32 to index
      %c0_7 = arith.constant 0 : index
      %c0_8 = arith.constant 0 : index
      %12 = vector.load %arg2[%c0_6, %11, %c0_7, %c0_8] : memref<32x2x8x128xf32, #tpu.memory_space<vmem>>, vector<1x1x8x128xf32>
      %13 = vector.shape_cast %12 : vector<1x1x8x128xf32> to vector<8x128xf32>
      %c1 = arith.constant 1 : index
      %14 = arith.index_cast %arg5 : i32 to index
      %c0_9 = arith.constant 0 : index
      %c0_10 = arith.constant 0 : index
      %15 = vector.load %arg2[%c1, %14, %c0_9, %c0_10] : memref<32x2x8x128xf32, #tpu.memory_space<vmem>>, vector<1x1x8x128xf32>
      %16 = vector.shape_cast %15 : vector<1x1x8x128xf32> to vector<8x128xf32>
      %c2 = arith.constant 2 : index
      %17 = arith.index_cast %arg5 : i32 to index
      %c0_11 = arith.constant 0 : index
      %c0_12 = arith.constant 0 : index
      %18 = vector.load %arg2[%c2, %17, %c0_11, %c0_12] : memref<32x2x8x128xf32, #tpu.memory_space<vmem>>, vector<1x1x8x128xf32>
      %19 = vector.shape_cast %18 : vector<1x1x8x128xf32> to vector<8x128xf32>
      %c3 = arith.constant 3 : index
      %20 = arith.index_cast %arg5 : i32 to index
      %c0_13 = arith.constant 0 : index
      %c0_14 = arith.constant 0 : index
      %21 = vector.load %arg2[%c3, %20, %c0_13, %c0_14] : memref<32x2x8x128xf32, #tpu.memory_space<vmem>>, vector<1x1x8x128xf32>
      %22 = vector.shape_cast %21 : vector<1x1x8x128xf32> to vector<8x128xf32>
      %c16 = arith.constant 16 : index
      %23 = arith.index_cast %arg5 : i32 to index
      %c0_15 = arith.constant 0 : index
      %c0_16 = arith.constant 0 : index
      %24 = vector.load %arg2[%c16, %23, %c0_15, %c0_16] : memref<32x2x8x128xf32, #tpu.memory_space<vmem>>, vector<1x1x8x128xf32>
      %25 = vector.shape_cast %24 : vector<1x1x8x128xf32> to vector<8x128xf32>
      %c17 = arith.constant 17 : index
      %26 = arith.index_cast %arg5 : i32 to index
      %c0_17 = arith.constant 0 : index
      %c0_18 = arith.constant 0 : index
      %27 = vector.load %arg2[%c17, %26, %c0_17, %c0_18] : memref<32x2x8x128xf32, #tpu.memory_space<vmem>>, vector<1x1x8x128xf32>
      %28 = vector.shape_cast %27 : vector<1x1x8x128xf32> to vector<8x128xf32>
      %c18 = arith.constant 18 : index
      %29 = arith.index_cast %arg5 : i32 to index
      %c0_19 = arith.constant 0 : index
      %c0_20 = arith.constant 0 : index
      %30 = vector.load %arg2[%c18, %29, %c0_19, %c0_20] : memref<32x2x8x128xf32, #tpu.memory_space<vmem>>, vector<1x1x8x128xf32>
      %31 = vector.shape_cast %30 : vector<1x1x8x128xf32> to vector<8x128xf32>
      %c19 = arith.constant 19 : index
      %32 = arith.index_cast %arg5 : i32 to index
      %c0_21 = arith.constant 0 : index
      %c0_22 = arith.constant 0 : index
      %33 = vector.load %arg2[%c19, %32, %c0_21, %c0_22] : memref<32x2x8x128xf32, #tpu.memory_space<vmem>>, vector<1x1x8x128xf32>
      %34 = vector.shape_cast %33 : vector<1x1x8x128xf32> to vector<8x128xf32>
      %35 = arith.mulf %13, %13 : vector<8x128xf32>
      %36 = arith.mulf %25, %25 : vector<8x128xf32>
      %37 = arith.addf %35, %36 : vector<8x128xf32>
      %38 = vector.broadcast %4 : f32 to vector<8x128xf32>
      %39 = arith.addf %38, %37 : vector<8x128xf32>
      %40 = arith.mulf %13, %7 : vector<8x128xf32>
      %41 = arith.mulf %25, %10 : vector<8x128xf32>
      %42 = arith.addf %40, %41 : vector<8x128xf32>
      %43 = arith.mulf %13, %10 : vector<8x128xf32>
      %44 = arith.mulf %25, %7 : vector<8x128xf32>
      %45 = arith.subf %43, %44 : vector<8x128xf32>
      %46 = arith.mulf %16, %16 : vector<8x128xf32>
      %47 = arith.mulf %28, %28 : vector<8x128xf32>
      %48 = arith.addf %46, %47 : vector<8x128xf32>
      %49 = vector.broadcast %4 : f32 to vector<8x128xf32>
      %50 = arith.addf %49, %48 : vector<8x128xf32>
      %51 = arith.mulf %16, %13 : vector<8x128xf32>
      %52 = arith.mulf %28, %25 : vector<8x128xf32>
      %53 = arith.addf %51, %52 : vector<8x128xf32>
      %54 = arith.mulf %16, %25 : vector<8x128xf32>
      %55 = arith.mulf %28, %13 : vector<8x128xf32>
      %56 = arith.subf %54, %55 : vector<8x128xf32>
      %57 = arith.mulf %16, %7 : vector<8x128xf32>
      %58 = arith.mulf %28, %10 : vector<8x128xf32>
      %59 = arith.addf %57, %58 : vector<8x128xf32>
      %60 = arith.mulf %16, %10 : vector<8x128xf32>
      %61 = arith.mulf %28, %7 : vector<8x128xf32>
      %62 = arith.subf %60, %61 : vector<8x128xf32>
      %63 = arith.mulf %19, %19 : vector<8x128xf32>
      %64 = arith.mulf %31, %31 : vector<8x128xf32>
      %65 = arith.addf %63, %64 : vector<8x128xf32>
      %66 = vector.broadcast %4 : f32 to vector<8x128xf32>
      %67 = arith.addf %66, %65 : vector<8x128xf32>
      %68 = arith.mulf %19, %13 : vector<8x128xf32>
      %69 = arith.mulf %31, %25 : vector<8x128xf32>
      %70 = arith.addf %68, %69 : vector<8x128xf32>
      %71 = arith.mulf %19, %25 : vector<8x128xf32>
      %72 = arith.mulf %31, %13 : vector<8x128xf32>
      %73 = arith.subf %71, %72 : vector<8x128xf32>
      %74 = arith.mulf %19, %16 : vector<8x128xf32>
      %75 = arith.mulf %31, %28 : vector<8x128xf32>
      %76 = arith.addf %74, %75 : vector<8x128xf32>
      %77 = arith.mulf %19, %28 : vector<8x128xf32>
      %78 = arith.mulf %31, %16 : vector<8x128xf32>
      %79 = arith.subf %77, %78 : vector<8x128xf32>
      %80 = arith.mulf %19, %7 : vector<8x128xf32>
      %81 = arith.mulf %31, %10 : vector<8x128xf32>
      %82 = arith.addf %80, %81 : vector<8x128xf32>
      %83 = arith.mulf %19, %10 : vector<8x128xf32>
      %84 = arith.mulf %31, %7 : vector<8x128xf32>
      %85 = arith.subf %83, %84 : vector<8x128xf32>
      %86 = arith.mulf %22, %22 : vector<8x128xf32>
      %87 = arith.mulf %34, %34 : vector<8x128xf32>
      %88 = arith.addf %86, %87 : vector<8x128xf32>
      %89 = vector.broadcast %4 : f32 to vector<8x128xf32>
      %90 = arith.addf %89, %88 : vector<8x128xf32>
      %91 = arith.mulf %22, %13 : vector<8x128xf32>
      %92 = arith.mulf %34, %25 : vector<8x128xf32>
      %93 = arith.addf %91, %92 : vector<8x128xf32>
      %94 = arith.mulf %22, %25 : vector<8x128xf32>
      %95 = arith.mulf %34, %13 : vector<8x128xf32>
      %96 = arith.subf %94, %95 : vector<8x128xf32>
      %97 = arith.mulf %22, %16 : vector<8x128xf32>
      %98 = arith.mulf %34, %28 : vector<8x128xf32>
      %99 = arith.addf %97, %98 : vector<8x128xf32>
      %100 = arith.mulf %22, %28 : vector<8x128xf32>
      %101 = arith.mulf %34, %16 : vector<8x128xf32>
      %102 = arith.subf %100, %101 : vector<8x128xf32>
      %103 = arith.mulf %22, %19 : vector<8x128xf32>
      %104 = arith.mulf %34, %31 : vector<8x128xf32>
      %105 = arith.addf %103, %104 : vector<8x128xf32>
      %106 = arith.mulf %22, %31 : vector<8x128xf32>
      %107 = arith.mulf %34, %19 : vector<8x128xf32>
      %108 = arith.subf %106, %107 : vector<8x128xf32>
      %109 = arith.mulf %22, %7 : vector<8x128xf32>
      %110 = arith.mulf %34, %10 : vector<8x128xf32>
      %111 = arith.addf %109, %110 : vector<8x128xf32>
      %112 = arith.mulf %22, %10 : vector<8x128xf32>
      %113 = arith.mulf %34, %7 : vector<8x128xf32>
      %114 = arith.subf %112, %113 : vector<8x128xf32>
      %c1_23 = arith.constant 1 : index
      %115 = arith.index_cast %arg5 : i32 to index
      %c0_24 = arith.constant 0 : index
      %c0_25 = arith.constant 0 : index
      %116 = vector.load %arg3[%c1_23, %115, %c0_24, %c0_25] : memref<8x2x8x128xf32, #tpu.memory_space<vmem>>, vector<1x1x8x128xf32>
      %117 = vector.shape_cast %116 : vector<1x1x8x128xf32> to vector<8x128xf32>
      %c5 = arith.constant 5 : index
      %118 = arith.index_cast %arg5 : i32 to index
      %c0_26 = arith.constant 0 : index
      %c0_27 = arith.constant 0 : index
      %119 = vector.load %arg3[%c5, %118, %c0_26, %c0_27] : memref<8x2x8x128xf32, #tpu.memory_space<vmem>>, vector<1x1x8x128xf32>
      %120 = vector.shape_cast %119 : vector<1x1x8x128xf32> to vector<8x128xf32>
      %c4_28 = arith.constant 4 : index
      %121 = arith.index_cast %arg5 : i32 to index
      %c0_29 = arith.constant 0 : index
      %c0_30 = arith.constant 0 : index
      %122 = vector.load %arg2[%c4_28, %121, %c0_29, %c0_30] : memref<32x2x8x128xf32, #tpu.memory_space<vmem>>, vector<1x1x8x128xf32>
      %123 = vector.shape_cast %122 : vector<1x1x8x128xf32> to vector<8x128xf32>
      %c5_31 = arith.constant 5 : index
      %124 = arith.index_cast %arg5 : i32 to index
      %c0_32 = arith.constant 0 : index
      %c0_33 = arith.constant 0 : index
      %125 = vector.load %arg2[%c5_31, %124, %c0_32, %c0_33] : memref<32x2x8x128xf32, #tpu.memory_space<vmem>>, vector<1x1x8x128xf32>
      %126 = vector.shape_cast %125 : vector<1x1x8x128xf32> to vector<8x128xf32>
      %c6 = arith.constant 6 : index
      %127 = arith.index_cast %arg5 : i32 to index
      %c0_34 = arith.constant 0 : index
      %c0_35 = arith.constant 0 : index
      %128 = vector.load %arg2[%c6, %127, %c0_34, %c0_35] : memref<32x2x8x128xf32, #tpu.memory_space<vmem>>, vector<1x1x8x128xf32>
      %129 = vector.shape_cast %128 : vector<1x1x8x128xf32> to vector<8x128xf32>
      %c7 = arith.constant 7 : index
      %130 = arith.index_cast %arg5 : i32 to index
      %c0_36 = arith.constant 0 : index
      %c0_37 = arith.constant 0 : index
      %131 = vector.load %arg2[%c7, %130, %c0_36, %c0_37] : memref<32x2x8x128xf32, #tpu.memory_space<vmem>>, vector<1x1x8x128xf32>
      %132 = vector.shape_cast %131 : vector<1x1x8x128xf32> to vector<8x128xf32>
      %c20 = arith.constant 20 : index
      %133 = arith.index_cast %arg5 : i32 to index
      %c0_38 = arith.constant 0 : index
      %c0_39 = arith.constant 0 : index
      %134 = vector.load %arg2[%c20, %133, %c0_38, %c0_39] : memref<32x2x8x128xf32, #tpu.memory_space<vmem>>, vector<1x1x8x128xf32>
      %135 = vector.shape_cast %134 : vector<1x1x8x128xf32> to vector<8x128xf32>
      %c21 = arith.constant 21 : index
      %136 = arith.index_cast %arg5 : i32 to index
      %c0_40 = arith.constant 0 : index
      %c0_41 = arith.constant 0 : index
      %137 = vector.load %arg2[%c21, %136, %c0_40, %c0_41] : memref<32x2x8x128xf32, #tpu.memory_space<vmem>>, vector<1x1x8x128xf32>
      %138 = vector.shape_cast %137 : vector<1x1x8x128xf32> to vector<8x128xf32>
      %c22 = arith.constant 22 : index
      %139 = arith.index_cast %arg5 : i32 to index
      %c0_42 = arith.constant 0 : index
      %c0_43 = arith.constant 0 : index
      %140 = vector.load %arg2[%c22, %139, %c0_42, %c0_43] : memref<32x2x8x128xf32, #tpu.memory_space<vmem>>, vector<1x1x8x128xf32>
      %141 = vector.shape_cast %140 : vector<1x1x8x128xf32> to vector<8x128xf32>
      %c23 = arith.constant 23 : index
      %142 = arith.index_cast %arg5 : i32 to index
      %c0_44 = arith.constant 0 : index
      %c0_45 = arith.constant 0 : index
      %143 = vector.load %arg2[%c23, %142, %c0_44, %c0_45] : memref<32x2x8x128xf32, #tpu.memory_space<vmem>>, vector<1x1x8x128xf32>
      %144 = vector.shape_cast %143 : vector<1x1x8x128xf32> to vector<8x128xf32>
      %145 = arith.mulf %123, %123 : vector<8x128xf32>
      %146 = arith.mulf %135, %135 : vector<8x128xf32>
      %147 = arith.addf %145, %146 : vector<8x128xf32>
      %148 = arith.addf %39, %147 : vector<8x128xf32>
      %149 = arith.mulf %123, %117 : vector<8x128xf32>
      %150 = arith.mulf %135, %120 : vector<8x128xf32>
      %151 = arith.addf %149, %150 : vector<8x128xf32>
      %152 = arith.mulf %123, %120 : vector<8x128xf32>
      %153 = arith.mulf %135, %117 : vector<8x128xf32>
      %154 = arith.subf %152, %153 : vector<8x128xf32>
      %155 = arith.addf %42, %151 : vector<8x128xf32>
      %156 = arith.addf %45, %154 : vector<8x128xf32>
      %157 = arith.mulf %126, %126 : vector<8x128xf32>
      %158 = arith.mulf %138, %138 : vector<8x128xf32>
      %159 = arith.addf %157, %158 : vector<8x128xf32>
      %160 = arith.addf %50, %159 : vector<8x128xf32>
      %161 = arith.mulf %126, %123 : vector<8x128xf32>
      %162 = arith.mulf %138, %135 : vector<8x128xf32>
      %163 = arith.addf %161, %162 : vector<8x128xf32>
      %164 = arith.mulf %126, %135 : vector<8x128xf32>
      %165 = arith.mulf %138, %123 : vector<8x128xf32>
      %166 = arith.subf %164, %165 : vector<8x128xf32>
      %167 = arith.addf %53, %163 : vector<8x128xf32>
      %168 = arith.addf %56, %166 : vector<8x128xf32>
      %169 = arith.mulf %126, %117 : vector<8x128xf32>
      %170 = arith.mulf %138, %120 : vector<8x128xf32>
      %171 = arith.addf %169, %170 : vector<8x128xf32>
      %172 = arith.mulf %126, %120 : vector<8x128xf32>
      %173 = arith.mulf %138, %117 : vector<8x128xf32>
      %174 = arith.subf %172, %173 : vector<8x128xf32>
      %175 = arith.addf %59, %171 : vector<8x128xf32>
      %176 = arith.addf %62, %174 : vector<8x128xf32>
      %177 = arith.mulf %129, %129 : vector<8x128xf32>
      %178 = arith.mulf %141, %141 : vector<8x128xf32>
      %179 = arith.addf %177, %178 : vector<8x128xf32>
      %180 = arith.addf %67, %179 : vector<8x128xf32>
      %181 = arith.mulf %129, %123 : vector<8x128xf32>
      %182 = arith.mulf %141, %135 : vector<8x128xf32>
      %183 = arith.addf %181, %182 : vector<8x128xf32>
      %184 = arith.mulf %129, %135 : vector<8x128xf32>
      %185 = arith.mulf %141, %123 : vector<8x128xf32>
      %186 = arith.subf %184, %185 : vector<8x128xf32>
      %187 = arith.addf %70, %183 : vector<8x128xf32>
      %188 = arith.addf %73, %186 : vector<8x128xf32>
      %189 = arith.mulf %129, %126 : vector<8x128xf32>
      %190 = arith.mulf %141, %138 : vector<8x128xf32>
      %191 = arith.addf %189, %190 : vector<8x128xf32>
      %192 = arith.mulf %129, %138 : vector<8x128xf32>
      %193 = arith.mulf %141, %126 : vector<8x128xf32>
      %194 = arith.subf %192, %193 : vector<8x128xf32>
      %195 = arith.addf %76, %191 : vector<8x128xf32>
      %196 = arith.addf %79, %194 : vector<8x128xf32>
      %197 = arith.mulf %129, %117 : vector<8x128xf32>
      %198 = arith.mulf %141, %120 : vector<8x128xf32>
      %199 = arith.addf %197, %198 : vector<8x128xf32>
      %200 = arith.mulf %129, %120 : vector<8x128xf32>
      %201 = arith.mulf %141, %117 : vector<8x128xf32>
      %202 = arith.subf %200, %201 : vector<8x128xf32>
      %203 = arith.addf %82, %199 : vector<8x128xf32>
      %204 = arith.addf %85, %202 : vector<8x128xf32>
      %205 = arith.mulf %132, %132 : vector<8x128xf32>
      %206 = arith.mulf %144, %144 : vector<8x128xf32>
      %207 = arith.addf %205, %206 : vector<8x128xf32>
      %208 = arith.addf %90, %207 : vector<8x128xf32>
      %209 = arith.mulf %132, %123 : vector<8x128xf32>
      %210 = arith.mulf %144, %135 : vector<8x128xf32>
      %211 = arith.addf %209, %210 : vector<8x128xf32>
      %212 = arith.mulf %132, %135 : vector<8x128xf32>
      %213 = arith.mulf %144, %123 : vector<8x128xf32>
      %214 = arith.subf %212, %213 : vector<8x128xf32>
      %215 = arith.addf %93, %211 : vector<8x128xf32>
      %216 = arith.addf %96, %214 : vector<8x128xf32>
      %217 = arith.mulf %132, %126 : vector<8x128xf32>
      %218 = arith.mulf %144, %138 : vector<8x128xf32>
      %219 = arith.addf %217, %218 : vector<8x128xf32>
      %220 = arith.mulf %132, %138 : vector<8x128xf32>
      %221 = arith.mulf %144, %126 : vector<8x128xf32>
      %222 = arith.subf %220, %221 : vector<8x128xf32>
      %223 = arith.addf %99, %219 : vector<8x128xf32>
      %224 = arith.addf %102, %222 : vector<8x128xf32>
      %225 = arith.mulf %132, %129 : vector<8x128xf32>
      %226 = arith.mulf %144, %141 : vector<8x128xf32>
      %227 = arith.addf %225, %226 : vector<8x128xf32>
      %228 = arith.mulf %132, %141 : vector<8x128xf32>
      %229 = arith.mulf %144, %129 : vector<8x128xf32>
      %230 = arith.subf %228, %229 : vector<8x128xf32>
      %231 = arith.addf %105, %227 : vector<8x128xf32>
      %232 = arith.addf %108, %230 : vector<8x128xf32>
      %233 = arith.mulf %132, %117 : vector<8x128xf32>
      %234 = arith.mulf %144, %120 : vector<8x128xf32>
      %235 = arith.addf %233, %234 : vector<8x128xf32>
      %236 = arith.mulf %132, %120 : vector<8x128xf32>
      %237 = arith.mulf %144, %117 : vector<8x128xf32>
      %238 = arith.subf %236, %237 : vector<8x128xf32>
      %239 = arith.addf %111, %235 : vector<8x128xf32>
      %240 = arith.addf %114, %238 : vector<8x128xf32>
      %c2_46 = arith.constant 2 : index
      %241 = arith.index_cast %arg5 : i32 to index
      %c0_47 = arith.constant 0 : index
      %c0_48 = arith.constant 0 : index
      %242 = vector.load %arg3[%c2_46, %241, %c0_47, %c0_48] : memref<8x2x8x128xf32, #tpu.memory_space<vmem>>, vector<1x1x8x128xf32>
      %243 = vector.shape_cast %242 : vector<1x1x8x128xf32> to vector<8x128xf32>
      %c6_49 = arith.constant 6 : index
      %244 = arith.index_cast %arg5 : i32 to index
      %c0_50 = arith.constant 0 : index
      %c0_51 = arith.constant 0 : index
      %245 = vector.load %arg3[%c6_49, %244, %c0_50, %c0_51] : memref<8x2x8x128xf32, #tpu.memory_space<vmem>>, vector<1x1x8x128xf32>
      %246 = vector.shape_cast %245 : vector<1x1x8x128xf32> to vector<8x128xf32>
      %c8 = arith.constant 8 : index
      %247 = arith.index_cast %arg5 : i32 to index
      %c0_52 = arith.constant 0 : index
      %c0_53 = arith.constant 0 : index
      %248 = vector.load %arg2[%c8, %247, %c0_52, %c0_53] : memref<32x2x8x128xf32, #tpu.memory_space<vmem>>, vector<1x1x8x128xf32>
      %249 = vector.shape_cast %248 : vector<1x1x8x128xf32> to vector<8x128xf32>
      %c9 = arith.constant 9 : index
      %250 = arith.index_cast %arg5 : i32 to index
      %c0_54 = arith.constant 0 : index
      %c0_55 = arith.constant 0 : index
      %251 = vector.load %arg2[%c9, %250, %c0_54, %c0_55] : memref<32x2x8x128xf32, #tpu.memory_space<vmem>>, vector<1x1x8x128xf32>
      %252 = vector.shape_cast %251 : vector<1x1x8x128xf32> to vector<8x128xf32>
      %c10 = arith.constant 10 : index
      %253 = arith.index_cast %arg5 : i32 to index
      %c0_56 = arith.constant 0 : index
      %c0_57 = arith.constant 0 : index
      %254 = vector.load %arg2[%c10, %253, %c0_56, %c0_57] : memref<32x2x8x128xf32, #tpu.memory_space<vmem>>, vector<1x1x8x128xf32>
      %255 = vector.shape_cast %254 : vector<1x1x8x128xf32> to vector<8x128xf32>
      %c11 = arith.constant 11 : index
      %256 = arith.index_cast %arg5 : i32 to index
      %c0_58 = arith.constant 0 : index
      %c0_59 = arith.constant 0 : index
      %257 = vector.load %arg2[%c11, %256, %c0_58, %c0_59] : memref<32x2x8x128xf32, #tpu.memory_space<vmem>>, vector<1x1x8x128xf32>
      %258 = vector.shape_cast %257 : vector<1x1x8x128xf32> to vector<8x128xf32>
      %c24 = arith.constant 24 : index
      %259 = arith.index_cast %arg5 : i32 to index
      %c0_60 = arith.constant 0 : index
      %c0_61 = arith.constant 0 : index
      %260 = vector.load %arg2[%c24, %259, %c0_60, %c0_61] : memref<32x2x8x128xf32, #tpu.memory_space<vmem>>, vector<1x1x8x128xf32>
      %261 = vector.shape_cast %260 : vector<1x1x8x128xf32> to vector<8x128xf32>
      %c25 = arith.constant 25 : index
      %262 = arith.index_cast %arg5 : i32 to index
      %c0_62 = arith.constant 0 : index
      %c0_63 = arith.constant 0 : index
      %263 = vector.load %arg2[%c25, %262, %c0_62, %c0_63] : memref<32x2x8x128xf32, #tpu.memory_space<vmem>>, vector<1x1x8x128xf32>
      %264 = vector.shape_cast %263 : vector<1x1x8x128xf32> to vector<8x128xf32>
      %c26 = arith.constant 26 : index
      %265 = arith.index_cast %arg5 : i32 to index
      %c0_64 = arith.constant 0 : index
      %c0_65 = arith.constant 0 : index
      %266 = vector.load %arg2[%c26, %265, %c0_64, %c0_65] : memref<32x2x8x128xf32, #tpu.memory_space<vmem>>, vector<1x1x8x128xf32>
      %267 = vector.shape_cast %266 : vector<1x1x8x128xf32> to vector<8x128xf32>
      %c27 = arith.constant 27 : index
      %268 = arith.index_cast %arg5 : i32 to index
      %c0_66 = arith.constant 0 : index
      %c0_67 = arith.constant 0 : index
      %269 = vector.load %arg2[%c27, %268, %c0_66, %c0_67] : memref<32x2x8x128xf32, #tpu.memory_space<vmem>>, vector<1x1x8x128xf32>
      %270 = vector.shape_cast %269 : vector<1x1x8x128xf32> to vector<8x128xf32>
      %271 = arith.mulf %249, %249 : vector<8x128xf32>
      %272 = arith.mulf %261, %261 : vector<8x128xf32>
      %273 = arith.addf %271, %272 : vector<8x128xf32>
      %274 = arith.addf %148, %273 : vector<8x128xf32>
      %275 = arith.mulf %249, %243 : vector<8x128xf32>
      %276 = arith.mulf %261, %246 : vector<8x128xf32>
      %277 = arith.addf %275, %276 : vector<8x128xf32>
      %278 = arith.mulf %249, %246 : vector<8x128xf32>
      %279 = arith.mulf %261, %243 : vector<8x128xf32>
      %280 = arith.subf %278, %279 : vector<8x128xf32>
      %281 = arith.addf %155, %277 : vector<8x128xf32>
      %282 = arith.addf %156, %280 : vector<8x128xf32>
      %283 = arith.mulf %252, %252 : vector<8x128xf32>
      %284 = arith.mulf %264, %264 : vector<8x128xf32>
      %285 = arith.addf %283, %284 : vector<8x128xf32>
      %286 = arith.addf %160, %285 : vector<8x128xf32>
      %287 = arith.mulf %252, %249 : vector<8x128xf32>
      %288 = arith.mulf %264, %261 : vector<8x128xf32>
      %289 = arith.addf %287, %288 : vector<8x128xf32>
      %290 = arith.mulf %252, %261 : vector<8x128xf32>
      %291 = arith.mulf %264, %249 : vector<8x128xf32>
      %292 = arith.subf %290, %291 : vector<8x128xf32>
      %293 = arith.addf %167, %289 : vector<8x128xf32>
      %294 = arith.addf %168, %292 : vector<8x128xf32>
      %295 = arith.mulf %252, %243 : vector<8x128xf32>
      %296 = arith.mulf %264, %246 : vector<8x128xf32>
      %297 = arith.addf %295, %296 : vector<8x128xf32>
      %298 = arith.mulf %252, %246 : vector<8x128xf32>
      %299 = arith.mulf %264, %243 : vector<8x128xf32>
      %300 = arith.subf %298, %299 : vector<8x128xf32>
      %301 = arith.addf %175, %297 : vector<8x128xf32>
      %302 = arith.addf %176, %300 : vector<8x128xf32>
      %303 = arith.mulf %255, %255 : vector<8x128xf32>
      %304 = arith.mulf %267, %267 : vector<8x128xf32>
      %305 = arith.addf %303, %304 : vector<8x128xf32>
      %306 = arith.addf %180, %305 : vector<8x128xf32>
      %307 = arith.mulf %255, %249 : vector<8x128xf32>
      %308 = arith.mulf %267, %261 : vector<8x128xf32>
      %309 = arith.addf %307, %308 : vector<8x128xf32>
      %310 = arith.mulf %255, %261 : vector<8x128xf32>
      %311 = arith.mulf %267, %249 : vector<8x128xf32>
      %312 = arith.subf %310, %311 : vector<8x128xf32>
      %313 = arith.addf %187, %309 : vector<8x128xf32>
      %314 = arith.addf %188, %312 : vector<8x128xf32>
      %315 = arith.mulf %255, %252 : vector<8x128xf32>
      %316 = arith.mulf %267, %264 : vector<8x128xf32>
      %317 = arith.addf %315, %316 : vector<8x128xf32>
      %318 = arith.mulf %255, %264 : vector<8x128xf32>
      %319 = arith.mulf %267, %252 : vector<8x128xf32>
      %320 = arith.subf %318, %319 : vector<8x128xf32>
      %321 = arith.addf %195, %317 : vector<8x128xf32>
      %322 = arith.addf %196, %320 : vector<8x128xf32>
      %323 = arith.mulf %255, %243 : vector<8x128xf32>
      %324 = arith.mulf %267, %246 : vector<8x128xf32>
      %325 = arith.addf %323, %324 : vector<8x128xf32>
      %326 = arith.mulf %255, %246 : vector<8x128xf32>
      %327 = arith.mulf %267, %243 : vector<8x128xf32>
      %328 = arith.subf %326, %327 : vector<8x128xf32>
      %329 = arith.addf %203, %325 : vector<8x128xf32>
      %330 = arith.addf %204, %328 : vector<8x128xf32>
      %331 = arith.mulf %258, %258 : vector<8x128xf32>
      %332 = arith.mulf %270, %270 : vector<8x128xf32>
      %333 = arith.addf %331, %332 : vector<8x128xf32>
      %334 = arith.addf %208, %333 : vector<8x128xf32>
      %335 = arith.mulf %258, %249 : vector<8x128xf32>
      %336 = arith.mulf %270, %261 : vector<8x128xf32>
      %337 = arith.addf %335, %336 : vector<8x128xf32>
      %338 = arith.mulf %258, %261 : vector<8x128xf32>
      %339 = arith.mulf %270, %249 : vector<8x128xf32>
      %340 = arith.subf %338, %339 : vector<8x128xf32>
      %341 = arith.addf %215, %337 : vector<8x128xf32>
      %342 = arith.addf %216, %340 : vector<8x128xf32>
      %343 = arith.mulf %258, %252 : vector<8x128xf32>
      %344 = arith.mulf %270, %264 : vector<8x128xf32>
      %345 = arith.addf %343, %344 : vector<8x128xf32>
      %346 = arith.mulf %258, %264 : vector<8x128xf32>
      %347 = arith.mulf %270, %252 : vector<8x128xf32>
      %348 = arith.subf %346, %347 : vector<8x128xf32>
      %349 = arith.addf %223, %345 : vector<8x128xf32>
      %350 = arith.addf %224, %348 : vector<8x128xf32>
      %351 = arith.mulf %258, %255 : vector<8x128xf32>
      %352 = arith.mulf %270, %267 : vector<8x128xf32>
      %353 = arith.addf %351, %352 : vector<8x128xf32>
      %354 = arith.mulf %258, %267 : vector<8x128xf32>
      %355 = arith.mulf %270, %255 : vector<8x128xf32>
      %356 = arith.subf %354, %355 : vector<8x128xf32>
      %357 = arith.addf %231, %353 : vector<8x128xf32>
      %358 = arith.addf %232, %356 : vector<8x128xf32>
      %359 = arith.mulf %258, %243 : vector<8x128xf32>
      %360 = arith.mulf %270, %246 : vector<8x128xf32>
      %361 = arith.addf %359, %360 : vector<8x128xf32>
      %362 = arith.mulf %258, %246 : vector<8x128xf32>
      %363 = arith.mulf %270, %243 : vector<8x128xf32>
      %364 = arith.subf %362, %363 : vector<8x128xf32>
      %365 = arith.addf %239, %361 : vector<8x128xf32>
      %366 = arith.addf %240, %364 : vector<8x128xf32>
      %c3_68 = arith.constant 3 : index
      %367 = arith.index_cast %arg5 : i32 to index
      %c0_69 = arith.constant 0 : index
      %c0_70 = arith.constant 0 : index
      %368 = vector.load %arg3[%c3_68, %367, %c0_69, %c0_70] : memref<8x2x8x128xf32, #tpu.memory_space<vmem>>, vector<1x1x8x128xf32>
      %369 = vector.shape_cast %368 : vector<1x1x8x128xf32> to vector<8x128xf32>
      %c7_71 = arith.constant 7 : index
      %370 = arith.index_cast %arg5 : i32 to index
      %c0_72 = arith.constant 0 : index
      %c0_73 = arith.constant 0 : index
      %371 = vector.load %arg3[%c7_71, %370, %c0_72, %c0_73] : memref<8x2x8x128xf32, #tpu.memory_space<vmem>>, vector<1x1x8x128xf32>
      %372 = vector.shape_cast %371 : vector<1x1x8x128xf32> to vector<8x128xf32>
      %c12 = arith.constant 12 : index
      %373 = arith.index_cast %arg5 : i32 to index
      %c0_74 = arith.constant 0 : index
      %c0_75 = arith.constant 0 : index
      %374 = vector.load %arg2[%c12, %373, %c0_74, %c0_75] : memref<32x2x8x128xf32, #tpu.memory_space<vmem>>, vector<1x1x8x128xf32>
      %375 = vector.shape_cast %374 : vector<1x1x8x128xf32> to vector<8x128xf32>
      %c13 = arith.constant 13 : index
      %376 = arith.index_cast %arg5 : i32 to index
      %c0_76 = arith.constant 0 : index
      %c0_77 = arith.constant 0 : index
      %377 = vector.load %arg2[%c13, %376, %c0_76, %c0_77] : memref<32x2x8x128xf32, #tpu.memory_space<vmem>>, vector<1x1x8x128xf32>
      %378 = vector.shape_cast %377 : vector<1x1x8x128xf32> to vector<8x128xf32>
      %c14 = arith.constant 14 : index
      %379 = arith.index_cast %arg5 : i32 to index
      %c0_78 = arith.constant 0 : index
      %c0_79 = arith.constant 0 : index
      %380 = vector.load %arg2[%c14, %379, %c0_78, %c0_79] : memref<32x2x8x128xf32, #tpu.memory_space<vmem>>, vector<1x1x8x128xf32>
      %381 = vector.shape_cast %380 : vector<1x1x8x128xf32> to vector<8x128xf32>
      %c15 = arith.constant 15 : index
      %382 = arith.index_cast %arg5 : i32 to index
      %c0_80 = arith.constant 0 : index
      %c0_81 = arith.constant 0 : index
      %383 = vector.load %arg2[%c15, %382, %c0_80, %c0_81] : memref<32x2x8x128xf32, #tpu.memory_space<vmem>>, vector<1x1x8x128xf32>
      %384 = vector.shape_cast %383 : vector<1x1x8x128xf32> to vector<8x128xf32>
      %c28 = arith.constant 28 : index
      %385 = arith.index_cast %arg5 : i32 to index
      %c0_82 = arith.constant 0 : index
      %c0_83 = arith.constant 0 : index
      %386 = vector.load %arg2[%c28, %385, %c0_82, %c0_83] : memref<32x2x8x128xf32, #tpu.memory_space<vmem>>, vector<1x1x8x128xf32>
      %387 = vector.shape_cast %386 : vector<1x1x8x128xf32> to vector<8x128xf32>
      %c29 = arith.constant 29 : index
      %388 = arith.index_cast %arg5 : i32 to index
      %c0_84 = arith.constant 0 : index
      %c0_85 = arith.constant 0 : index
      %389 = vector.load %arg2[%c29, %388, %c0_84, %c0_85] : memref<32x2x8x128xf32, #tpu.memory_space<vmem>>, vector<1x1x8x128xf32>
      %390 = vector.shape_cast %389 : vector<1x1x8x128xf32> to vector<8x128xf32>
      %c30 = arith.constant 30 : index
      %391 = arith.index_cast %arg5 : i32 to index
      %c0_86 = arith.constant 0 : index
      %c0_87 = arith.constant 0 : index
      %392 = vector.load %arg2[%c30, %391, %c0_86, %c0_87] : memref<32x2x8x128xf32, #tpu.memory_space<vmem>>, vector<1x1x8x128xf32>
      %393 = vector.shape_cast %392 : vector<1x1x8x128xf32> to vector<8x128xf32>
      %c31 = arith.constant 31 : index
      %394 = arith.index_cast %arg5 : i32 to index
      %c0_88 = arith.constant 0 : index
      %c0_89 = arith.constant 0 : index
      %395 = vector.load %arg2[%c31, %394, %c0_88, %c0_89] : memref<32x2x8x128xf32, #tpu.memory_space<vmem>>, vector<1x1x8x128xf32>
      %396 = vector.shape_cast %395 : vector<1x1x8x128xf32> to vector<8x128xf32>
      %397 = arith.mulf %375, %375 : vector<8x128xf32>
      %398 = arith.mulf %387, %387 : vector<8x128xf32>
      %399 = arith.addf %397, %398 : vector<8x128xf32>
      %400 = arith.addf %274, %399 : vector<8x128xf32>
      %401 = arith.mulf %375, %369 : vector<8x128xf32>
      %402 = arith.mulf %387, %372 : vector<8x128xf32>
      %403 = arith.addf %401, %402 : vector<8x128xf32>
      %404 = arith.mulf %375, %372 : vector<8x128xf32>
      %405 = arith.mulf %387, %369 : vector<8x128xf32>
      %406 = arith.subf %404, %405 : vector<8x128xf32>
      %407 = arith.addf %281, %403 : vector<8x128xf32>
      %408 = arith.addf %282, %406 : vector<8x128xf32>
      %409 = arith.mulf %378, %378 : vector<8x128xf32>
      %410 = arith.mulf %390, %390 : vector<8x128xf32>
      %411 = arith.addf %409, %410 : vector<8x128xf32>
      %412 = arith.addf %286, %411 : vector<8x128xf32>
      %413 = arith.mulf %378, %375 : vector<8x128xf32>
      %414 = arith.mulf %390, %387 : vector<8x128xf32>
      %415 = arith.addf %413, %414 : vector<8x128xf32>
      %416 = arith.mulf %378, %387 : vector<8x128xf32>
      %417 = arith.mulf %390, %375 : vector<8x128xf32>
      %418 = arith.subf %416, %417 : vector<8x128xf32>
      %419 = arith.addf %293, %415 : vector<8x128xf32>
      %420 = arith.addf %294, %418 : vector<8x128xf32>
      %421 = arith.mulf %378, %369 : vector<8x128xf32>
      %422 = arith.mulf %390, %372 : vector<8x128xf32>
      %423 = arith.addf %421, %422 : vector<8x128xf32>
      %424 = arith.mulf %378, %372 : vector<8x128xf32>
      %425 = arith.mulf %390, %369 : vector<8x128xf32>
      %426 = arith.subf %424, %425 : vector<8x128xf32>
      %427 = arith.addf %301, %423 : vector<8x128xf32>
      %428 = arith.addf %302, %426 : vector<8x128xf32>
      %429 = arith.mulf %381, %381 : vector<8x128xf32>
      %430 = arith.mulf %393, %393 : vector<8x128xf32>
      %431 = arith.addf %429, %430 : vector<8x128xf32>
      %432 = arith.addf %306, %431 : vector<8x128xf32>
      %433 = arith.mulf %381, %375 : vector<8x128xf32>
      %434 = arith.mulf %393, %387 : vector<8x128xf32>
      %435 = arith.addf %433, %434 : vector<8x128xf32>
      %436 = arith.mulf %381, %387 : vector<8x128xf32>
      %437 = arith.mulf %393, %375 : vector<8x128xf32>
      %438 = arith.subf %436, %437 : vector<8x128xf32>
      %439 = arith.addf %313, %435 : vector<8x128xf32>
      %440 = arith.addf %314, %438 : vector<8x128xf32>
      %441 = arith.mulf %381, %378 : vector<8x128xf32>
      %442 = arith.mulf %393, %390 : vector<8x128xf32>
      %443 = arith.addf %441, %442 : vector<8x128xf32>
      %444 = arith.mulf %381, %390 : vector<8x128xf32>
      %445 = arith.mulf %393, %378 : vector<8x128xf32>
      %446 = arith.subf %444, %445 : vector<8x128xf32>
      %447 = arith.addf %321, %443 : vector<8x128xf32>
      %448 = arith.addf %322, %446 : vector<8x128xf32>
      %449 = arith.mulf %381, %369 : vector<8x128xf32>
      %450 = arith.mulf %393, %372 : vector<8x128xf32>
      %451 = arith.addf %449, %450 : vector<8x128xf32>
      %452 = arith.mulf %381, %372 : vector<8x128xf32>
      %453 = arith.mulf %393, %369 : vector<8x128xf32>
      %454 = arith.subf %452, %453 : vector<8x128xf32>
      %455 = arith.addf %329, %451 : vector<8x128xf32>
      %456 = arith.addf %330, %454 : vector<8x128xf32>
      %457 = arith.mulf %384, %384 : vector<8x128xf32>
      %458 = arith.mulf %396, %396 : vector<8x128xf32>
      %459 = arith.addf %457, %458 : vector<8x128xf32>
      %460 = arith.addf %334, %459 : vector<8x128xf32>
      %461 = arith.mulf %384, %375 : vector<8x128xf32>
      %462 = arith.mulf %396, %387 : vector<8x128xf32>
      %463 = arith.addf %461, %462 : vector<8x128xf32>
      %464 = arith.mulf %384, %387 : vector<8x128xf32>
      %465 = arith.mulf %396, %375 : vector<8x128xf32>
      %466 = arith.subf %464, %465 : vector<8x128xf32>
      %467 = arith.addf %341, %463 : vector<8x128xf32>
      %468 = arith.addf %342, %466 : vector<8x128xf32>
      %469 = arith.mulf %384, %378 : vector<8x128xf32>
      %470 = arith.mulf %396, %390 : vector<8x128xf32>
      %471 = arith.addf %469, %470 : vector<8x128xf32>
      %472 = arith.mulf %384, %390 : vector<8x128xf32>
      %473 = arith.mulf %396, %378 : vector<8x128xf32>
      %474 = arith.subf %472, %473 : vector<8x128xf32>
      %475 = arith.addf %349, %471 : vector<8x128xf32>
      %476 = arith.addf %350, %474 : vector<8x128xf32>
      %477 = arith.mulf %384, %381 : vector<8x128xf32>
      %478 = arith.mulf %396, %393 : vector<8x128xf32>
      %479 = arith.addf %477, %478 : vector<8x128xf32>
      %480 = arith.mulf %384, %393 : vector<8x128xf32>
      %481 = arith.mulf %396, %381 : vector<8x128xf32>
      %482 = arith.subf %480, %481 : vector<8x128xf32>
      %483 = arith.addf %357, %479 : vector<8x128xf32>
      %484 = arith.addf %358, %482 : vector<8x128xf32>
      %485 = arith.mulf %384, %369 : vector<8x128xf32>
      %486 = arith.mulf %396, %372 : vector<8x128xf32>
      %487 = arith.addf %485, %486 : vector<8x128xf32>
      %488 = arith.mulf %384, %372 : vector<8x128xf32>
      %489 = arith.mulf %396, %369 : vector<8x128xf32>
      %490 = arith.subf %488, %489 : vector<8x128xf32>
      %491 = arith.addf %365, %487 : vector<8x128xf32>
      %492 = arith.addf %366, %490 : vector<8x128xf32>
      %cst = arith.constant 9.99999997E-7 : f32
      %493 = vector.broadcast %cst : f32 to vector<8x128xf32>
      %494 = arith.addf %400, %493 : vector<8x128xf32>
      %495 = tpu.reciprocal %494 {approx = true} : vector<8x128xf32> -> vector<8x128xf32>
      %496 = arith.mulf %419, %495 : vector<8x128xf32>
      %497 = arith.mulf %420, %495 : vector<8x128xf32>
      %498 = arith.mulf %439, %495 : vector<8x128xf32>
      %499 = arith.mulf %440, %495 : vector<8x128xf32>
      %500 = arith.mulf %467, %495 : vector<8x128xf32>
      %501 = arith.mulf %468, %495 : vector<8x128xf32>
      %502 = arith.mulf %419, %419 : vector<8x128xf32>
      %503 = arith.mulf %420, %420 : vector<8x128xf32>
      %504 = arith.addf %502, %503 : vector<8x128xf32>
      %505 = arith.mulf %504, %495 : vector<8x128xf32>
      %506 = arith.subf %412, %505 : vector<8x128xf32>
      %507 = arith.mulf %439, %439 : vector<8x128xf32>
      %508 = arith.mulf %440, %440 : vector<8x128xf32>
      %509 = arith.addf %507, %508 : vector<8x128xf32>
      %510 = arith.mulf %509, %495 : vector<8x128xf32>
      %511 = arith.subf %432, %510 : vector<8x128xf32>
      %cst_90 = arith.constant 0.000000e+00 : f32
      %512 = vector.broadcast %cst_90 : f32 to vector<8x128xf32>
      %513 = arith.subf %512, %420 : vector<8x128xf32>
      %514 = arith.mulf %498, %419 : vector<8x128xf32>
      %515 = arith.mulf %499, %513 : vector<8x128xf32>
      %516 = arith.subf %514, %515 : vector<8x128xf32>
      %517 = arith.mulf %498, %513 : vector<8x128xf32>
      %518 = arith.mulf %499, %419 : vector<8x128xf32>
      %519 = arith.addf %517, %518 : vector<8x128xf32>
      %520 = arith.subf %447, %516 : vector<8x128xf32>
      %521 = arith.subf %448, %519 : vector<8x128xf32>
      %522 = arith.mulf %467, %467 : vector<8x128xf32>
      %523 = arith.mulf %468, %468 : vector<8x128xf32>
      %524 = arith.addf %522, %523 : vector<8x128xf32>
      %525 = arith.mulf %524, %495 : vector<8x128xf32>
      %526 = arith.subf %460, %525 : vector<8x128xf32>
      %cst_91 = arith.constant 0.000000e+00 : f32
      %527 = vector.broadcast %cst_91 : f32 to vector<8x128xf32>
      %528 = arith.subf %527, %420 : vector<8x128xf32>
      %529 = arith.mulf %500, %419 : vector<8x128xf32>
      %530 = arith.mulf %501, %528 : vector<8x128xf32>
      %531 = arith.subf %529, %530 : vector<8x128xf32>
      %532 = arith.mulf %500, %528 : vector<8x128xf32>
      %533 = arith.mulf %501, %419 : vector<8x128xf32>
      %534 = arith.addf %532, %533 : vector<8x128xf32>
      %535 = arith.subf %475, %531 : vector<8x128xf32>
      %536 = arith.subf %476, %534 : vector<8x128xf32>
      %cst_92 = arith.constant 0.000000e+00 : f32
      %537 = vector.broadcast %cst_92 : f32 to vector<8x128xf32>
      %538 = arith.subf %537, %440 : vector<8x128xf32>
      %539 = arith.mulf %500, %439 : vector<8x128xf32>
      %540 = arith.mulf %501, %538 : vector<8x128xf32>
      %541 = arith.subf %539, %540 : vector<8x128xf32>
      %542 = arith.mulf %500, %538 : vector<8x128xf32>
      %543 = arith.mulf %501, %439 : vector<8x128xf32>
      %544 = arith.addf %542, %543 : vector<8x128xf32>
      %545 = arith.subf %483, %541 : vector<8x128xf32>
      %546 = arith.subf %484, %544 : vector<8x128xf32>
      %cst_93 = arith.constant 9.99999997E-7 : f32
      %547 = vector.broadcast %cst_93 : f32 to vector<8x128xf32>
      %548 = arith.addf %506, %547 : vector<8x128xf32>
      %549 = tpu.reciprocal %548 {approx = true} : vector<8x128xf32> -> vector<8x128xf32>
      %550 = arith.mulf %520, %549 : vector<8x128xf32>
      %551 = arith.mulf %521, %549 : vector<8x128xf32>
      %552 = arith.mulf %535, %549 : vector<8x128xf32>
      %553 = arith.mulf %536, %549 : vector<8x128xf32>
      %554 = arith.mulf %520, %520 : vector<8x128xf32>
      %555 = arith.mulf %521, %521 : vector<8x128xf32>
      %556 = arith.addf %554, %555 : vector<8x128xf32>
      %557 = arith.mulf %556, %549 : vector<8x128xf32>
      %558 = arith.subf %511, %557 : vector<8x128xf32>
      %559 = arith.mulf %535, %535 : vector<8x128xf32>
      %560 = arith.mulf %536, %536 : vector<8x128xf32>
      %561 = arith.addf %559, %560 : vector<8x128xf32>
      %562 = arith.mulf %561, %549 : vector<8x128xf32>
      %563 = arith.subf %526, %562 : vector<8x128xf32>
      %cst_94 = arith.constant 0.000000e+00 : f32
      %564 = vector.broadcast %cst_94 : f32 to vector<8x128xf32>
      %565 = arith.subf %564, %521 : vector<8x128xf32>
      %566 = arith.mulf %552, %520 : vector<8x128xf32>
      %567 = arith.mulf %553, %565 : vector<8x128xf32>
      %568 = arith.subf %566, %567 : vector<8x128xf32>
      %569 = arith.mulf %552, %565 : vector<8x128xf32>
      %570 = arith.mulf %553, %520 : vector<8x128xf32>
      %571 = arith.addf %569, %570 : vector<8x128xf32>
      %572 = arith.subf %545, %568 : vector<8x128xf32>
      %573 = arith.subf %546, %571 : vector<8x128xf32>
      %cst_95 = arith.constant 9.99999997E-7 : f32
      %574 = vector.broadcast %cst_95 : f32 to vector<8x128xf32>
      %575 = arith.addf %558, %574 : vector<8x128xf32>
      %576 = tpu.reciprocal %575 {approx = true} : vector<8x128xf32> -> vector<8x128xf32>
      %577 = arith.mulf %572, %576 : vector<8x128xf32>
      %578 = arith.mulf %573, %576 : vector<8x128xf32>
      %579 = arith.mulf %572, %572 : vector<8x128xf32>
      %580 = arith.mulf %573, %573 : vector<8x128xf32>
      %581 = arith.addf %579, %580 : vector<8x128xf32>
      %582 = arith.mulf %581, %576 : vector<8x128xf32>
      %583 = arith.subf %563, %582 : vector<8x128xf32>
      %cst_96 = arith.constant 9.99999997E-7 : f32
      %584 = vector.broadcast %cst_96 : f32 to vector<8x128xf32>
      %585 = arith.addf %583, %584 : vector<8x128xf32>
      %586 = tpu.reciprocal %585 {approx = true} : vector<8x128xf32> -> vector<8x128xf32>
      %cst_97 = arith.constant 0.000000e+00 : f32
      %587 = vector.broadcast %cst_97 : f32 to vector<8x128xf32>
      %588 = arith.subf %587, %496 : vector<8x128xf32>
      %cst_98 = arith.constant 0.000000e+00 : f32
      %589 = vector.broadcast %cst_98 : f32 to vector<8x128xf32>
      %590 = arith.subf %589, %497 : vector<8x128xf32>
      %591 = arith.mulf %550, %588 : vector<8x128xf32>
      %592 = arith.mulf %551, %590 : vector<8x128xf32>
      %593 = arith.subf %591, %592 : vector<8x128xf32>
      %594 = arith.mulf %550, %590 : vector<8x128xf32>
      %595 = arith.mulf %551, %588 : vector<8x128xf32>
      %596 = arith.addf %594, %595 : vector<8x128xf32>
      %597 = arith.addf %498, %593 : vector<8x128xf32>
      %598 = arith.addf %499, %596 : vector<8x128xf32>
      %cst_99 = arith.constant 0.000000e+00 : f32
      %599 = vector.broadcast %cst_99 : f32 to vector<8x128xf32>
      %600 = arith.subf %599, %597 : vector<8x128xf32>
      %cst_100 = arith.constant 0.000000e+00 : f32
      %601 = vector.broadcast %cst_100 : f32 to vector<8x128xf32>
      %602 = arith.subf %601, %598 : vector<8x128xf32>
      %603 = arith.mulf %552, %588 : vector<8x128xf32>
      %604 = arith.mulf %553, %590 : vector<8x128xf32>
      %605 = arith.subf %603, %604 : vector<8x128xf32>
      %606 = arith.mulf %552, %590 : vector<8x128xf32>
      %607 = arith.mulf %553, %588 : vector<8x128xf32>
      %608 = arith.addf %606, %607 : vector<8x128xf32>
      %609 = arith.addf %500, %605 : vector<8x128xf32>
      %610 = arith.addf %501, %608 : vector<8x128xf32>
      %611 = arith.mulf %577, %600 : vector<8x128xf32>
      %612 = arith.mulf %578, %602 : vector<8x128xf32>
      %613 = arith.subf %611, %612 : vector<8x128xf32>
      %614 = arith.mulf %577, %602 : vector<8x128xf32>
      %615 = arith.mulf %578, %600 : vector<8x128xf32>
      %616 = arith.addf %614, %615 : vector<8x128xf32>
      %617 = arith.addf %609, %613 : vector<8x128xf32>
      %618 = arith.addf %610, %616 : vector<8x128xf32>
      %cst_101 = arith.constant 0.000000e+00 : f32
      %619 = vector.broadcast %cst_101 : f32 to vector<8x128xf32>
      %620 = arith.subf %619, %617 : vector<8x128xf32>
      %cst_102 = arith.constant 0.000000e+00 : f32
      %621 = vector.broadcast %cst_102 : f32 to vector<8x128xf32>
      %622 = arith.subf %621, %618 : vector<8x128xf32>
      %cst_103 = arith.constant 0.000000e+00 : f32
      %623 = vector.broadcast %cst_103 : f32 to vector<8x128xf32>
      %624 = arith.subf %623, %550 : vector<8x128xf32>
      %cst_104 = arith.constant 0.000000e+00 : f32
      %625 = vector.broadcast %cst_104 : f32 to vector<8x128xf32>
      %626 = arith.subf %625, %551 : vector<8x128xf32>
      %627 = arith.mulf %577, %624 : vector<8x128xf32>
      %628 = arith.mulf %578, %626 : vector<8x128xf32>
      %629 = arith.subf %627, %628 : vector<8x128xf32>
      %630 = arith.mulf %577, %626 : vector<8x128xf32>
      %631 = arith.mulf %578, %624 : vector<8x128xf32>
      %632 = arith.addf %630, %631 : vector<8x128xf32>
      %633 = arith.addf %552, %629 : vector<8x128xf32>
      %634 = arith.addf %553, %632 : vector<8x128xf32>
      %cst_105 = arith.constant 0.000000e+00 : f32
      %635 = vector.broadcast %cst_105 : f32 to vector<8x128xf32>
      %636 = arith.subf %635, %633 : vector<8x128xf32>
      %cst_106 = arith.constant 0.000000e+00 : f32
      %637 = vector.broadcast %cst_106 : f32 to vector<8x128xf32>
      %638 = arith.subf %637, %634 : vector<8x128xf32>
      %cst_107 = arith.constant 0.000000e+00 : f32
      %639 = vector.broadcast %cst_107 : f32 to vector<8x128xf32>
      %640 = arith.subf %639, %577 : vector<8x128xf32>
      %cst_108 = arith.constant 0.000000e+00 : f32
      %641 = vector.broadcast %cst_108 : f32 to vector<8x128xf32>
      %642 = arith.subf %641, %578 : vector<8x128xf32>
      %643 = arith.mulf %407, %495 : vector<8x128xf32>
      %644 = arith.mulf %408, %495 : vector<8x128xf32>
      %645 = arith.mulf %588, %407 : vector<8x128xf32>
      %646 = arith.mulf %590, %408 : vector<8x128xf32>
      %647 = arith.subf %645, %646 : vector<8x128xf32>
      %648 = arith.mulf %588, %408 : vector<8x128xf32>
      %649 = arith.mulf %590, %407 : vector<8x128xf32>
      %650 = arith.addf %648, %649 : vector<8x128xf32>
      %651 = arith.addf %427, %647 : vector<8x128xf32>
      %652 = arith.addf %428, %650 : vector<8x128xf32>
      %653 = arith.mulf %651, %549 : vector<8x128xf32>
      %654 = arith.mulf %652, %549 : vector<8x128xf32>
      %655 = arith.mulf %600, %407 : vector<8x128xf32>
      %656 = arith.mulf %602, %408 : vector<8x128xf32>
      %657 = arith.subf %655, %656 : vector<8x128xf32>
      %658 = arith.mulf %600, %408 : vector<8x128xf32>
      %659 = arith.mulf %602, %407 : vector<8x128xf32>
      %660 = arith.addf %658, %659 : vector<8x128xf32>
      %661 = arith.addf %455, %657 : vector<8x128xf32>
      %662 = arith.addf %456, %660 : vector<8x128xf32>
      %663 = arith.mulf %624, %427 : vector<8x128xf32>
      %664 = arith.mulf %626, %428 : vector<8x128xf32>
      %665 = arith.subf %663, %664 : vector<8x128xf32>
      %666 = arith.mulf %624, %428 : vector<8x128xf32>
      %667 = arith.mulf %626, %427 : vector<8x128xf32>
      %668 = arith.addf %666, %667 : vector<8x128xf32>
      %669 = arith.addf %661, %665 : vector<8x128xf32>
      %670 = arith.addf %662, %668 : vector<8x128xf32>
      %671 = arith.mulf %669, %576 : vector<8x128xf32>
      %672 = arith.mulf %670, %576 : vector<8x128xf32>
      %673 = arith.mulf %620, %407 : vector<8x128xf32>
      %674 = arith.mulf %622, %408 : vector<8x128xf32>
      %675 = arith.subf %673, %674 : vector<8x128xf32>
      %676 = arith.mulf %620, %408 : vector<8x128xf32>
      %677 = arith.mulf %622, %407 : vector<8x128xf32>
      %678 = arith.addf %676, %677 : vector<8x128xf32>
      %679 = arith.addf %491, %675 : vector<8x128xf32>
      %680 = arith.addf %492, %678 : vector<8x128xf32>
      %681 = arith.mulf %636, %427 : vector<8x128xf32>
      %682 = arith.mulf %638, %428 : vector<8x128xf32>
      %683 = arith.subf %681, %682 : vector<8x128xf32>
      %684 = arith.mulf %636, %428 : vector<8x128xf32>
      %685 = arith.mulf %638, %427 : vector<8x128xf32>
      %686 = arith.addf %684, %685 : vector<8x128xf32>
      %687 = arith.addf %679, %683 : vector<8x128xf32>
      %688 = arith.addf %680, %686 : vector<8x128xf32>
      %689 = arith.mulf %640, %455 : vector<8x128xf32>
      %690 = arith.mulf %642, %456 : vector<8x128xf32>
      %691 = arith.subf %689, %690 : vector<8x128xf32>
      %692 = arith.mulf %640, %456 : vector<8x128xf32>
      %693 = arith.mulf %642, %455 : vector<8x128xf32>
      %694 = arith.addf %692, %693 : vector<8x128xf32>
      %695 = arith.addf %687, %691 : vector<8x128xf32>
      %696 = arith.addf %688, %694 : vector<8x128xf32>
      %697 = arith.mulf %695, %586 : vector<8x128xf32>
      %698 = arith.mulf %696, %586 : vector<8x128xf32>
      %cst_109 = arith.constant 0.000000e+00 : f32
      %699 = vector.broadcast %cst_109 : f32 to vector<8x128xf32>
      %700 = arith.subf %699, %590 : vector<8x128xf32>
      %701 = arith.mulf %588, %653 : vector<8x128xf32>
      %702 = arith.mulf %700, %654 : vector<8x128xf32>
      %703 = arith.subf %701, %702 : vector<8x128xf32>
      %704 = arith.mulf %588, %654 : vector<8x128xf32>
      %705 = arith.mulf %700, %653 : vector<8x128xf32>
      %706 = arith.addf %704, %705 : vector<8x128xf32>
      %707 = arith.addf %643, %703 : vector<8x128xf32>
      %708 = arith.addf %644, %706 : vector<8x128xf32>
      %709 = arith.mulf %588, %588 : vector<8x128xf32>
      %710 = arith.mulf %590, %590 : vector<8x128xf32>
      %711 = arith.addf %709, %710 : vector<8x128xf32>
      %712 = arith.mulf %711, %549 : vector<8x128xf32>
      %713 = arith.addf %495, %712 : vector<8x128xf32>
      %cst_110 = arith.constant 0.000000e+00 : f32
      %714 = vector.broadcast %cst_110 : f32 to vector<8x128xf32>
      %715 = arith.subf %714, %602 : vector<8x128xf32>
      %716 = arith.mulf %600, %671 : vector<8x128xf32>
      %717 = arith.mulf %715, %672 : vector<8x128xf32>
      %718 = arith.subf %716, %717 : vector<8x128xf32>
      %719 = arith.mulf %600, %672 : vector<8x128xf32>
      %720 = arith.mulf %715, %671 : vector<8x128xf32>
      %721 = arith.addf %719, %720 : vector<8x128xf32>
      %722 = arith.addf %707, %718 : vector<8x128xf32>
      %723 = arith.addf %708, %721 : vector<8x128xf32>
      %724 = arith.mulf %600, %600 : vector<8x128xf32>
      %725 = arith.mulf %602, %602 : vector<8x128xf32>
      %726 = arith.addf %724, %725 : vector<8x128xf32>
      %727 = arith.mulf %726, %576 : vector<8x128xf32>
      %728 = arith.addf %713, %727 : vector<8x128xf32>
      %cst_111 = arith.constant 0.000000e+00 : f32
      %729 = vector.broadcast %cst_111 : f32 to vector<8x128xf32>
      %730 = arith.subf %729, %622 : vector<8x128xf32>
      %731 = arith.mulf %620, %697 : vector<8x128xf32>
      %732 = arith.mulf %730, %698 : vector<8x128xf32>
      %733 = arith.subf %731, %732 : vector<8x128xf32>
      %734 = arith.mulf %620, %698 : vector<8x128xf32>
      %735 = arith.mulf %730, %697 : vector<8x128xf32>
      %736 = arith.addf %734, %735 : vector<8x128xf32>
      %737 = arith.addf %722, %733 : vector<8x128xf32>
      %738 = arith.addf %723, %736 : vector<8x128xf32>
      %739 = arith.mulf %620, %620 : vector<8x128xf32>
      %740 = arith.mulf %622, %622 : vector<8x128xf32>
      %741 = arith.addf %739, %740 : vector<8x128xf32>
      %742 = arith.mulf %741, %586 : vector<8x128xf32>
      %743 = arith.addf %728, %742 : vector<8x128xf32>
      %744 = vector.broadcast %4 : f32 to vector<8x128xf32>
      %745 = arith.mulf %744, %743 : vector<8x128xf32>
      %cst_112 = arith.constant 9.99999997E-7 : f32
      %746 = vector.broadcast %cst_112 : f32 to vector<8x128xf32>
      %747 = arith.addf %745, %746 : vector<8x128xf32>
      %748 = tpu.reciprocal %747 {approx = true} : vector<8x128xf32> -> vector<8x128xf32>
      %cst_113 = arith.constant 2.82842708 : f32
      %749 = vector.broadcast %cst_113 : f32 to vector<8x128xf32>
      %750 = arith.mulf %749, %748 : vector<8x128xf32>
      %751 = arith.mulf %737, %750 : vector<8x128xf32>
      %c0_114 = arith.constant 0 : index
      %752 = arith.index_cast %arg5 : i32 to index
      %c0_115 = arith.constant 0 : index
      %c0_116 = arith.constant 0 : index
      %753 = vector.load %arg4[%c0_114, %752, %c0_115, %c0_116] : memref<8x2x8x128xf32, #tpu.memory_space<vmem>>, vector<1x1x8x128xf32>
      %754 = vector.shape_cast %753 : vector<1x1x8x128xf32> to vector<8x128xf32>
      %755 = vector.shape_cast %751 : vector<8x128xf32> to vector<1x1x8x128xf32>
      tpu.vector_store %arg4[%c0_114, %752, %c0_115, %c0_116], %755 {strides = array<i32>} : memref<8x2x8x128xf32, #tpu.memory_space<vmem>>, vector<1x1x8x128xf32>,
      %756 = arith.mulf %738, %750 : vector<8x128xf32>
      %c1_117 = arith.constant 1 : index
      %757 = arith.index_cast %arg5 : i32 to index
      %c0_118 = arith.constant 0 : index
      %c0_119 = arith.constant 0 : index
      %758 = vector.load %arg4[%c1_117, %757, %c0_118, %c0_119] : memref<8x2x8x128xf32, #tpu.memory_space<vmem>>, vector<1x1x8x128xf32>
      %759 = vector.shape_cast %758 : vector<1x1x8x128xf32> to vector<8x128xf32>
      %760 = vector.shape_cast %756 : vector<8x128xf32> to vector<1x1x8x128xf32>
      tpu.vector_store %arg4[%c1_117, %757, %c0_118, %c0_119], %760 {strides = array<i32>} : memref<8x2x8x128xf32, #tpu.memory_space<vmem>>, vector<1x1x8x128xf32>,
      %cst_120 = arith.constant 0.000000e+00 : f32
      %761 = vector.broadcast %cst_120 : f32 to vector<8x128xf32>
      %762 = arith.subf %761, %626 : vector<8x128xf32>
      %763 = arith.mulf %624, %671 : vector<8x128xf32>
      %764 = arith.mulf %762, %672 : vector<8x128xf32>
      %765 = arith.subf %763, %764 : vector<8x128xf32>
      %766 = arith.mulf %624, %672 : vector<8x128xf32>
      %767 = arith.mulf %762, %671 : vector<8x128xf32>
      %768 = arith.addf %766, %767 : vector<8x128xf32>
      %769 = arith.addf %653, %765 : vector<8x128xf32>
      %770 = arith.addf %654, %768 : vector<8x128xf32>
      %771 = arith.mulf %624, %624 : vector<8x128xf32>
      %772 = arith.mulf %626, %626 : vector<8x128xf32>
      %773 = arith.addf %771, %772 : vector<8x128xf32>
      %774 = arith.mulf %773, %576 : vector<8x128xf32>
      %775 = arith.addf %549, %774 : vector<8x128xf32>
      %cst_121 = arith.constant 0.000000e+00 : f32
      %776 = vector.broadcast %cst_121 : f32 to vector<8x128xf32>
      %777 = arith.subf %776, %638 : vector<8x128xf32>
      %778 = arith.mulf %636, %697 : vector<8x128xf32>
      %779 = arith.mulf %777, %698 : vector<8x128xf32>
      %780 = arith.subf %778, %779 : vector<8x128xf32>
      %781 = arith.mulf %636, %698 : vector<8x128xf32>
      %782 = arith.mulf %777, %697 : vector<8x128xf32>
      %783 = arith.addf %781, %782 : vector<8x128xf32>
      %784 = arith.addf %769, %780 : vector<8x128xf32>
      %785 = arith.addf %770, %783 : vector<8x128xf32>
      %786 = arith.mulf %636, %636 : vector<8x128xf32>
      %787 = arith.mulf %638, %638 : vector<8x128xf32>
      %788 = arith.addf %786, %787 : vector<8x128xf32>
      %789 = arith.mulf %788, %586 : vector<8x128xf32>
      %790 = arith.addf %775, %789 : vector<8x128xf32>
      %791 = vector.broadcast %4 : f32 to vector<8x128xf32>
      %792 = arith.mulf %791, %790 : vector<8x128xf32>
      %cst_122 = arith.constant 9.99999997E-7 : f32
      %793 = vector.broadcast %cst_122 : f32 to vector<8x128xf32>
      %794 = arith.addf %792, %793 : vector<8x128xf32>
      %795 = tpu.reciprocal %794 {approx = true} : vector<8x128xf32> -> vector<8x128xf32>
      %cst_123 = arith.constant 2.82842708 : f32
      %796 = vector.broadcast %cst_123 : f32 to vector<8x128xf32>
      %797 = arith.mulf %796, %795 : vector<8x128xf32>
      %798 = arith.mulf %784, %797 : vector<8x128xf32>
      %c2_124 = arith.constant 2 : index
      %799 = arith.index_cast %arg5 : i32 to index
      %c0_125 = arith.constant 0 : index
      %c0_126 = arith.constant 0 : index
      %800 = vector.load %arg4[%c2_124, %799, %c0_125, %c0_126] : memref<8x2x8x128xf32, #tpu.memory_space<vmem>>, vector<1x1x8x128xf32>
      %801 = vector.shape_cast %800 : vector<1x1x8x128xf32> to vector<8x128xf32>
      %802 = vector.shape_cast %798 : vector<8x128xf32> to vector<1x1x8x128xf32>
      tpu.vector_store %arg4[%c2_124, %799, %c0_125, %c0_126], %802 {strides = array<i32>} : memref<8x2x8x128xf32, #tpu.memory_space<vmem>>, vector<1x1x8x128xf32>,
      %803 = arith.mulf %785, %797 : vector<8x128xf32>
      %c3_127 = arith.constant 3 : index
      %804 = arith.index_cast %arg5 : i32 to index
      %c0_128 = arith.constant 0 : index
      %c0_129 = arith.constant 0 : index
      %805 = vector.load %arg4[%c3_127, %804, %c0_128, %c0_129] : memref<8x2x8x128xf32, #tpu.memory_space<vmem>>, vector<1x1x8x128xf32>
      %806 = vector.shape_cast %805 : vector<1x1x8x128xf32> to vector<8x128xf32>
      %807 = vector.shape_cast %803 : vector<8x128xf32> to vector<1x1x8x128xf32>
      tpu.vector_store %arg4[%c3_127, %804, %c0_128, %c0_129], %807 {strides = array<i32>} : memref<8x2x8x128xf32, #tpu.memory_space<vmem>>, vector<1x1x8x128xf32>,
      %cst_130 = arith.constant 0.000000e+00 : f32
      %808 = vector.broadcast %cst_130 : f32 to vector<8x128xf32>
      %809 = arith.subf %808, %642 : vector<8x128xf32>
      %810 = arith.mulf %640, %697 : vector<8x128xf32>
      %811 = arith.mulf %809, %698 : vector<8x128xf32>
      %812 = arith.subf %810, %811 : vector<8x128xf32>
      %813 = arith.mulf %640, %698 : vector<8x128xf32>
      %814 = arith.mulf %809, %697 : vector<8x128xf32>
      %815 = arith.addf %813, %814 : vector<8x128xf32>
      %816 = arith.addf %671, %812 : vector<8x128xf32>
      %817 = arith.addf %672, %815 : vector<8x128xf32>
      %818 = arith.mulf %640, %640 : vector<8x128xf32>
      %819 = arith.mulf %642, %642 : vector<8x128xf32>
      %820 = arith.addf %818, %819 : vector<8x128xf32>
      %821 = arith.mulf %820, %586 : vector<8x128xf32>
      %822 = arith.addf %576, %821 : vector<8x128xf32>
      %823 = vector.broadcast %4 : f32 to vector<8x128xf32>
      %824 = arith.mulf %823, %822 : vector<8x128xf32>
      %cst_131 = arith.constant 9.99999997E-7 : f32
      %825 = vector.broadcast %cst_131 : f32 to vector<8x128xf32>
      %826 = arith.addf %824, %825 : vector<8x128xf32>
      %827 = tpu.reciprocal %826 {approx = true} : vector<8x128xf32> -> vector<8x128xf32>
      %cst_132 = arith.constant 2.82842708 : f32
      %828 = vector.broadcast %cst_132 : f32 to vector<8x128xf32>
      %829 = arith.mulf %828, %827 : vector<8x128xf32>
      %830 = arith.mulf %816, %829 : vector<8x128xf32>
      %c4_133 = arith.constant 4 : index
      %831 = arith.index_cast %arg5 : i32 to index
      %c0_134 = arith.constant 0 : index
      %c0_135 = arith.constant 0 : index
      %832 = vector.load %arg4[%c4_133, %831, %c0_134, %c0_135] : memref<8x2x8x128xf32, #tpu.memory_space<vmem>>, vector<1x1x8x128xf32>
      %833 = vector.shape_cast %832 : vector<1x1x8x128xf32> to vector<8x128xf32>
      %834 = vector.shape_cast %830 : vector<8x128xf32> to vector<1x1x8x128xf32>
      tpu.vector_store %arg4[%c4_133, %831, %c0_134, %c0_135], %834 {strides = array<i32>} : memref<8x2x8x128xf32, #tpu.memory_space<vmem>>, vector<1x1x8x128xf32>,
      %835 = arith.mulf %817, %829 : vector<8x128xf32>
      %c5_136 = arith.constant 5 : index
      %836 = arith.index_cast %arg5 : i32 to index
      %c0_137 = arith.constant 0 : index
      %c0_138 = arith.constant 0 : index
      %837 = vector.load %arg4[%c5_136, %836, %c0_137, %c0_138] : memref<8x2x8x128xf32, #tpu.memory_space<vmem>>, vector<1x1x8x128xf32>
      %838 = vector.shape_cast %837 : vector<1x1x8x128xf32> to vector<8x128xf32>
      %839 = vector.shape_cast %835 : vector<8x128xf32> to vector<1x1x8x128xf32>
      tpu.vector_store %arg4[%c5_136, %836, %c0_137, %c0_138], %839 {strides = array<i32>} : memref<8x2x8x128xf32, #tpu.memory_space<vmem>>, vector<1x1x8x128xf32>,
      %840 = vector.broadcast %4 : f32 to vector<8x128xf32>
      %841 = arith.mulf %840, %586 : vector<8x128xf32>
      %cst_139 = arith.constant 9.99999997E-7 : f32
      %842 = vector.broadcast %cst_139 : f32 to vector<8x128xf32>
      %843 = arith.addf %841, %842 : vector<8x128xf32>
      %844 = tpu.reciprocal %843 {approx = true} : vector<8x128xf32> -> vector<8x128xf32>
      %cst_140 = arith.constant 2.82842708 : f32
      %845 = vector.broadcast %cst_140 : f32 to vector<8x128xf32>
      %846 = arith.mulf %845, %844 : vector<8x128xf32>
      %847 = arith.mulf %697, %846 : vector<8x128xf32>
      %c6_141 = arith.constant 6 : index
      %848 = arith.index_cast %arg5 : i32 to index
      %c0_142 = arith.constant 0 : index
      %c0_143 = arith.constant 0 : index
      %849 = vector.load %arg4[%c6_141, %848, %c0_142, %c0_143] : memref<8x2x8x128xf32, #tpu.memory_space<vmem>>, vector<1x1x8x128xf32>
      %850 = vector.shape_cast %849 : vector<1x1x8x128xf32> to vector<8x128xf32>
      %851 = vector.shape_cast %847 : vector<8x128xf32> to vector<1x1x8x128xf32>
      tpu.vector_store %arg4[%c6_141, %848, %c0_142, %c0_143], %851 {strides = array<i32>} : memref<8x2x8x128xf32, #tpu.memory_space<vmem>>, vector<1x1x8x128xf32>,
      %852 = arith.mulf %698, %846 : vector<8x128xf32>
      %c7_144 = arith.constant 7 : index
      %853 = arith.index_cast %arg5 : i32 to index
      %c0_145 = arith.constant 0 : index
      %c0_146 = arith.constant 0 : index
      %854 = vector.load %arg4[%c7_144, %853, %c0_145, %c0_146] : memref<8x2x8x128xf32, #tpu.memory_space<vmem>>, vector<1x1x8x128xf32>
      %855 = vector.shape_cast %854 : vector<1x1x8x128xf32> to vector<8x128xf32>
      %856 = vector.shape_cast %852 : vector<8x128xf32> to vector<1x1x8x128xf32>
      tpu.vector_store %arg4[%c7_144, %853, %c0_145, %c0_146], %856 {strides = array<i32>} : memref<8x2x8x128xf32, #tpu.memory_space<vmem>>, vector<1x1x8x128xf32>,
    }
    %c2_i32_0 = arith.constant 2 : i32
    return
  }
  func.func @transform_0(%arg0: i32, %arg1: memref<4xf32, #tpu.memory_space<smem>>) -> (i32, i32, i32, i32) {
    %c0_i32 = arith.constant 0 : i32
    %c0_i32_0 = arith.constant 0 : i32
    %c0_i32_1 = arith.constant 0 : i32
    %c0_i32_2 = arith.constant 0 : i32
    return %c0_i32, %arg0, %c0_i32_0, %c0_i32_1 : i32, i32, i32, i32
  }
  func.func @transform_1(%arg0: i32, %arg1: memref<4xf32, #tpu.memory_space<smem>>) -> (i32, i32, i32, i32) {
    %c0_i32 = arith.constant 0 : i32
    %c0_i32_0 = arith.constant 0 : i32
    %c0_i32_1 = arith.constant 0 : i32
    %c0_i32_2 = arith.constant 0 : i32
    return %c0_i32, %arg0, %c0_i32_0, %c0_i32_1 : i32, i32, i32, i32
  }
  func.func @transform_2(%arg0: i32, %arg1: memref<4xf32, #tpu.memory_space<smem>>) -> (i32, i32, i32, i32) {
    %c0_i32 = arith.constant 0 : i32
    %c0_i32_0 = arith.constant 0 : i32
    %c0_i32_1 = arith.constant 0 : i32
    %c0_i32_2 = arith.constant 0 : i32
    return %c0_i32, %arg0, %c0_i32_0, %c0_i32_1 : i32, i32, i32, i32
  }
}

</mosaic_0001>

<bundles_post_ra>
// kernel: custom-call.1
= control target key start
LH: loop header
LB: loop body
LE: loop exit
PB: predicated region body
PF: predicated region fallthrough
CT: control target
= control target key end

     0   :  { %s59_s0 = inlined_call_operand.hbm [shape: c64[2,2,2], index: 0, kind: input, shape index: {}]   ;;  %s60_s1 = inlined_call_operand.vmem [shape: f32[2,2,2], index: 1, kind: output, shape index: {}]  }
   0x1   :  { %s2_s8 = scalar_lea.hbm %s59_s0, 64 }
   0x2   :  { %3 = vsyncpa [#allocation0], 0  ;;  %s4_s11 = sshll.u32 %s60_s1, 4  ;;  %s34_s14 = scalar_lea.hbm %s59_s0, 128  ;;  %s5_s11 = int_to_ptr.vmem [resolvable:$true] %s4_s11 }
   0x3   :  { %p11_p0 = scmp.ne.s32.totalorder %s2_s8, %s34_s14  ;;  %p13_p1 = scmp.lt.u32.totalorder %s2_s8, %s59_s0 }
   0x4   :  { %p14_p2 = scmp.lt.u32.totalorder %s34_s14, %s34_s14  ;;  %p16_p4 = scmp.lt.u32.totalorder %s34_s14, %s2_s8 }
   0x6   :  { %p15_p3 = por %p14_p2, %p13_p1 }
   0x8   :  { %p17_p5 = por %p16_p4, %p15_p3 }
   0xa   :  { %p18_p6 = pnand %p17_p5, %p11_p0 }
   0xc   :  { %21 = shalt.err (!%p18_p6)  }
   0xd   :  { %s22_s17 = scalar_lea.vmem %s5_s11, 64  ;;  %p27_p8 = scmp.lt.s32.totalorder %s5_s11, %s5_s11 }
   0xe   :  { %p23_p7 = scmp.ne.s32.totalorder %s5_s11, %s22_s17  ;;  %p28_p9 = scmp.lt.s32.totalorder %s22_s17, %s22_s17 }
  0x10   :  { %p29_p10 = por %p28_p9, %p27_p8 }
  0x12   :  { %p30_p11 = pnand %p29_p10, %p23_p7 }
  0x14   :  { %33 = shalt.err (!%p30_p11)  }
  0x15   :  { %7 = dma.hbm_to_vmem [thread:$0]  %s2_s8, 64, %s5_s11, [#allocation0] }
  0x16   :  { %35 = dma.done.wait [#allocation0], 64  }
  0x17   :  { %36 = vsyncadd [#allocation0], 4294967232 }
  0x18   :  { %9 = vsyncpa [#allocation0], 1 }

// kernel: custom-call
= control target key start
LH: loop header
LB: loop body
LE: loop exit
PB: predicated region body
PF: predicated region fallthrough
CT: control target
= control target key end

     0   :  { %2 = vsyncpa [#allocation0], 0  ;;  %s61_s0 = inlined_call_operand.hbm [shape: c64[2,2,2], index: 0, kind: input, shape index: {}]   ;;  %s62_s1 = inlined_call_operand.vmem [shape: f32[2,2,2], index: 1, kind: output, shape index: {}]  }
   0x1   :  { %s3_s8 = sshll.u32 %s62_s1, 4  ;;  %s9_s11 = scalar_lea.hbm %s61_s0, 64  ;;  %s4_s8 = int_to_ptr.vmem [resolvable:$true] %s3_s8 }
   0x2   :  { %p10_p0 = scmp.ne.s32.totalorder %s61_s0, %s9_s11  ;;  %s11_s16 = scalar_lea.hbm %s61_s0, 128 }
   0x3   :  { %p12_p1 = scmp.lt.u32.totalorder %s11_s16, %s9_s11  ;;  %p13_p2 = scmp.lt.u32.totalorder %s9_s11, %s61_s0 }
   0x5   :  { %p14_p3 = por %p13_p2, %p12_p1 }
   0x7   :  { %p15_p4 = pnand %p14_p3, %p10_p0 }
   0x9   :  { %18 = shalt.err (!%p15_p4)  }
   0xa   :  { %s19_s1 = scalar_lea.vmem %s4_s8, 64  ;;  %p24_p6 = scmp.lt.s32.totalorder %s4_s8, %s4_s8 }
   0xb   :  { %p20_p5 = scmp.ne.s32.totalorder %s4_s8, %s19_s1  ;;  %p25_p7 = scmp.lt.s32.totalorder %s19_s1, %s19_s1 }
   0xd   :  { %p26_p8 = por %p25_p7, %p24_p6 }
   0xf   :  { %p27_p9 = pnand %p26_p8, %p20_p5 }
  0x11   :  { %30 = shalt.err (!%p27_p9)  }
  0x12   :  { %6 = dma.hbm_to_vmem [thread:$0]  %s61_s0, 64, %s4_s8, [#allocation0] }
  0x13   :  { %31 = dma.done.wait [#allocation0], 64  }
  0x14   :  { %32 = vsyncadd [#allocation0], 4294967232 }
  0x15   :  { %8 = vsyncpa [#allocation0], 1 }

// kernel: custom-call.5
= control target key start
LH: loop header
LB: loop body
LE: loop exit
PB: predicated region body
PF: predicated region fallthrough
CT: control target
= control target key end

     0   :  { %s59_s0 = inlined_call_operand.hbm [shape: c64[2,1,4,4,512], index: 0, kind: input, shape index: {}]   ;;  %s60_s1 = inlined_call_operand.vmem [shape: f32[2,1,4,4,512], index: 1, kind: output, shape index: {}]  }
   0x1   :  { %s2_s8 = scalar_lea.hbm %s59_s0, 2048 }
   0x2   :  { %3 = vsyncpa [#allocation0], 0  ;;  %s4_s11 = sshll.u32 %s60_s1, 4  ;;  %s34_s14 = scalar_lea.hbm %s59_s0, 4096  ;;  %s5_s11 = int_to_ptr.vmem [resolvable:$true] %s4_s11 }
   0x3   :  { %p11_p0 = scmp.ne.s32.totalorder %s2_s8, %s34_s14  ;;  %p13_p1 = scmp.lt.u32.totalorder %s2_s8, %s59_s0 }
   0x4   :  { %p14_p2 = scmp.lt.u32.totalorder %s34_s14, %s34_s14  ;;  %p16_p4 = scmp.lt.u32.totalorder %s34_s14, %s2_s8 }
   0x6   :  { %p15_p3 = por %p14_p2, %p13_p1 }
   0x8   :  { %p17_p5 = por %p16_p4, %p15_p3 }
   0xa   :  { %p18_p6 = pnand %p17_p5, %p11_p0 }
   0xc   :  { %21 = shalt.err (!%p18_p6)  }
   0xd   :  { %s22_s17 = scalar_lea.vmem %s5_s11, 2048  ;;  %p27_p8 = scmp.lt.s32.totalorder %s5_s11, %s5_s11 }
   0xe   :  { %p23_p7 = scmp.ne.s32.totalorder %s5_s11, %s22_s17  ;;  %p28_p9 = scmp.lt.s32.totalorder %s22_s17, %s22_s17 }
  0x10   :  { %p29_p10 = por %p28_p9, %p27_p8 }
  0x12   :  { %p30_p11 = pnand %p29_p10, %p23_p7 }
  0x14   :  { %33 = shalt.err (!%p30_p11)  }
  0x15   :  { %7 = dma.hbm_to_vmem [thread:$0]  %s2_s8, 2048, %s5_s11, [#allocation0] }
  0x16   :  { %35 = dma.done.wait [#allocation0], 2048  }
  0x17   :  { %36 = vsyncadd [#allocation0], 4294965248 }
  0x18   :  { %9 = vsyncpa [#allocation0], 1 }

// kernel: custom-call.4
= control target key start
LH: loop header
LB: loop body
LE: loop exit
PB: predicated region body
PF: predicated region fallthrough
CT: control target
= control target key end

     0   :  { %2 = vsyncpa [#allocation0], 0  ;;  %s61_s0 = inlined_call_operand.hbm [shape: c64[2,1,4,4,512], index: 0, kind: input, shape index: {}]   ;;  %s62_s1 = inlined_call_operand.vmem [shape: f32[2,1,4,4,512], index: 1, kind: output, shape index: {}]  }
   0x1   :  { %s3_s8 = sshll.u32 %s62_s1, 4  ;;  %s9_s11 = scalar_lea.hbm %s61_s0, 2048  ;;  %s4_s8 = int_to_ptr.vmem [resolvable:$true] %s3_s8 }
   0x2   :  { %p10_p0 = scmp.ne.s32.totalorder %s61_s0, %s9_s11  ;;  %s11_s16 = scalar_lea.hbm %s61_s0, 4096 }
   0x3   :  { %p12_p1 = scmp.lt.u32.totalorder %s11_s16, %s9_s11  ;;  %p13_p2 = scmp.lt.u32.totalorder %s9_s11, %s61_s0 }
   0x5   :  { %p14_p3 = por %p13_p2, %p12_p1 }
   0x7   :  { %p15_p4 = pnand %p14_p3, %p10_p0 }
   0x9   :  { %18 = shalt.err (!%p15_p4)  }
   0xa   :  { %s19_s1 = scalar_lea.vmem %s4_s8, 2048  ;;  %p24_p6 = scmp.lt.s32.totalorder %s4_s8, %s4_s8 }
   0xb   :  { %p20_p5 = scmp.ne.s32.totalorder %s4_s8, %s19_s1  ;;  %p25_p7 = scmp.lt.s32.totalorder %s19_s1, %s19_s1 }
   0xd   :  { %p26_p8 = por %p25_p7, %p24_p6 }
   0xf   :  { %p27_p9 = pnand %p26_p8, %p20_p5 }
  0x11   :  { %30 = shalt.err (!%p27_p9)  }
  0x12   :  { %6 = dma.hbm_to_vmem [thread:$0]  %s61_s0, 2048, %s4_s8, [#allocation0] }
  0x13   :  { %31 = dma.done.wait [#allocation0], 2048  }
  0x14   :  { %32 = vsyncadd [#allocation0], 4294965248 }
  0x15   :  { %8 = vsyncpa [#allocation0], 1 }

// kernel: custom-call.2
= control target key start
LH: loop header
LB: loop body
LE: loop exit
PB: predicated region body
PF: predicated region fallthrough
CT: control target
= control target key end

     0   :  { %2 = vsyncpa [#allocation0], 0  ;;  %s61_s0 = inlined_call_operand.hbm [shape: c64[2,1,4,2,2,4,512], index: 0, kind: input, shape index: {}]   ;;  %s62_s1 = inlined_call_operand.vmem [shape: f32[2,1,4,2,2,4,512], index: 1, kind: output, shape index: {}]  }
   0x1   :  { %s3_s8 = sshll.u32 %s62_s1, 4  ;;  %s9_s11 = scalar_lea.hbm %s61_s0, 8192  ;;  %s4_s8 = int_to_ptr.vmem [resolvable:$true] %s3_s8 }
   0x2   :  { %p10_p0 = scmp.ne.s32.totalorder %s61_s0, %s9_s11  ;;  %s11_s16 = scalar_lea.hbm %s61_s0, 16384 }
   0x3   :  { %p12_p1 = scmp.lt.u32.totalorder %s11_s16, %s9_s11  ;;  %p13_p2 = scmp.lt.u32.totalorder %s9_s11, %s61_s0 }
   0x5   :  { %p14_p3 = por %p13_p2, %p12_p1 }
   0x7   :  { %p15_p4 = pnand %p14_p3, %p10_p0 }
   0x9   :  { %18 = shalt.err (!%p15_p4)  }
   0xa   :  { %s19_s1 = scalar_lea.vmem %s4_s8, 8192  ;;  %p24_p6 = scmp.lt.s32.totalorder %s4_s8, %s4_s8 }
   0xb   :  { %p20_p5 = scmp.ne.s32.totalorder %s4_s8, %s19_s1  ;;  %p25_p7 = scmp.lt.s32.totalorder %s19_s1, %s19_s1 }
   0xd   :  { %p26_p8 = por %p25_p7, %p24_p6 }
   0xf   :  { %p27_p9 = pnand %p26_p8, %p20_p5 }
  0x11   :  { %30 = shalt.err (!%p27_p9)  }
  0x12   :  { %6 = dma.hbm_to_vmem [thread:$0]  %s61_s0, 8192, %s4_s8, [#allocation0] }
  0x13   :  { %31 = dma.done.wait [#allocation0], 8192  }
  0x14   :  { %32 = vsyncadd [#allocation0], 4294959104 }
  0x15   :  { %8 = vsyncpa [#allocation0], 1 }

// kernel: custom-call.3
= control target key start
LH: loop header
LB: loop body
LE: loop exit
PB: predicated region body
PF: predicated region fallthrough
CT: control target
= control target key end

     0   :  { %s59_s0 = inlined_call_operand.hbm [shape: c64[2,1,4,2,2,4,512], index: 0, kind: input, shape index: {}]   ;;  %s60_s1 = inlined_call_operand.vmem [shape: f32[2,1,4,2,2,4,512], index: 1, kind: output, shape index: {}]  }
   0x1   :  { %s2_s8 = scalar_lea.hbm %s59_s0, 8192 }
   0x2   :  { %3 = vsyncpa [#allocation0], 0  ;;  %s4_s11 = sshll.u32 %s60_s1, 4  ;;  %s34_s14 = scalar_lea.hbm %s59_s0, 16384  ;;  %s5_s11 = int_to_ptr.vmem [resolvable:$true] %s4_s11 }
   0x3   :  { %p11_p0 = scmp.ne.s32.totalorder %s2_s8, %s34_s14  ;;  %p13_p1 = scmp.lt.u32.totalorder %s2_s8, %s59_s0 }
   0x4   :  { %p14_p2 = scmp.lt.u32.totalorder %s34_s14, %s34_s14  ;;  %p16_p4 = scmp.lt.u32.totalorder %s34_s14, %s2_s8 }
   0x6   :  { %p15_p3 = por %p14_p2, %p13_p1 }
   0x8   :  { %p17_p5 = por %p16_p4, %p15_p3 }
   0xa   :  { %p18_p6 = pnand %p17_p5, %p11_p0 }
   0xc   :  { %21 = shalt.err (!%p18_p6)  }
   0xd   :  { %s22_s17 = scalar_lea.vmem %s5_s11, 8192  ;;  %p27_p8 = scmp.lt.s32.totalorder %s5_s11, %s5_s11 }
   0xe   :  { %p23_p7 = scmp.ne.s32.totalorder %s5_s11, %s22_s17  ;;  %p28_p9 = scmp.lt.s32.totalorder %s22_s17, %s22_s17 }
  0x10   :  { %p29_p10 = por %p28_p9, %p27_p8 }
  0x12   :  { %p30_p11 = pnand %p29_p10, %p23_p7 }
  0x14   :  { %33 = shalt.err (!%p30_p11)  }
  0x15   :  { %7 = dma.hbm_to_vmem [thread:$0]  %s2_s8, 8192, %s5_s11, [#allocation0] }
  0x16   :  { %35 = dma.done.wait [#allocation0], 8192  }
  0x17   :  { %36 = vsyncadd [#allocation0], 4294959104 }
  0x18   :  { %9 = vsyncpa [#allocation0], 1 }

// kernel: pusch_receiver.1
= control target key start
LH: loop header
LB: loop body
LE: loop exit
PB: predicated region body
PF: predicated region fallthrough
CT: control target
= control target key end

     0   :  { %s3220_s0 = inlined_call_operand.vmem [shape: f32[4], index: 0, kind: input, shape index: {}]   ;;  %s3221_s1 = inlined_call_operand.vmem [shape: f32[32,4,8,128], index: 1, kind: input, shape index: {}]   ;;  %s3222_s2 = inlined_call_operand.vmem [shape: f32[8,4,8,128], index: 2, kind: input, shape index: {}]   ;;  %s3223_s3 = inlined_call_operand.vmem [shape: f32[8,4,8,128], index: 3, kind: output, shape index: {}]  }
   0x1   :  { %s8_s14 = sshll.u32 %s3220_s0, 4  ;;  %s9_s14 = int_to_ptr.vmem [resolvable:$true] %s8_s14 }
   0x2   :  { %s1830_s15 = scalar_lea.vmem %s9_s14, 16  ;;  %p1835_p1 = scmp.lt.s32.totalorder %s9_s14, %s9_s14 }
   0x3   :  { %p1831_p0 = scmp.ne.s32.totalorder %s9_s14, %s1830_s15  ;;  %p1836_p2 = scmp.lt.s32.totalorder %s1830_s15, %s1830_s15 }
   0x5   :  { %p1837_p3 = por %p1836_p2, %p1835_p1 }
   0x7   :  { %p1838_p4 = pnand %p1837_p3, %p1831_p0 }
   0x9   :  { %1841 = shalt.err (!%p1838_p4)  }
   0xa   :  { %s1876_s16 = smov [#allocation3]  }
   0xb   :  { %11 = dma.vmem_to_smem %s9_s14, 16, %s1876_s16, [#allocation2] }
   0xc   :  { %1858 = dma.done.wait [#allocation2], 16 }
   0xd   :  { %1859 = vsyncadd [#allocation2], 4294967280 }
   0xe   :  { %13 = sfence }
   0xf   :  { %s1900_s17 = smov 0   ;;  %s1902_s18 = smov 0  }
  0x10   :  { %s1904_s19 = smov 0  }
  0x11 LB: > { %s1916_s0 = sadd.s32 4294967295, %s1870_s19   ;;  %s1919_s20 = sadd.s32 1, %s1870_s19   ;;  %s1870_s19 = sphi %s1904_s19, %s3257_s19   ;;  %s1866_s18 = sphi %s1902_s18, %s3256_s18   ;;  %s1862_s17 = sphi %s1900_s17, %s3255_s17  }
  0x12   : > { %s23_s21 = ssub.s32 %s1870_s19, %s1919_s20  ;;  %s26_s22 = sadd.s32 1, %s1866_s18 }
  0x13   : > { %p24_p5 = scmp.eq.s32.totalorder %s23_s21, 0  ;;  %p33_p6 = scmp.ne.s32.totalorder %s1866_s18, %s1862_s17 }
  0x14   : > { %p34_p7 = scmp.eq.s32.totalorder %s1870_s19, 0  ;;  %p89_p8 = scmp.eq.s32.totalorder %s1916_s0, 1 }
  0x15   : > { %s1929_s23 = scalar_select %p24_p5, %s1866_s18, %s26_s22  }
  0x16   : > { %p1931_p9 = por %p34_p7, %p33_p6  ;;  %p1935_p10 = por %p89_p8, %p33_p6 }
  0x17   : > { %p1670_p11 = scmp.ge.s32.totalorder %s1870_s19, 2 }
  0x19   : > { %111 = sbr.rel (%p1670_p11) target bundleno = 80 (0x50), region = 16 }
  0x20   : > { %114 = sbr.rel (!%p1931_p9) target bundleno = 68 (0x44), region = 20  ;;  %s116_s26 = sand.u32 (%p1931_p9), 1, %s1866_s18  }
  0x21   : > { %s1778_s27 = sshll.u32 (%p1931_p9), %s1870_s19, 4  ;;  %s1671_s28 = sshll.u32 (%p1931_p9), %s116_s26, 9 }
  0x22   : > { %s1947_s4 = scalar_lea.vmem (%p1931_p9), %s3221_s1, %s1778_s27  ;;  %s1952_s5 = scalar_lea.vmem (%p1931_p9), [#allocation4], %s1671_s28 }
  0x23   : > { %v275_v0 = vld [vmem:[%s1947_s4] sm:$0xff] (%p1931_p9)  ;;  %v277_v1 = vld [vmem:[%s1947_s4 + $0x8] sm:$0xff] (%p1931_p9) }
  0x24   : > { %v279_v2 = vld [vmem:[%s1947_s4 + $0x20] sm:$0xff] (%p1931_p9)  ;;  %276 = vst [vmem:[%s1952_s5] sm:$0xff] (%p1931_p9), %v275_v0  ;;  %278 = vst [vmem:[%s1952_s5 + $0x8] sm:$0xff] (%p1931_p9), %v277_v1  ;;  %v281_v3 = vld [vmem:[%s1947_s4 + $0x28] sm:$0xff] (%p1931_p9) }
  0x25   : > { %280 = vst [vmem:[%s1952_s5 + $0x10] sm:$0xff] (%p1931_p9), %v279_v2  ;;  %v283_v4 = vld [vmem:[%s1947_s4 + $0x40] sm:$0xff] (%p1931_p9)  ;;  %v285_v5 = vld [vmem:[%s1947_s4 + $0x48] sm:$0xff] (%p1931_p9)  ;;  %282 = vst [vmem:[%s1952_s5 + $0x18] sm:$0xff] (%p1931_p9), %v281_v3 }
  0x26   : > { %284 = vst [vmem:[%s1952_s5 + $0x20] sm:$0xff] (%p1931_p9), %v283_v4  ;;  %286 = vst [vmem:[%s1952_s5 + $0x28] sm:$0xff] (%p1931_p9), %v285_v5  ;;  %v287_v6 = vld [vmem:[%s1947_s4 + $0x60] sm:$0xff] (%p1931_p9)  ;;  %v289_v7 = vld [vmem:[%s1947_s4 + $0x68] sm:$0xff] (%p1931_p9) }
  0x27   : > { %v291_v8 = vld [vmem:[%s1947_s4 + $0x80] sm:$0xff]  ;;  %288 = vst [vmem:[%s1952_s5 + $0x30] sm:$0xff] %v287_v6  ;;  %290 = vst [vmem:[%s1952_s5 + $0x38] sm:$0xff] %v289_v7  ;;  %v293_v9 = vld [vmem:[%s1947_s4 + $0x88] sm:$0xff] }
  0x28   : > { %292 = vst [vmem:[%s1952_s5 + $0x40] sm:$0xff] %v291_v8  ;;  %v295_v10 = vld [vmem:[%s1947_s4 + $0xa0] sm:$0xff]  ;;  %v297_v11 = vld [vmem:[%s1947_s4 + $0xa8] sm:$0xff]  ;;  %294 = vst [vmem:[%s1952_s5 + $0x48] sm:$0xff] %v293_v9 }
  0x29   : > { %296 = vst [vmem:[%s1952_s5 + $0x50] sm:$0xff] %v295_v10  ;;  %298 = vst [vmem:[%s1952_s5 + $0x58] sm:$0xff] %v297_v11  ;;  %v299_v12 = vld [vmem:[%s1947_s4 + $0xc0] sm:$0xff]  ;;  %v301_v13 = vld [vmem:[%s1947_s4 + $0xc8] sm:$0xff] }
  0x2a   : > { %v303_v14 = vld [vmem:[%s1947_s4 + $0xe0] sm:$0xff]  ;;  %300 = vst [vmem:[%s1952_s5 + $0x60] sm:$0xff] %v299_v12  ;;  %302 = vst [vmem:[%s1952_s5 + $0x68] sm:$0xff] %v301_v13  ;;  %v305_v15 = vld [vmem:[%s1947_s4 + $0xe8] sm:$0xff] }
  0x2b   : > { %304 = vst [vmem:[%s1952_s5 + $0x70] sm:$0xff] %v303_v14  ;;  %v307_v16 = vld [vmem:[%s1947_s4 + $0x100] sm:$0xff]  ;;  %v309_v17 = vld [vmem:[%s1947_s4 + $0x108] sm:$0xff]  ;;  %306 = vst [vmem:[%s1952_s5 + $0x78] sm:$0xff] %v305_v15 }
  0x2c   : > { %308 = vst [vmem:[%s1952_s5 + $0x80] sm:$0xff] %v307_v16  ;;  %310 = vst [vmem:[%s1952_s5 + $0x88] sm:$0xff] %v309_v17  ;;  %v311_v18 = vld [vmem:[%s1947_s4 + $0x120] sm:$0xff]  ;;  %v313_v19 = vld [vmem:[%s1947_s4 + $0x128] sm:$0xff] }
  0x2d   : > { %v315_v20 = vld [vmem:[%s1947_s4 + $0x140] sm:$0xff]  ;;  %312 = vst [vmem:[%s1952_s5 + $0x90] sm:$0xff] %v311_v18  ;;  %314 = vst [vmem:[%s1952_s5 + $0x98] sm:$0xff] %v313_v19  ;;  %v317_v21 = vld [vmem:[%s1947_s4 + $0x148] sm:$0xff] }
  0x2e   : > { %316 = vst [vmem:[%s1952_s5 + $0xa0] sm:$0xff] %v315_v20  ;;  %v319_v22 = vld [vmem:[%s1947_s4 + $0x160] sm:$0xff]  ;;  %v321_v23 = vld [vmem:[%s1947_s4 + $0x168] sm:$0xff]  ;;  %318 = vst [vmem:[%s1952_s5 + $0xa8] sm:$0xff] %v317_v21 }
  0x2f   : > { %320 = vst [vmem:[%s1952_s5 + $0xb0] sm:$0xff] %v319_v22  ;;  %322 = vst [vmem:[%s1952_s5 + $0xb8] sm:$0xff] %v321_v23  ;;  %v323_v24 = vld [vmem:[%s1947_s4 + $0x180] sm:$0xff]  ;;  %v325_v25 = vld [vmem:[%s1947_s4 + $0x188] sm:$0xff] }
  0x30   : > { %v327_v26 = vld [vmem:[%s1947_s4 + $0x1a0] sm:$0xff]  ;;  %324 = vst [vmem:[%s1952_s5 + $0xc0] sm:$0xff] %v323_v24  ;;  %326 = vst [vmem:[%s1952_s5 + $0xc8] sm:$0xff] %v325_v25  ;;  %v329_v27 = vld [vmem:[%s1947_s4 + $0x1a8] sm:$0xff] }
  0x31   : > { %328 = vst [vmem:[%s1952_s5 + $0xd0] sm:$0xff] %v327_v26  ;;  %v331_v28 = vld [vmem:[%s1947_s4 + $0x1c0] sm:$0xff]  ;;  %v333_v29 = vld [vmem:[%s1947_s4 + $0x1c8] sm:$0xff]  ;;  %330 = vst [vmem:[%s1952_s5 + $0xd8] sm:$0xff] %v329_v27 }
  0x32   : > { %332 = vst [vmem:[%s1952_s5 + $0xe0] sm:$0xff] %v331_v28  ;;  %334 = vst [vmem:[%s1952_s5 + $0xe8] sm:$0xff] %v333_v29  ;;  %v335_v30 = vld [vmem:[%s1947_s4 + $0x1e0] sm:$0xff]  ;;  %v337_v31 = vld [vmem:[%s1947_s4 + $0x1e8] sm:$0xff] }
  0x33   : > { %v339_v32 = vld [vmem:[%s1947_s4 + $0x200] sm:$0xff]  ;;  %336 = vst [vmem:[%s1952_s5 + $0xf0] sm:$0xff] %v335_v30  ;;  %338 = vst [vmem:[%s1952_s5 + $0xf8] sm:$0xff] %v337_v31  ;;  %v341_v33 = vld [vmem:[%s1947_s4 + $0x208] sm:$0xff] }
  0x34   : > { %340 = vst [vmem:[%s1952_s5 + $0x100] sm:$0xff] %v339_v32  ;;  %v343_v34 = vld [vmem:[%s1947_s4 + $0x220] sm:$0xff]  ;;  %v345_v35 = vld [vmem:[%s1947_s4 + $0x228] sm:$0xff]  ;;  %342 = vst [vmem:[%s1952_s5 + $0x108] sm:$0xff] %v341_v33 }
  0x35   : > { %344 = vst [vmem:[%s1952_s5 + $0x110] sm:$0xff] %v343_v34  ;;  %346 = vst [vmem:[%s1952_s5 + $0x118] sm:$0xff] %v345_v35  ;;  %v347_v36 = vld [vmem:[%s1947_s4 + $0x240] sm:$0xff]  ;;  %v349_v37 = vld [vmem:[%s1947_s4 + $0x248] sm:$0xff] }
  0x36   : > { %v351_v38 = vld [vmem:[%s1947_s4 + $0x260] sm:$0xff]  ;;  %348 = vst [vmem:[%s1952_s5 + $0x120] sm:$0xff] %v347_v36  ;;  %350 = vst [vmem:[%s1952_s5 + $0x128] sm:$0xff] %v349_v37  ;;  %v353_v39 = vld [vmem:[%s1947_s4 + $0x268] sm:$0xff] }
  0x37   : > { %352 = vst [vmem:[%s1952_s5 + $0x130] sm:$0xff] %v351_v38  ;;  %v355_v40 = vld [vmem:[%s1947_s4 + $0x280] sm:$0xff]  ;;  %v357_v41 = vld [vmem:[%s1947_s4 + $0x288] sm:$0xff]  ;;  %354 = vst [vmem:[%s1952_s5 + $0x138] sm:$0xff] %v353_v39 }
  0x38   : > { %356 = vst [vmem:[%s1952_s5 + $0x140] sm:$0xff] %v355_v40  ;;  %358 = vst [vmem:[%s1952_s5 + $0x148] sm:$0xff] %v357_v41  ;;  %v359_v42 = vld [vmem:[%s1947_s4 + $0x2a0] sm:$0xff]  ;;  %v361_v43 = vld [vmem:[%s1947_s4 + $0x2a8] sm:$0xff] }
  0x39   : > { %v363_v44 = vld [vmem:[%s1947_s4 + $0x2c0] sm:$0xff]  ;;  %360 = vst [vmem:[%s1952_s5 + $0x150] sm:$0xff] %v359_v42  ;;  %362 = vst [vmem:[%s1952_s5 + $0x158] sm:$0xff] %v361_v43  ;;  %v365_v45 = vld [vmem:[%s1947_s4 + $0x2c8] sm:$0xff] }
  0x3a   : > { %364 = vst [vmem:[%s1952_s5 + $0x160] sm:$0xff] %v363_v44  ;;  %v367_v46 = vld [vmem:[%s1947_s4 + $0x2e0] sm:$0xff]  ;;  %v369_v47 = vld [vmem:[%s1947_s4 + $0x2e8] sm:$0xff]  ;;  %366 = vst [vmem:[%s1952_s5 + $0x168] sm:$0xff] %v365_v45 }
  0x3b   : > { %368 = vst [vmem:[%s1952_s5 + $0x170] sm:$0xff] %v367_v46  ;;  %370 = vst [vmem:[%s1952_s5 + $0x178] sm:$0xff] %v369_v47  ;;  %v371_v48 = vld [vmem:[%s1947_s4 + $0x300] sm:$0xff]  ;;  %v373_v49 = vld [vmem:[%s1947_s4 + $0x308] sm:$0xff] }
  0x3c   : > { %v375_v50 = vld [vmem:[%s1947_s4 + $0x320] sm:$0xff]  ;;  %372 = vst [vmem:[%s1952_s5 + $0x180] sm:$0xff] %v371_v48  ;;  %374 = vst [vmem:[%s1952_s5 + $0x188] sm:$0xff] %v373_v49  ;;  %v377_v51 = vld [vmem:[%s1947_s4 + $0x328] sm:$0xff] }
  0x3d   : > { %376 = vst [vmem:[%s1952_s5 + $0x190] sm:$0xff] %v375_v50  ;;  %v379_v52 = vld [vmem:[%s1947_s4 + $0x340] sm:$0xff]  ;;  %v381_v53 = vld [vmem:[%s1947_s4 + $0x348] sm:$0xff]  ;;  %378 = vst [vmem:[%s1952_s5 + $0x198] sm:$0xff] %v377_v51 }
  0x3e   : > { %380 = vst [vmem:[%s1952_s5 + $0x1a0] sm:$0xff] %v379_v52  ;;  %382 = vst [vmem:[%s1952_s5 + $0x1a8] sm:$0xff] %v381_v53  ;;  %v383_v54 = vld [vmem:[%s1947_s4 + $0x360] sm:$0xff]  ;;  %v385_v55 = vld [vmem:[%s1947_s4 + $0x368] sm:$0xff] }
  0x3f   : > { %v387_v56 = vld [vmem:[%s1947_s4 + $0x380] sm:$0xff]  ;;  %384 = vst [vmem:[%s1952_s5 + $0x1b0] sm:$0xff] %v383_v54  ;;  %386 = vst [vmem:[%s1952_s5 + $0x1b8] sm:$0xff] %v385_v55  ;;  %v389_v57 = vld [vmem:[%s1947_s4 + $0x388] sm:$0xff] }
  0x40   : > { %388 = vst [vmem:[%s1952_s5 + $0x1c0] sm:$0xff] %v387_v56  ;;  %v391_v58 = vld [vmem:[%s1947_s4 + $0x3a0] sm:$0xff]  ;;  %v393_v59 = vld [vmem:[%s1947_s4 + $0x3a8] sm:$0xff]  ;;  %390 = vst [vmem:[%s1952_s5 + $0x1c8] sm:$0xff] %v389_v57 }
  0x41   : > { %392 = vst [vmem:[%s1952_s5 + $0x1d0] sm:$0xff] %v391_v58  ;;  %394 = vst [vmem:[%s1952_s5 + $0x1d8] sm:$0xff] %v393_v59  ;;  %v395_v60 = vld [vmem:[%s1947_s4 + $0x3c0] sm:$0xff]  ;;  %v397_v61 = vld [vmem:[%s1947_s4 + $0x3c8] sm:$0xff] }
  0x42   : > { %v399_v62 = vld [vmem:[%s1947_s4 + $0x3e0] sm:$0xff]  ;;  %396 = vst [vmem:[%s1952_s5 + $0x1e0] sm:$0xff] %v395_v60  ;;  %398 = vst [vmem:[%s1952_s5 + $0x1e8] sm:$0xff] %v397_v61  ;;  %v401_v63 = vld [vmem:[%s1947_s4 + $0x3e8] sm:$0xff] }
  0x43   : > { %400 = vst [vmem:[%s1952_s5 + $0x1f0] sm:$0xff] %v399_v62  ;;  %402 = vst [vmem:[%s1952_s5 + $0x1f8] sm:$0xff] %v401_v63 }
  0x44 PF: > { %408 = sbr.rel (!%p1931_p9) target bundleno = 80 (0x50), region = 58  ;;  %s410_s6 = sand.u32 (%p1931_p9), 1, %s1866_s18  }
  0x45   : > { %s1779_s7 = sshll.u32 (%p1931_p9), %s1870_s19, 4  ;;  %s1674_s8 = sshll.u32 (%p1931_p9), %s410_s6, 7 }
  0x46   : > { %s2086_s11 = scalar_lea.vmem (%p1931_p9), %s3222_s2, %s1779_s7  ;;  %s412_s12 = scalar_lea.vmem (%p1931_p9), [#allocation5], %s1674_s8 }
  0x47   : > { %v473_v0 = vld [vmem:[%s2086_s11] sm:$0xff] (%p1931_p9)  ;;  %v475_v1 = vld [vmem:[%s2086_s11 + $0x8] sm:$0xff] (%p1931_p9) }
  0x48   : > { %v477_v2 = vld [vmem:[%s2086_s11 + $0x20] sm:$0xff] (%p1931_p9)  ;;  %474 = vst [vmem:[%s412_s12] sm:$0xff] (%p1931_p9), %v473_v0  ;;  %476 = vst [vmem:[%s412_s12 + $0x8] sm:$0xff] (%p1931_p9), %v475_v1  ;;  %v479_v3 = vld [vmem:[%s2086_s11 + $0x28] sm:$0xff] (%p1931_p9) }
  0x49   : > { %478 = vst [vmem:[%s412_s12 + $0x10] sm:$0xff] (%p1931_p9), %v477_v2  ;;  %v481_v4 = vld [vmem:[%s2086_s11 + $0x40] sm:$0xff] (%p1931_p9)  ;;  %v483_v5 = vld [vmem:[%s2086_s11 + $0x48] sm:$0xff] (%p1931_p9)  ;;  %480 = vst [vmem:[%s412_s12 + $0x18] sm:$0xff] (%p1931_p9), %v479_v3 }
  0x4a   : > { %482 = vst [vmem:[%s412_s12 + $0x20] sm:$0xff] (%p1931_p9), %v481_v4  ;;  %484 = vst [vmem:[%s412_s12 + $0x28] sm:$0xff] (%p1931_p9), %v483_v5  ;;  %v485_v6 = vld [vmem:[%s2086_s11 + $0x60] sm:$0xff] (%p1931_p9)  ;;  %v487_v7 = vld [vmem:[%s2086_s11 + $0x68] sm:$0xff] (%p1931_p9) }
  0x4b   : > { %v489_v8 = vld [vmem:[%s2086_s11 + $0x80] sm:$0xff]  ;;  %486 = vst [vmem:[%s412_s12 + $0x30] sm:$0xff] %v485_v6  ;;  %488 = vst [vmem:[%s412_s12 + $0x38] sm:$0xff] %v487_v7  ;;  %v491_v9 = vld [vmem:[%s2086_s11 + $0x88] sm:$0xff] }
  0x4c   : > { %490 = vst [vmem:[%s412_s12 + $0x40] sm:$0xff] %v489_v8  ;;  %v493_v10 = vld [vmem:[%s2086_s11 + $0xa0] sm:$0xff]  ;;  %v495_v11 = vld [vmem:[%s2086_s11 + $0xa8] sm:$0xff]  ;;  %492 = vst [vmem:[%s412_s12 + $0x48] sm:$0xff] %v491_v9 }
  0x4d   : > { %494 = vst [vmem:[%s412_s12 + $0x50] sm:$0xff] %v493_v10  ;;  %496 = vst [vmem:[%s412_s12 + $0x58] sm:$0xff] %v495_v11  ;;  %v497_v12 = vld [vmem:[%s2086_s11 + $0xc0] sm:$0xff]  ;;  %v499_v13 = vld [vmem:[%s2086_s11 + $0xc8] sm:$0xff] }
  0x4e   : > { %v501_v14 = vld [vmem:[%s2086_s11 + $0xe0] sm:$0xff]  ;;  %498 = vst [vmem:[%s412_s12 + $0x60] sm:$0xff] %v497_v12  ;;  %500 = vst [vmem:[%s412_s12 + $0x68] sm:$0xff] %v499_v13  ;;  %v503_v15 = vld [vmem:[%s2086_s11 + $0xe8] sm:$0xff] }
  0x4f   : > { %502 = vst [vmem:[%s412_s12 + $0x70] sm:$0xff] %v501_v14  ;;  %504 = vst [vmem:[%s412_s12 + $0x78] sm:$0xff] %v503_v15 }
  0x50 PF: > { %p1677_p12 = scmp.ge.s32.totalorder %s1870_s19, 1  ;;  %p509_p13 = scmp.lt.s32.totalorder %s1870_s19, 3 }
  0x52   : > { %p510_p0 = pnand %p1677_p12, %p509_p13 }
  0x53   : > { %s516_s13 = sand.u32 (!%p510_p0), 1, %s1862_s17   ;;  %s2116_s24 = smov (!%p510_p0), 0  }
  0x54   : > { %513 = sbr.rel (%p510_p0) target bundleno = 296 (0x128), region = 96  ;;  %s2107_s14 = sshll.u32 (!%p510_p0), %s516_s13, 9 }
  0x55   : > { %s2109_s15 = sshll.u32 (!%p510_p0), %s516_s13, 7  ;;  %s518_s16 = scalar_lea.vmem (!%p510_p0), [#allocation4], %s2107_s14 }
  0x56   : > { %s525_s21 = scalar_lea.vmem (!%p510_p0), [#allocation5], %s2109_s15  ;;  %s2114_s22 = scalar_lea.vmem (!%p510_p0), [#allocation6], %s2109_s15 }
  0x5b LB: >> { %s2122_s17 = sshll.u32 %s1874_s24, 3  ;;  %s1681_s27 = sshll.u32 %s1916_s0, 1  ;;  %s1874_s24 = sphi %s2116_s24, %s555_s24  }
  0x5c   : >> { %s2127_s19 = scalar_lea.vmem %s525_s21, %s2122_s17 [#allocation5]  ;;  %s2138_s26 = scalar_lea.vmem %s518_s16, %s2122_s17 [#allocation4] }
  0x5d   : >> { %v2130_v16 = vld [vmem:[%s2127_s19] sm:$0xff]  ;;  %s557_s28 = sadd.s32 %s1874_s24, %s1681_s27  ;;  %v2157_v26 = vld [vmem:[%s2138_s26 + $0x10] sm:$0xff]  ;;  %s1268_s30 = scalar_lea.vmem %s2114_s22, %s2122_s17 [#allocation6] }
  0x5e   : >> { %v2133_v17 = vld [vmem:[%s2127_s19 + $0x40] sm:$0xff]  ;;  %s558_s29 = sld [smem:[#allocation3 + %s557_s28]]  ;;  %v2160_v27 = vld [vmem:[%s2138_s26 + $0x110] sm:$0xff]  ;;  %v599_v30 = vmul.f32 %v2157_v26, %v2157_v26  ;;  %v609_v45 = vmul.f32 %v2157_v26, %v2130_v16  ;;  %s555_s24 = sadd.s32 1, %s1874_s24  }
  0x5f   : >> { %v2141_v18 = vld [vmem:[%s2138_s26] sm:$0xff]  ;;  %v600_v31 = vmul.f32 %v2160_v27, %v2160_v27  ;;  %v2185_v39 = vld [vmem:[%s2127_s19 + $0x10] sm:$0xff]  ;;  %v610_v49 = vmul.f32 %v2160_v27, %v2133_v17  ;;  %v2213_v50 = vmul.f32 %v2157_v26, %v2133_v17  ;;  %v2217_v51 = vmul.f32 %v2160_v27, %v2130_v16  ;;  %p552_p1 = scmp.ge.s32.totalorder %s555_s24, 2  }
  0x60   : >> { %v2144_v19 = vld [vmem:[%s2138_s26 + $0x100] sm:$0xff]  ;;  %v593_v20 = vmul.f32 %v2141_v18, %v2130_v16  ;;  %v596_v21 = vmul.f32 %v2133_v17, %v2141_v18  ;;  %v588_v28 = vmul.f32 %v2141_v18, %v2141_v18  ;;  %v603_v32 = vmul.f32 %v2157_v26, %v2141_v18  ;;  %v2196_v43 = vld [vmem:[%s2127_s19 + $0x50] sm:$0xff] }
  0x61   : >> { %v594_v22 = vmul.f32 %v2144_v19, %v2133_v17  ;;  %v597_v23 = vmul.f32 %v2144_v19, %v2130_v16  ;;  %v589_v29 = vmul.f32 %v2144_v19, %v2144_v19  ;;  %v604_v33 = vmul.f32 %v2160_v27, %v2144_v19  ;;  %v2188_v40 = vld [vmem:[%s2138_s26 + $0x20] sm:$0xff]  ;;  %v1690_v6 = vld [vmem:[%s2138_s26 + $0x30] sm:$0xff] }
  0x62   : >> { %v2176_v34 = vmul.f32 %v2144_v19, %v2157_v26  ;;  %v2180_v35 = vmul.f32 %v2160_v27, %v2141_v18  ;;  %v601_v38 = vadd.f32 %v600_v31, %v599_v30  ;;  %v2191_v41 = vld [vmem:[%s2138_s26 + $0x120] sm:$0xff]  ;;  %v615_v46 = vmul.f32 %v2188_v40, %v2188_v40  ;;  %v1698_v7 = vld [vmem:[%s2138_s26 + $0x130] sm:$0xff] }
  0x63   : >> { %v595_v24 = vadd.f32 %v594_v22, %v593_v20  ;;  %v598_v25 = vsub.f32 %v596_v21, %v597_v23  ;;  %v590_v36 = vadd.f32 %v589_v29, %v588_v28  ;;  %v2193_v42 = vadd.f32 %v604_v33, %v603_v32  ;;  %v2220_v52 = vld [vmem:[%s2138_s26 + $0x40] sm:$0xff] }
  0x64   : >> { %v2182_v37 = vstv %s558_s29  ;;  %v616_v47 = vmul.f32 %v2191_v41, %v2191_v41  ;;  %v2223_v53 = vld [vmem:[%s2138_s26 + $0x140] sm:$0xff]  ;;  %v619_v55 = vmul.f32 %v2188_v40, %v2141_v18  ;;  %v696_v56 = vmul.f32 %v2220_v52, %v2185_v39 }
  0x65   : >> { %3230 = vst [vmem:[#allocation8_spill] sm:$0xff] %v2182_v37  ;;  %v2207_v48 = vadd.f32 %v2182_v37, %v590_v36  ;;  %v2226_v54 = vadd.f32 %v601_v38, %v2182_v37  ;;  %v697_v57 = vmul.f32 %v2223_v53, %v2196_v43  ;;  %v620_v58 = vmul.f32 %v2191_v41, %v2144_v19 }
  0x66   : >> { %v2238_v59 = vmul.f32 %v2144_v19, %v2188_v40  ;;  %v699_v60 = vmul.f32 %v2220_v52, %v2196_v43  ;;  %v700_v61 = vmul.f32 %v2223_v53, %v2185_v39  ;;  %v617_v62 = vadd.f32 %v616_v47, %v615_v46 }
  0x67   : >> { %v2246_v63 = vmul.f32 %v2191_v41, %v2141_v18  ;;  %v625_v0 = vmul.f32 %v2188_v40, %v2157_v26  ;;  %v698_v1 = vadd.f32 %v697_v57, %v696_v56  ;;  %v626_v2 = vmul.f32 %v2191_v41, %v2160_v27  ;;  %v2319_v56 = vld [vmem:[%s2138_s26 + $0x150] sm:$0xff] }
  0x68   : >> { %v2254_v3 = vmul.f32 %v2160_v27, %v2188_v40  ;;  %v2258_v4 = vmul.f32 %v2191_v41, %v2157_v26  ;;  %v701_v5 = vsub.f32 %v699_v60, %v700_v61  ;;  %v631_v8 = vmul.f32 %v2188_v40, %v2130_v16 }
  0x69   : >> { %v632_v9 = vmul.f32 %v2191_v41, %v2133_v17  ;;  %v2268_v10 = vmul.f32 %v2188_v40, %v2133_v17  ;;  %v2270_v11 = vadd.f32 %v698_v1, %v595_v24  ;;  %v2274_v12 = vmul.f32 %v2191_v41, %v2130_v16 }
  0x6a   : >> { %v637_v13 = vmul.f32 %v1690_v6, %v1690_v6  ;;  %v638_v14 = vmul.f32 %v1698_v7, %v1698_v7  ;;  %v2276_v15 = vadd.f32 %v701_v5, %v598_v25  ;;  %v2278_v20 = vadd.f32 %v610_v49, %v609_v45 }
  0x6b   : >> { %v2283_v22 = vadd.f32 %v617_v62, %v2182_v37  ;;  %v2285_v23 = vadd.f32 %v620_v58, %v619_v55  ;;  %v641_v24 = vmul.f32 %v1690_v6, %v2141_v18  ;;  %v642_v28 = vmul.f32 %v1698_v7, %v2144_v19  ;;  %v2316_v55 = vld [vmem:[%s2138_s26 + $0x50] sm:$0xff] }
  0x6c   : >> { %v2290_v29 = vmul.f32 %v2144_v19, %v1690_v6  ;;  %v2293_v25 = vmul.f32 %v1698_v7, %v2141_v18  ;;  %v2297_v31 = vadd.f32 %v626_v2, %v625_v0  ;;  %v2301_v33 = vadd.f32 %v632_v9, %v631_v8 }
  0x6d   : >> { %v639_v38 = vadd.f32 %v638_v14, %v637_v13  ;;  %v647_v19 = vmul.f32 %v1690_v6, %v2157_v26  ;;  %v648_v45 = vmul.f32 %v1698_v7, %v2160_v27  ;;  %v2308_v18 = vmul.f32 %v2160_v27, %v1690_v6 }
  0x6e   : >> { %v2311_v46 = vmul.f32 %v1698_v7, %v2157_v26  ;;  %v653_v47 = vmul.f32 %v1690_v6, %v2188_v40  ;;  %v654_v49 = vmul.f32 %v1698_v7, %v2191_v41  ;;  %v2321_v57 = vadd.f32 %v642_v28, %v641_v24  ;;  %v2360_v28 = vld [vmem:[%s2138_s26 + $0x60] sm:$0xff] }
  0x6f   : >> { %v2326_v60 = vmul.f32 %v2191_v41, %v1690_v6  ;;  %v2329_v26 = vmul.f32 %v1698_v7, %v2188_v40  ;;  %v692_v27 = vmul.f32 %v2220_v52, %v2220_v52  ;;  %v693_v61 = vmul.f32 %v2223_v53, %v2223_v53 }
  0x70   : >> { %v704_v62 = vmul.f32 %v2316_v55, %v2316_v55  ;;  %v705_v0 = vmul.f32 %v2319_v56, %v2319_v56  ;;  %v2340_v41 = vadd.f32 %v639_v38, %v2182_v37  ;;  %v2342_v1 = vadd.f32 %v648_v45, %v647_v19  ;;  %v2363_v38 = vld [vmem:[%s2138_s26 + $0x160] sm:$0xff] }
  0x71   : >> { %v708_v40 = vmul.f32 %v2316_v55, %v2220_v52  ;;  %v709_v2 = vmul.f32 %v2319_v56, %v2223_v53  ;;  %v2350_v8 = vadd.f32 %v654_v49, %v653_v47  ;;  %v659_v9 = vmul.f32 %v1690_v6, %v2130_v16  ;;  %v2411_v37 = vld [vmem:[%s2127_s19 + $0x60] sm:$0xff] }
  0x72   : >> { %v660_v13 = vmul.f32 %v1698_v7, %v2133_v17  ;;  %v2357_v24 = vmul.f32 %v1690_v6, %v2133_v17  ;;  %v711_v19 = vmul.f32 %v2223_v53, %v2316_v55  ;;  %v712_v45 = vmul.f32 %v2319_v56, %v2220_v52 }
  0x73   : >> { %v2370_v47 = vmul.f32 %v1698_v7, %v2130_v16  ;;  %v694_v49 = vadd.f32 %v693_v61, %v692_v27  ;;  %v706_v5 = vadd.f32 %v705_v0, %v704_v62  ;;  %v716_v14 = vmul.f32 %v2316_v55, %v2185_v39 }
  0x74   : >> { %3231 = vst [vmem:[#allocation9_spill] sm:$0xff] %v2357_v24  ;;  %v710_v17 = vadd.f32 %v709_v2, %v708_v40  ;;  %v717_v6 = vmul.f32 %v2319_v56, %v2196_v43  ;;  %v719_v58 = vmul.f32 %v2316_v55, %v2196_v43  ;;  %v720_v36 = vmul.f32 %v2319_v56, %v2185_v39 }
  0x75   : >> { %3232 = vst [vmem:[#allocation10_spill] sm:$0xff] %v2370_v47  ;;  %v724_v16 = vmul.f32 %v2360_v28, %v2360_v28  ;;  %v725_v7 = vmul.f32 %v2363_v38, %v2363_v38  ;;  %v728_v27 = vmul.f32 %v2360_v28, %v2220_v52  ;;  %v729_v61 = vmul.f32 %v2363_v38, %v2223_v53 }
  0x76   : >> { %v2388_v62 = vadd.f32 %v660_v13, %v659_v9  ;;  %v713_v0 = vsub.f32 %v711_v19, %v712_v45  ;;  %v731_v40 = vmul.f32 %v2223_v53, %v2360_v28  ;;  %v732_v2 = vmul.f32 %v2363_v38, %v2220_v52  ;;  %v2404_v13 = vld [vmem:[%s2127_s19 + $0x20] sm:$0xff] }
  0x77   : >> { %v2397_v30 = vadd.f32 %v694_v49, %v2207_v48  ;;  %v736_v21 = vmul.f32 %v2360_v28, %v2316_v55  ;;  %v737_v9 = vmul.f32 %v2363_v38, %v2319_v56  ;;  %v718_v19 = vadd.f32 %v717_v6, %v716_v14  ;;  %v2420_v14 = vld [vmem:[%s2138_s26 + $0x80] sm:$0xff] }
  0x78   : >> { %v721_v45 = vsub.f32 %v719_v58, %v720_v36  ;;  %v739_v44 = vmul.f32 %v2319_v56, %v2360_v28  ;;  %v740_v32 = vmul.f32 %v2363_v38, %v2316_v55  ;;  %v2414_v48 = vadd.f32 %v706_v5, %v2226_v54  ;;  %v2430_v54 = vld [vmem:[%s2138_s26 + $0x180] sm:$0xff] }
  0x79   : >> { %3233 = vst [vmem:[#allocation11_spill] sm:$0xff] %v2397_v30  ;;  %v2417_v49 = vadd.f32 %v710_v17, %v2193_v42  ;;  %v726_v30 = vadd.f32 %v725_v7, %v724_v16  ;;  %v730_v47 = vadd.f32 %v729_v61, %v728_v27  ;;  %v3234_v36 = vsub.f32 %v2176_v34, %v2180_v35 }
  0x7a   : >> { %v733_v6 = vsub.f32 %v731_v40, %v732_v2  ;;  %v744_v24 = vmul.f32 %v2360_v28, %v2185_v39  ;;  %v820_v42 = vmul.f32 %v2420_v14, %v2404_v13  ;;  %v738_v5 = vadd.f32 %v737_v9, %v736_v21  ;;  %v1718_v40 = vld [vmem:[%s2138_s26 + $0x170] sm:$0xff] }
  0x7b   : >> { %v2425_v58 = vadd.f32 %v713_v0, %v3234_v36  ;;  %v745_v17 = vmul.f32 %v2363_v38, %v2196_v43  ;;  %v821_v16 = vmul.f32 %v2430_v54, %v2411_v37  ;;  %v823_v34 = vmul.f32 %v2420_v14, %v2411_v37  ;;  %v1710_v0 = vld [vmem:[%s2138_s26 + $0x70] sm:$0xff] }
  0x7c   : >> { %v2441_v35 = vadd.f32 %v718_v19, %v2278_v20  ;;  %v3235_v7 = vsub.f32 %v2213_v50, %v2217_v51  ;;  %v741_v61 = vsub.f32 %v739_v44, %v740_v32  ;;  %v824_v21 = vmul.f32 %v2430_v54, %v2404_v13 }
  0x7d   : >> { %v2453_v2 = vadd.f32 %v726_v30, %v2283_v22  ;;  %v2456_v9 = vadd.f32 %v730_v47, %v2285_v23  ;;  %v747_v20 = vmul.f32 %v2360_v28, %v2196_v43  ;;  %v822_v19 = vadd.f32 %v821_v16, %v820_v42 }
  0x7e   : >> { %v2446_v27 = vadd.f32 %v721_v45, %v3235_v7  ;;  %v3236_v50 = vsub.f32 %v2238_v59, %v2246_v63  ;;  %v748_v44 = vmul.f32 %v2363_v38, %v2185_v39  ;;  %v752_v32 = vmul.f32 %v1710_v0, %v1710_v0  ;;  %v2496_v7 = vld [vmem:[%s2138_s26 + $0x90] sm:$0xff] }
  0x7f   : >> { %v825_v45 = vsub.f32 %v823_v34, %v824_v21  ;;  %v2468_v22 = vadd.f32 %v738_v5, %v2297_v31  ;;  %v746_v30 = vadd.f32 %v745_v17, %v744_v24  ;;  %v753_v23 = vmul.f32 %v1718_v40, %v1718_v40 }
  0x80   : >> { %v2463_v51 = vadd.f32 %v733_v6, %v3236_v50  ;;  %v2471_v47 = vadd.f32 %v822_v19, %v2270_v11  ;;  %v3239_v36 = vsub.f32 %v2254_v3, %v2258_v4  ;;  %v756_v59 = vmul.f32 %v1710_v0, %v2220_v52 }
  0x81   : >> { %3238 = vst [vmem:[#allocation13_spill] sm:$0xff] %v2468_v22  ;;  %v757_v63 = vmul.f32 %v1718_v40, %v2223_v53  ;;  %v2481_v6 = vadd.f32 %v825_v45, %v2276_v15  ;;  %v759_v31 = vmul.f32 %v2223_v53, %v1710_v0  ;;  %v760_v24 = vmul.f32 %v1718_v40, %v2220_v52 }
  0x82   : >> { %3237 = vst [vmem:[#allocation12_spill] sm:$0xff] %v2463_v51  ;;  %v2476_v42 = vadd.f32 %v741_v61, %v3239_v36  ;;  %v764_v11 = vmul.f32 %v1710_v0, %v2316_v55  ;;  %v765_v5 = vmul.f32 %v1718_v40, %v2319_v56  ;;  %v767_v3 = vmul.f32 %v2319_v56, %v1710_v0  ;;  %v2499_v61 = vld [vmem:[%s2138_s26 + $0x190] sm:$0xff] }
  0x83   : >> { %v768_v4 = vmul.f32 %v1718_v40, %v2316_v55  ;;  %v772_v17 = vmul.f32 %v1710_v0, %v2360_v28  ;;  %v773_v16 = vmul.f32 %v1718_v40, %v2363_v38  ;;  %v775_v34 = vmul.f32 %v2363_v38, %v1710_v0 }
  0x84   : >> { %3240 = vst [vmem:[#allocation14_spill] sm:$0xff] %v2476_v42  ;;  %v776_v15 = vmul.f32 %v1718_v40, %v2360_v28  ;;  %v780_v53 = vmul.f32 %v1710_v0, %v2185_v39  ;;  %v781_v52 = vmul.f32 %v1718_v40, %v2196_v43  ;;  %v783_v56 = vmul.f32 %v1710_v0, %v2196_v43 }
  0x85   : >> { %v784_v55 = vmul.f32 %v1718_v40, %v2185_v39  ;;  %v816_v21 = vmul.f32 %v2420_v14, %v2420_v14  ;;  %v817_v38 = vmul.f32 %v2430_v54, %v2430_v54  ;;  %v749_v19 = vsub.f32 %v747_v20, %v748_v44 }
  0x86   : >> { %v754_v28 = vadd.f32 %v753_v23, %v752_v32  ;;  %v828_v50 = vmul.f32 %v2496_v7, %v2496_v7  ;;  %v829_v45 = vmul.f32 %v2499_v61, %v2499_v61  ;;  %v758_v36 = vadd.f32 %v757_v63, %v756_v59 }
  0x87   : >> { %v761_v42 = vsub.f32 %v759_v31, %v760_v24  ;;  %v832_v43 = vmul.f32 %v2496_v7, %v2420_v14  ;;  %v833_v39 = vmul.f32 %v2499_v61, %v2430_v54  ;;  %v766_v0 = vadd.f32 %v765_v5, %v764_v11 }
  0x88   : >> { %v769_v40 = vsub.f32 %v767_v3, %v768_v4  ;;  %v774_v22 = vadd.f32 %v773_v16, %v772_v17  ;;  %v777_v51 = vsub.f32 %v775_v34, %v776_v15  ;;  %v2516_v20 = vadd.f32 %v746_v30, %v2301_v33  ;;  %v2563_v15 = vld [vmem:[%s2138_s26 + $0xa0] sm:$0xff] }
  0x89   : >> { %v782_v44 = vadd.f32 %v781_v52, %v780_v53  ;;  %v785_v32 = vsub.f32 %v783_v56, %v784_v55  ;;  %v818_v23 = vadd.f32 %v817_v38, %v816_v21  ;;  %v3241_v59 = vsub.f32 %v2268_v10, %v2274_v12 }
  0x8a   : >> { %v830_v31 = vadd.f32 %v829_v45, %v828_v50  ;;  %v835_v24 = vmul.f32 %v2430_v54, %v2496_v7  ;;  %v836_v11 = vmul.f32 %v2499_v61, %v2420_v14  ;;  %v2528_v33 = vadd.f32 %v754_v28, %v2340_v41 }
  0x8b   : >> { %v2521_v63 = vadd.f32 %v749_v19, %v3241_v59  ;;  %v2531_v30 = vadd.f32 %v758_v36, %v2321_v57  ;;  %v3242_v5 = vsub.f32 %v2290_v29, %v2293_v25  ;;  %v834_v12 = vadd.f32 %v833_v39, %v832_v43  ;;  %v3245_v25 = vld [vmem:[#allocation9_spill] sm:$0xff]  ;;  %v2598_v19 = vld [vmem:[%s2127_s19 + $0x30] sm:$0xff] }
  0x8c   : >> { %v2539_v3 = vadd.f32 %v766_v0, %v2342_v1  ;;  %v3243_v4 = vsub.f32 %v2308_v18, %v2311_v46  ;;  %v2547_v41 = vadd.f32 %v774_v22, %v2350_v8  ;;  %v3244_v57 = vsub.f32 %v2326_v60, %v2329_v26  ;;  %v2566_v18 = vld [vmem:[%s2138_s26 + $0x1a0] sm:$0xff]  ;;  %v3248_v46 = vld [vmem:[#allocation11_spill] sm:$0xff]  ;;  %v2609_v43 = vld [vmem:[%s2127_s19 + $0x70] sm:$0xff] }
  0x8d   : >> { %v2536_v10 = vadd.f32 %v761_v42, %v3242_v5  ;;  %v2555_v29 = vadd.f32 %v782_v44, %v2388_v62  ;;  %v3246_v42 = vld [vmem:[#allocation10_spill] sm:$0xff]  ;;  %v2569_v8 = vadd.f32 %v818_v23, %v3248_v46  ;;  %v840_v60 = vmul.f32 %v2496_v7, %v2404_v13 }
  0x8e   : >> { %v2544_v17 = vadd.f32 %v769_v40, %v3243_v4  ;;  %v2552_v16 = vadd.f32 %v777_v51, %v3244_v57  ;;  %v3247_v1 = vsub.f32 %v3245_v25, %v3246_v42  ;;  %v2574_v26 = vadd.f32 %v830_v31, %v2414_v48  ;;  %v1738_v5 = vld [vmem:[%s2138_s26 + $0x1b0] sm:$0xff] }
  0x8f   : >> { %v837_v62 = vsub.f32 %v835_v24, %v836_v11  ;;  %v841_v51 = vmul.f32 %v2499_v61, %v2411_v37  ;;  %v843_v22 = vmul.f32 %v2496_v7, %v2411_v37  ;;  %v2581_v53 = vadd.f32 %v834_v12, %v2417_v49  ;;  %v2626_v24 = vld [vmem:[%s2138_s26 + $0x1c0] sm:$0xff]  ;;  %v1730_v11 = vld [vmem:[%s2138_s26 + $0xb0] sm:$0xff] }
  0x90   : >> { %v2560_v34 = vadd.f32 %v785_v32, %v3247_v1  ;;  %v844_v52 = vmul.f32 %v2499_v61, %v2404_v13  ;;  %v848_v56 = vmul.f32 %v2563_v15, %v2563_v15  ;;  %v849_v48 = vmul.f32 %v2566_v18, %v2566_v18  ;;  %v2619_v32 = vld [vmem:[%s2138_s26 + $0xc0] sm:$0xff] }
  0x91   : >> { %v852_v55 = vmul.f32 %v2563_v15, %v2420_v14  ;;  %v853_v21 = vmul.f32 %v2566_v18, %v2430_v54  ;;  %v855_v49 = vmul.f32 %v2430_v54, %v2563_v15  ;;  %v856_v38 = vmul.f32 %v2566_v18, %v2420_v14 }
  0x92   : >> { %v860_v28 = vmul.f32 %v2563_v15, %v2496_v7  ;;  %v861_v50 = vmul.f32 %v2566_v18, %v2499_v61  ;;  %v863_v45 = vmul.f32 %v2499_v61, %v2563_v15  ;;  %v864_v36 = vmul.f32 %v2566_v18, %v2496_v7 }
  0x93   : >> { %v2612_v39 = vadd.f32 %v837_v62, %v2425_v58  ;;  %v842_v0 = vadd.f32 %v841_v51, %v840_v60  ;;  %v868_v40 = vmul.f32 %v2563_v15, %v2404_v13  ;;  %v869_v44 = vmul.f32 %v2566_v18, %v2411_v37 }
  0x94   : >> { %v845_v23 = vsub.f32 %v843_v22, %v844_v52  ;;  %v871_v59 = vmul.f32 %v2563_v15, %v2411_v37  ;;  %v872_v31 = vmul.f32 %v2566_v18, %v2404_v13  ;;  %v944_v58 = vmul.f32 %v2619_v32, %v2598_v19 }
  0x95   : >> { %3249 = vst [vmem:[#allocation9_spill] sm:$0xff] %v2612_v39  ;;  %v850_v12 = vadd.f32 %v849_v48, %v848_v56  ;;  %v854_v4 = vadd.f32 %v853_v21, %v852_v55  ;;  %v945_v57 = vmul.f32 %v2626_v24, %v2609_v43  ;;  %v947_v25 = vmul.f32 %v2619_v32, %v2609_v43 }
  0x96   : >> { %v857_v42 = vsub.f32 %v855_v49, %v856_v38  ;;  %v862_v1 = vadd.f32 %v861_v50, %v860_v28  ;;  %v865_v46 = vsub.f32 %v863_v45, %v864_v36  ;;  %v948_v60 = vmul.f32 %v2626_v24, %v2598_v19 }
  0x97   : >> { %v870_v62 = vadd.f32 %v869_v44, %v868_v40  ;;  %v876_v51 = vmul.f32 %v1730_v11, %v1730_v11  ;;  %v877_v22 = vmul.f32 %v1738_v5, %v1738_v5  ;;  %v946_v52 = vadd.f32 %v945_v57, %v944_v58 }
  0x98   : >> { %v873_v39 = vsub.f32 %v871_v59, %v872_v31  ;;  %v880_v56 = vmul.f32 %v1730_v11, %v2420_v14  ;;  %v881_v48 = vmul.f32 %v1738_v5, %v2430_v54  ;;  %v949_v55 = vsub.f32 %v947_v25, %v948_v60  ;;  %v2687_v25 = vld [vmem:[%s2138_s26 + $0x1d0] sm:$0xff] }
  0x99   : >> { %v2641_v21 = vadd.f32 %v842_v0, %v2441_v35  ;;  %v883_v49 = vmul.f32 %v2430_v54, %v1730_v11  ;;  %v884_v38 = vmul.f32 %v1738_v5, %v2420_v14  ;;  %v2646_v28 = vadd.f32 %v946_v52, %v2471_v47  ;;  %v3250_v35 = vld [vmem:[#allocation12_spill] sm:$0xff]  ;;  %v3251_v54 = vld [vmem:[#allocation13_spill] sm:$0xff]  ;;  %v3252_v47 = vld [vmem:[#allocation14_spill] sm:$0xff] }
  0x9a   : >> { %v2649_v50 = vadd.f32 %v845_v23, %v2446_v27  ;;  %v2652_v45 = vadd.f32 %v850_v12, %v2453_v2  ;;  %v2655_v36 = vadd.f32 %v854_v4, %v2456_v9  ;;  %v2658_v40 = vadd.f32 %v949_v55, %v2481_v6 }
  0x9b   : >> { %v2661_v0 = vadd.f32 %v857_v42, %v3250_v35  ;;  %v2664_v14 = vadd.f32 %v862_v1, %v3251_v54  ;;  %v2667_v27 = vadd.f32 %v865_v46, %v3252_v47  ;;  %v2670_v2 = vadd.f32 %v870_v62, %v2516_v20 }
  0x9c   : >> { %v2673_v9 = vadd.f32 %v873_v39, %v2521_v63  ;;  %v878_v44 = vadd.f32 %v877_v22, %v876_v51  ;;  %v882_v6 = vadd.f32 %v881_v48, %v880_v56  ;;  %v888_v23 = vmul.f32 %v1730_v11, %v2496_v7  ;;  %v2684_v39 = vld [vmem:[%s2138_s26 + $0xd0] sm:$0xff] }
  0x9d   : >> { %v885_v59 = vsub.f32 %v883_v49, %v884_v38  ;;  %v889_v31 = vmul.f32 %v1738_v5, %v2499_v61  ;;  %v891_v58 = vmul.f32 %v2499_v61, %v1730_v11  ;;  %v892_v12 = vmul.f32 %v1738_v5, %v2496_v7 }
  0x9e   : >> { %v896_v4 = vmul.f32 %v1730_v11, %v2563_v15  ;;  %v897_v57 = vmul.f32 %v1738_v5, %v2566_v18  ;;  %v899_v20 = vmul.f32 %v2566_v18, %v1730_v11  ;;  %v900_v63 = vmul.f32 %v1738_v5, %v2563_v15 }
  0x9f   : >> { %v904_v42 = vmul.f32 %v1730_v11, %v2404_v13  ;;  %v905_v1 = vmul.f32 %v1738_v5, %v2411_v37  ;;  %v940_v61 = vmul.f32 %v2619_v32, %v2619_v32  ;;  %v941_v7 = vmul.f32 %v2626_v24, %v2626_v24 }
  0xa0   : >> { %v907_v46 = vmul.f32 %v1730_v11, %v2411_v37  ;;  %v908_v18 = vmul.f32 %v1738_v5, %v2404_v13  ;;  %v952_v15 = vmul.f32 %v2684_v39, %v2684_v39  ;;  %v953_v60 = vmul.f32 %v2687_v25, %v2687_v25 }
  0xa1   : >> { %v956_v62 = vmul.f32 %v2684_v39, %v2619_v32  ;;  %v957_v51 = vmul.f32 %v2687_v25, %v2626_v24  ;;  %v959_v22 = vmul.f32 %v2626_v24, %v2684_v39  ;;  %v960_v37 = vmul.f32 %v2687_v25, %v2619_v32 }
  0xa2   : >> { %v890_v11 = vadd.f32 %v889_v31, %v888_v23  ;;  %v893_v13 = vsub.f32 %v891_v58, %v892_v12  ;;  %v964_v5 = vmul.f32 %v2684_v39, %v2598_v19  ;;  %v965_v52 = vmul.f32 %v2687_v25, %v2609_v43  ;;  %v2733_v12 = vld [vmem:[%s2138_s26 + $0xe0] sm:$0xff] }
  0xa3   : >> { %v2714_v56 = vadd.f32 %v878_v44, %v2528_v33  ;;  %v2717_v48 = vadd.f32 %v882_v6, %v2531_v30  ;;  %v898_v55 = vadd.f32 %v897_v57, %v896_v4  ;;  %v942_v49 = vadd.f32 %v941_v7, %v940_v61  ;;  %v2736_v4 = vld [vmem:[%s2138_s26 + $0x1e0] sm:$0xff]  ;;  %v3253_v7 = vld [vmem:[#allocation9_spill] sm:$0xff] }
  0xa4   : >> { %v901_v38 = vsub.f32 %v899_v20, %v900_v63  ;;  %v906_v35 = vadd.f32 %v905_v1, %v904_v42  ;;  %v909_v54 = vsub.f32 %v907_v46, %v908_v18  ;;  %v954_v47 = vadd.f32 %v953_v60, %v952_v15  ;;  %v2759_v1 = vld [vmem:[%s2138_s26 + $0xf0] sm:$0xff] }
  0xa5   : >> { %v958_v23 = vadd.f32 %v957_v51, %v956_v62  ;;  %v961_v31 = vsub.f32 %v959_v22, %v960_v37  ;;  %v967_v58 = vmul.f32 %v2684_v39, %v2609_v43  ;;  %v968_v33 = vmul.f32 %v2687_v25, %v2598_v19 }
  0xa6   : >> { %v2724_v44 = vadd.f32 %v885_v59, %v2536_v10  ;;  %v2727_v30 = vadd.f32 %v890_v11, %v2539_v3  ;;  %v2730_v6 = vadd.f32 %v893_v13, %v2544_v17  ;;  %v966_v57 = vadd.f32 %v965_v52, %v964_v5 }
  0xa7   : >> { %v2739_v20 = vadd.f32 %v898_v55, %v2547_v41  ;;  %v943_v63 = vadd.f32 %v942_v49, %v2569_v8  ;;  %v972_v10 = vmul.f32 %v2733_v12, %v2733_v12  ;;  %v973_v3 = vmul.f32 %v2736_v4, %v2736_v4  ;;  %v2762_v8 = vld [vmem:[%s2138_s26 + $0x1f0] sm:$0xff] }
  0xa8   : >> { %v2747_v59 = vadd.f32 %v901_v38, %v2552_v16  ;;  %v2750_v17 = vadd.f32 %v906_v35, %v2555_v29  ;;  %v2753_v42 = vadd.f32 %v909_v54, %v2560_v34  ;;  %v2756_v41 = vadd.f32 %v954_v47, %v2574_v26 }
  0xa9   : >> { %v2765_v61 = vadd.f32 %v958_v23, %v2581_v53  ;;  %v2768_v46 = vadd.f32 %v961_v31, %v3253_v7  ;;  %v969_v16 = vsub.f32 %v967_v58, %v968_v33  ;;  %v976_v29 = vmul.f32 %v2733_v12, %v2619_v32 }
  0xaa   : >> { %v2773_v34 = vadd.f32 %v966_v57, %v2641_v21  ;;  %v977_v26 = vmul.f32 %v2736_v4, %v2626_v24  ;;  %v979_v18 = vmul.f32 %v2626_v24, %v2733_v12  ;;  %v980_v53 = vmul.f32 %v2736_v4, %v2619_v32 }
  0xab   : >> { %v974_v15 = vadd.f32 %v973_v3, %v972_v10  ;;  %v984_v60 = vmul.f32 %v2733_v12, %v2684_v39  ;;  %v985_v62 = vmul.f32 %v2736_v4, %v2687_v25  ;;  %v1036_v51 = vadd.f32 1e-06, %v943_v63 }
  0xac   : >> { %v987_v21 = vmul.f32 %v2687_v25, %v2733_v12  ;;  %v988_v22 = vmul.f32 %v2736_v4, %v2684_v39  ;;  %v1004_v37 = vmul.f32 %v2759_v1, %v2619_v32  ;;  %v1005_v11 = vmul.f32 %v2762_v8, %v2626_v24 }
  0xad   : >> { %v2794_v13 = vadd.f32 %v969_v16, %v2649_v50  ;;  %v1007_v5 = vmul.f32 %v2626_v24, %v2759_v1  ;;  %v1008_v52 = vmul.f32 %v2762_v8, %v2619_v32  ;;  %1814 = vrcp.f32 %v1036_v51 }
  0xae   : >> { %v978_v55 = vadd.f32 %v977_v26, %v976_v29  ;;  %v981_v49 = vsub.f32 %v979_v18, %v980_v53  ;;  %v1000_v38 = vmul.f32 %v2759_v1, %v2759_v1  ;;  %v1001_v35 = vmul.f32 %v2762_v8, %v2762_v8 }
  0xaf   : >> { %v986_v54 = vadd.f32 %v985_v62, %v984_v60  ;;  %v992_v50 = vmul.f32 %v2733_v12, %v2598_v19  ;;  %v1012_v47 = vmul.f32 %v2759_v1, %v2684_v39  ;;  %v1013_v24 = vmul.f32 %v2762_v8, %v2687_v25 }
  0xb0   : >> { %v989_v32 = vsub.f32 %v987_v21, %v988_v22  ;;  %v993_v23 = vmul.f32 %v2736_v4, %v2609_v43  ;;  %v1006_v31 = vadd.f32 %v1005_v11, %v1004_v37  ;;  %v1015_v58 = vmul.f32 %v2687_v25, %v2759_v1 }
  0xb1   : >> { %v1009_v33 = vsub.f32 %v1007_v5, %v1008_v52  ;;  %v1016_v57 = vmul.f32 %v2762_v8, %v2684_v39  ;;  %v1044_v63 = vmul.f32 %v2765_v61, %v2765_v61  ;;  %v1045_v10 = vmul.f32 %v2768_v46, %v2768_v46 }
  0xb2   : >> { %v2821_v3 = vadd.f32 %v974_v15, %v2652_v45  ;;  %v2825_v7 = vmul.f32 %v2733_v12, %v2609_v43  ;;  %v2829_v25 = vmul.f32 %v2736_v4, %v2598_v19  ;;  %v1002_v16 = vadd.f32 %v1001_v35, %v1000_v38 }
  0xb3   : >> { %v982_v39 = vadd.f32 %v978_v55, %v2655_v36  ;;  %v1014_v29 = vadd.f32 %v1013_v24, %v1012_v47  ;;  %v1020_v26 = vmul.f32 %v2759_v1, %v2733_v12  ;;  %v1021_v18 = vmul.f32 %v2762_v8, %v2736_v4 }
  0xb4   : >> { %v983_v45 = vadd.f32 %v981_v49, %v2661_v0  ;;  %v990_v53 = vadd.f32 %v986_v54, %v2664_v14  ;;  %v991_v15 = vadd.f32 %v989_v32, %v2667_v27  ;;  %v2839_v60 = vadd.f32 %v993_v23, %v992_v50 }
  0xb5   : >> { %v1010_v62 = vadd.f32 %v1006_v31, %v2717_v48  ;;  %v1011_v51 = vadd.f32 %v1009_v33, %v2724_v44  ;;  %v1017_v36 = vsub.f32 %v1015_v58, %v1016_v57  ;;  %v1046_v21 = vadd.f32 %v1045_v10, %v1044_v63 }
  0xb6   : >> { %v997_v22 = vsub.f32 %v2825_v7, %v2829_v25  ;;  %v2846_v37 = vadd.f32 %v1002_v16, %v2714_v56  ;;  %v2850_v0 = vmul.f32 %v2736_v4, %v2759_v1  ;;  %v1054_v14 = vsub.f32 0.0, %v2768_v46 }
  0xb7   : >> { %v2853_v27 = vpop.eup %1814  ;;  %v1018_v48 = vadd.f32 %v1014_v29, %v2727_v30  ;;  %v1022_v11 = vadd.f32 %v1021_v18, %v1020_v26  ;;  %v2858_v44 = vmul.f32 %v2762_v8, %v2733_v12  ;;  %v1028_v5 = vmul.f32 %v2759_v1, %v2598_v19 }
  0xb8   : >> { %v1029_v56 = vmul.f32 %v2762_v8, %v2609_v43  ;;  %v2866_v4 = vmul.f32 %v2759_v1, %v2609_v43  ;;  %v2869_v52 = vmul.f32 %v2853_v27, %v982_v39  ;;  %v2872_v30 = vmul.f32 %v2853_v27, %v983_v45 }
  0xb9   : >> { %v1019_v55 = vadd.f32 %v1017_v36, %v2730_v6  ;;  %v2876_v12 = vmul.f32 %v2853_v27, %v1010_v62  ;;  %v2879_v49 = vmul.f32 %v2853_v27, %v1011_v51  ;;  %v1047_v38 = vmul.f32 %v2853_v27, %v1046_v21 }
  0xba   : >> { %v1055_v43 = vmul.f32 %v2869_v52, %v2765_v61  ;;  %v1056_v1 = vmul.f32 %v1054_v14, %v2872_v30  ;;  %v1058_v35 = vmul.f32 %v1054_v14, %v2869_v52  ;;  %v1059_v54 = vmul.f32 %v2872_v30, %v2765_v61 }
  0xbb   : >> { %v1048_v6 = vsub.f32 %v2756_v41, %v1047_v38  ;;  %v1049_v50 = vmul.f32 %v982_v39, %v982_v39  ;;  %v1050_v47 = vmul.f32 %v983_v45, %v983_v45  ;;  %v1068_v24 = vmul.f32 %v2876_v12, %v2765_v61 }
  0xbc   : >> { %v1063_v32 = vmul.f32 %v1010_v62, %v1010_v62  ;;  %v1064_v23 = vmul.f32 %v1011_v51, %v1011_v51  ;;  %v1069_v31 = vmul.f32 %v1054_v14, %v2879_v49  ;;  %v1071_v58 = vmul.f32 %v1054_v14, %v2876_v12 }
  0xbd   : >> { %v1057_v33 = vsub.f32 %v1055_v43, %v1056_v1  ;;  %v1060_v57 = vadd.f32 %v1059_v54, %v1058_v35  ;;  %v1072_v63 = vmul.f32 %v2879_v49, %v2765_v61  ;;  %v1076_v10 = vsub.f32 0.0, %v983_v45 }
  0xbe   : >> { %v1025_v41 = vsub.f32 %v2850_v0, %v2858_v44  ;;  %v1032_v16 = vmul.f32 %v2762_v8, %v2598_v19  ;;  %v1038_v29 = vmul.f32 %v2853_v27, %v2765_v61  ;;  %v1039_v26 = vmul.f32 %v2853_v27, %v2768_v46 }
  0xbf   : >> { %v1026_v18 = vadd.f32 %v1022_v11, %v2739_v20  ;;  %v1070_v62 = vsub.f32 %v1068_v24, %v1069_v31  ;;  %v1073_v51 = vadd.f32 %v1072_v63, %v1071_v58  ;;  %v1085_v36 = vadd.f32 1e-06, %v1048_v6 }
  0xc0   : >> { %v1030_v21 = vadd.f32 %v1029_v56, %v1028_v5  ;;  %v1051_v14 = vadd.f32 %v1050_v47, %v1049_v50  ;;  %v1065_v45 = vadd.f32 %v1064_v23, %v1063_v32  ;;  %v1077_v38 = vmul.f32 %v2876_v12, %v982_v39 }
  0xc1   : >> { %v1061_v0 = vsub.f32 %v990_v53, %v1057_v33  ;;  %v1062_v44 = vsub.f32 %v991_v15, %v1060_v57  ;;  %v1078_v19 = vmul.f32 %v1076_v10, %v2879_v49  ;;  %1816 = vrcp.f32 %v1085_v36 }
  0xc2   : >> { %v1080_v8 = vmul.f32 %v1076_v10, %v2876_v12  ;;  %v1081_v61 = vmul.f32 %v2879_v49, %v982_v39  ;;  %v2908_v46 = vsub.f32 0.0, %v1038_v29  ;;  %v2910_v20 = vsub.f32 0.0, %v1039_v26 }
  0xc3   : >> { %v1074_v11 = vsub.f32 %v1018_v48, %v1070_v62  ;;  %v1075_v43 = vsub.f32 %v1019_v55, %v1073_v51  ;;  %v2914_v5 = vmul.f32 %v2853_v27, %v2646_v28  ;;  %v2918_v53 = vmul.f32 %v2853_v27, %v2658_v40 }
  0xc4   : >> { %v1167_v15 = vmul.f32 %v2908_v46, %v2646_v28  ;;  %v1168_v39 = vmul.f32 %v2910_v20, %v2658_v40  ;;  %v1170_v56 = vmul.f32 %v2908_v46, %v2658_v40  ;;  %v1171_v48 = vmul.f32 %v2910_v20, %v2646_v28 }
  0xc5   : >> { %v1091_v55 = vmul.f32 %v1061_v0, %v1061_v0  ;;  %v1092_v1 = vmul.f32 %v1062_v44, %v1062_v44  ;;  %v1096_v35 = vmul.f32 %v1074_v11, %v1074_v11  ;;  %v1097_v54 = vmul.f32 %v1075_v43, %v1075_v43 }
  0xc6   : >> { %v1033_v6 = vsub.f32 %v2866_v4, %v1032_v16  ;;  %v1052_v50 = vmul.f32 %v2853_v27, %v1051_v14  ;;  %v1169_v47 = vsub.f32 %v1167_v15, %v1168_v39  ;;  %v1172_v24 = vadd.f32 %v1171_v48, %v1170_v56 }
  0xc7   : >> { %v1027_v32 = vadd.f32 %v1025_v41, %v2747_v59  ;;  %v1066_v23 = vmul.f32 %v2853_v27, %v1065_v45  ;;  %v1079_v31 = vsub.f32 %v1077_v38, %v1078_v19  ;;  %v1082_v58 = vadd.f32 %v1081_v61, %v1080_v8 }
  0xc8   : >> { %v2934_v33 = vadd.f32 %v2839_v60, %v2670_v2  ;;  %v2940_v57 = vadd.f32 %v997_v22, %v2673_v9  ;;  %v1173_v4 = vadd.f32 %v1169_v47, %v2773_v34  ;;  %v1174_v63 = vadd.f32 %v1172_v24, %v2794_v13 }
  0xc9   : >> { %v1093_v10 = vadd.f32 %v1092_v1, %v1091_v55  ;;  %v1098_v59 = vadd.f32 %v1097_v54, %v1096_v35  ;;  %v1230_v41 = vmul.f32 %v2908_v46, %v2908_v46  ;;  %v1231_v16 = vmul.f32 %v2910_v20, %v2910_v20 }
  0xca   : >> { %v2949_v2 = vadd.f32 %v1030_v21, %v2750_v17  ;;  %v2952_v60 = vadd.f32 %v1033_v6, %v2753_v42  ;;  %v1053_v9 = vsub.f32 %v2821_v3, %v1052_v50  ;;  %v1101_v7 = vsub.f32 0.0, %v1062_v44 }
  0xcb   : >> { %v2955_v25 = vpop.eup %1816  ;;  %v1067_v22 = vsub.f32 %v2846_v37, %v1066_v23  ;;  %v1083_v29 = vsub.f32 %v1026_v18, %v1079_v31  ;;  %v1084_v26 = vsub.f32 %v1027_v32, %v1082_v58  ;;  %v1221_v62 = vsub.f32 0.0, %v2910_v20 }
  0xcc   : >> { %v1087_v51 = vmul.f32 %v2955_v25, %v1061_v0  ;;  %v1088_v36 = vmul.f32 %v2955_v25, %v1062_v44  ;;  %v2962_v17 = vmul.f32 %v2955_v25, %v1074_v11  ;;  %v2965_v42 = vmul.f32 %v2955_v25, %v1075_v43 }
  0xcd   : >> { %v1094_v3 = vmul.f32 %v2955_v25, %v1093_v10  ;;  %v1099_v21 = vmul.f32 %v2955_v25, %v1098_v59  ;;  %v2970_v37 = vmul.f32 %v2955_v25, %v1173_v4  ;;  %v1232_v18 = vadd.f32 %v1231_v16, %v1230_v41 }
  0xce   : >> { %v1102_v14 = vmul.f32 %v2962_v17, %v1061_v0  ;;  %v1103_v45 = vmul.f32 %v1101_v7, %v2965_v42  ;;  %v1105_v38 = vmul.f32 %v1101_v7, %v2962_v17  ;;  %v1106_v44 = vmul.f32 %v2965_v42, %v1061_v0 }
  0xcf   : >> { %v1095_v19 = vsub.f32 %v1053_v9, %v1094_v3  ;;  %v1123_v8 = vmul.f32 %v2908_v46, %v1087_v51  ;;  %v1124_v61 = vmul.f32 %v2910_v20, %v1088_v36  ;;  %v2979_v11 = vmul.f32 %v2955_v25, %v1174_v63 }
  0xd0   : >> { %v1104_v43 = vsub.f32 %v1102_v14, %v1103_v45  ;;  %v1107_v15 = vadd.f32 %v1106_v44, %v1105_v38  ;;  %v1126_v39 = vmul.f32 %v2910_v20, %v1087_v51  ;;  %v1127_v56 = vmul.f32 %v2908_v46, %v1088_v36 }
  0xd1   : >> { %v1110_v48 = vadd.f32 1e-06, %v1095_v19  ;;  %v1125_v55 = vsub.f32 %v1123_v8, %v1124_v61  ;;  %v1133_v1 = vmul.f32 %v2908_v46, %v2962_v17  ;;  %v1134_v0 = vmul.f32 %v2910_v20, %v2965_v42 }
  0xd2   : >> { %v1108_v35 = vsub.f32 %v1083_v29, %v1104_v43  ;;  %v1109_v54 = vsub.f32 %v1084_v26, %v1107_v15  ;;  %v1128_v6 = vadd.f32 %v1127_v56, %v1126_v39  ;;  %v1136_v50 = vmul.f32 %v2910_v20, %v2962_v17 }
  0xd3   : >> { %1818 = vrcp.f32 %v1110_v48  ;;  %v1129_v47 = vadd.f32 %v1125_v55, %v2869_v52  ;;  %v1135_v24 = vsub.f32 %v1133_v1, %v1134_v0  ;;  %v1137_v32 = vmul.f32 %v2908_v46, %v2965_v42 }
  0xd4   : >> { %v1114_v23 = vmul.f32 %v1108_v35, %v1108_v35  ;;  %v1115_v31 = vmul.f32 %v1109_v54, %v1109_v54  ;;  %v1130_v58 = vadd.f32 %v1128_v6, %v2872_v30  ;;  %v2993_v4 = vsub.f32 0.0, %v1087_v51 }
  0xd5   : >> { %v1100_v63 = vsub.f32 %v1067_v22, %v1099_v21  ;;  %v2995_v10 = vsub.f32 0.0, %v1129_v47  ;;  %v1138_v59 = vadd.f32 %v1137_v32, %v1136_v50  ;;  %v2997_v41 = vsub.f32 0.0, %v1088_v36 }
  0xd6   : >> { %v1116_v20 = vadd.f32 %v1115_v31, %v1114_v23  ;;  %v2999_v16 = vsub.f32 0.0, %v1130_v58  ;;  %v1139_v52 = vadd.f32 %v1135_v24, %v2876_v12  ;;  %v1185_v9 = vmul.f32 %v2993_v4, %v2773_v34 }
  0xd7   : >> { %v1177_v7 = vmul.f32 %v2995_v10, %v2646_v28  ;;  %v1180_v30 = vmul.f32 %v2995_v10, %v2658_v40  ;;  %v1186_v22 = vmul.f32 %v2997_v41, %v2794_v13  ;;  %v1188_v29 = vmul.f32 %v2993_v4, %v2794_v13 }
  0xd8   : >> { %v1178_v26 = vmul.f32 %v2999_v16, %v2658_v40  ;;  %v1181_v12 = vmul.f32 %v2999_v16, %v2646_v28  ;;  %v1189_v51 = vmul.f32 %v2997_v41, %v2773_v34  ;;  %v1222_v36 = vmul.f32 %v2970_v37, %v2908_v46 }
  0xd9   : >> { %v1140_v3 = vadd.f32 %v1138_v59, %v2879_v49  ;;  %v1223_v21 = vmul.f32 %v1221_v62, %v2979_v11  ;;  %v1225_v14 = vmul.f32 %v2979_v11, %v2908_v46  ;;  %v1226_v45 = vmul.f32 %v1221_v62, %v2970_v37 }
  0xda   : >> { %v1179_v38 = vsub.f32 %v1177_v7, %v1178_v26  ;;  %v1182_v44 = vadd.f32 %v1181_v12, %v1180_v30  ;;  %v1187_v19 = vsub.f32 %v1185_v9, %v1186_v22  ;;  %v1233_v8 = vmul.f32 %v2955_v25, %v1232_v18 }
  0xdb   : >> { %v1190_v61 = vadd.f32 %v1189_v51, %v1188_v29  ;;  %v1224_v43 = vsub.f32 %v1222_v36, %v1223_v21  ;;  %v1227_v15 = vadd.f32 %v1226_v45, %v1225_v14  ;;  %v1244_v39 = vmul.f32 %v2995_v10, %v2995_v10 }
  0xdc   : >> { %v1183_v49 = vadd.f32 %v1179_v38, %v2934_v33  ;;  %v1184_v56 = vadd.f32 %v1182_v44, %v2940_v57  ;;  %v1235_v48 = vsub.f32 0.0, %v2999_v16  ;;  %v1245_v46 = vmul.f32 %v2999_v16, %v2999_v16 }
  0xdd   : >> { %v3033_v62 = vpop.eup %1818  ;;  %v3036_v55 = vadd.f32 %v1224_v43, %v2914_v5  ;;  %v3039_v18 = vadd.f32 %v1227_v15, %v2918_v53  ;;  %v3042_v1 = vadd.f32 %v2853_v27, %v1233_v8  ;;  %v1273_v0 = vsub.f32 0.0, %v2997_v41 }
  0xde   : >> { %v1112_v6 = vmul.f32 %v3033_v62, %v1108_v35  ;;  %v1113_v50 = vmul.f32 %v3033_v62, %v1109_v54  ;;  %v1117_v47 = vmul.f32 %v3033_v62, %v1116_v20  ;;  %v1191_v24 = vadd.f32 %v1187_v19, %v1183_v49 }
  0xdf   : >> { %v1192_v32 = vadd.f32 %v1190_v61, %v1184_v56  ;;  %v1246_v23 = vadd.f32 %v1245_v46, %v1244_v39  ;;  %v3050_v5 = vmul.f32 %v2993_v4, %v2993_v4  ;;  %v3054_v53 = vmul.f32 %v2997_v41, %v2997_v41 }
  0xe0   : >> { %v1118_v27 = vsub.f32 %v1100_v63, %v1117_v47  ;;  %v1141_v31 = vmul.f32 %v2995_v10, %v1112_v6  ;;  %v1142_v35 = vmul.f32 %v2999_v16, %v1113_v50  ;;  %v1144_v54 = vmul.f32 %v2999_v16, %v1112_v6 }
  0xe1   : >> { %v1145_v58 = vmul.f32 %v2995_v10, %v1113_v50  ;;  %v1153_v59 = vmul.f32 %v2993_v4, %v1112_v6  ;;  %v1154_v20 = vmul.f32 %v2997_v41, %v1113_v50  ;;  %v1156_v9 = vmul.f32 %v2997_v41, %v1112_v6 }
  0xe2   : >> { %v1119_v7 = vadd.f32 1e-06, %v1118_v27  ;;  %v1143_v30 = vsub.f32 %v1141_v31, %v1142_v35  ;;  %v1157_v22 = vmul.f32 %v2993_v4, %v1113_v50  ;;  %v3064_v29 = vsub.f32 0.0, %v1112_v6 }
  0xe3   : >> { %v1146_v63 = vadd.f32 %v1145_v58, %v1144_v54  ;;  %v1155_v26 = vsub.f32 %v1153_v59, %v1154_v20  ;;  %v3066_v12 = vsub.f32 0.0, %v1113_v50  ;;  %v3069_v16 = vmul.f32 %v3033_v62, %v1191_v24 }
  0xe4   : >> { %1820 = vrcp.f32 %v1119_v7  ;;  %v1147_v51 = vadd.f32 %v1143_v30, %v1139_v52  ;;  %v1158_v36 = vadd.f32 %v1157_v22, %v1156_v9  ;;  %v3072_v21 = vmul.f32 %v3033_v62, %v1192_v32 }
  0xe5   : >> { %v1148_v14 = vadd.f32 %v1146_v63, %v1140_v3  ;;  %v1159_v45 = vadd.f32 %v1155_v26, %v2962_v17  ;;  %v1211_v38 = vmul.f32 %v3064_v29, %v2934_v33  ;;  %v1212_v44 = vmul.f32 %v3066_v12, %v2940_v57 }
  0xe6   : >> { %v3079_v19 = vsub.f32 0.0, %v1147_v51  ;;  %v1160_v8 = vadd.f32 %v1158_v36, %v2965_v42  ;;  %v1214_v52 = vmul.f32 %v3064_v29, %v2940_v57  ;;  %v1215_v61 = vmul.f32 %v3066_v12, %v2934_v33 }
  0xe7   : >> { %v1150_v43 = vsub.f32 0.0, %v1148_v14  ;;  %v3086_v3 = vsub.f32 0.0, %v1159_v45  ;;  %v1213_v17 = vsub.f32 %v1211_v38, %v1212_v44  ;;  %v1236_v15 = vmul.f32 %v3069_v16, %v2995_v10 }
  0xe8   : >> { %v3090_v39 = vsub.f32 0.0, %v1160_v8  ;;  %v1195_v49 = vmul.f32 %v3079_v19, %v2646_v28  ;;  %v1198_v42 = vmul.f32 %v3079_v19, %v2658_v40  ;;  %v1216_v56 = vadd.f32 %v1215_v61, %v1214_v52 }
  0xe9   : >> { %v1196_v57 = vmul.f32 %v1150_v43, %v2658_v40  ;;  %v1199_v33 = vmul.f32 %v1150_v43, %v2646_v28  ;;  %v1203_v46 = vmul.f32 %v3086_v3, %v2773_v34  ;;  %v1206_v6 = vmul.f32 %v3086_v3, %v2794_v13 }
  0xea   : >> { %v1204_v50 = vmul.f32 %v3090_v39, %v2794_v13  ;;  %v1207_v47 = vmul.f32 %v3090_v39, %v2773_v34  ;;  %v1237_v24 = vmul.f32 %v1235_v48, %v3072_v21  ;;  %v1239_v32 = vmul.f32 %v3072_v21, %v2995_v10 }
  0xeb   : >> { %v1197_v40 = vsub.f32 %v1195_v49, %v1196_v57  ;;  %v1200_v27 = vadd.f32 %v1199_v33, %v1198_v42  ;;  %v1240_v28 = vmul.f32 %v1235_v48, %v3069_v16  ;;  %v1247_v31 = vmul.f32 %v3033_v62, %v1246_v23 }
  0xec   : >> { %v1205_v35 = vsub.f32 %v1203_v46, %v1204_v50  ;;  %v1208_v54 = vadd.f32 %v1207_v47, %v1206_v6  ;;  %v1238_v58 = vsub.f32 %v1236_v15, %v1237_v24  ;;  %v1249_v59 = vsub.f32 0.0, %v1150_v43 }
  0xed   : >> { %v1201_v13 = vadd.f32 %v1197_v40, %v2949_v2  ;;  %v1202_v20 = vadd.f32 %v1200_v27, %v2952_v60  ;;  %v1241_v34 = vadd.f32 %v1240_v28, %v1239_v32  ;;  %v1248_v9 = vadd.f32 %v1247_v31, %v3042_v1 }
  0xee   : >> { %v3114_v7 = vpop.eup %1820  ;;  %v1242_v10 = vadd.f32 %v1238_v58, %v3036_v55  ;;  %v1258_v48 = vmul.f32 %v3079_v19, %v3079_v19  ;;  %v1259_v30 = vmul.f32 %v1150_v43, %v1150_v43  ;;  %v1274_v23 = vmul.f32 %v3069_v16, %v2993_v4 }
  0xef   : >> { %v1209_v22 = vadd.f32 %v1205_v35, %v1201_v13  ;;  %v1210_v63 = vadd.f32 %v1208_v54, %v1202_v20  ;;  %v1243_v2 = vadd.f32 %v1241_v34, %v3039_v18  ;;  %v1275_v60 = vmul.f32 %v1273_v0, %v3072_v21 }
  0xf0   : >> { %v1260_v1 = vadd.f32 %v1259_v30, %v1258_v48  ;;  %v1277_v26 = vmul.f32 %v3072_v21, %v2993_v4  ;;  %v1278_v55 = vmul.f32 %v1273_v0, %v3069_v16  ;;  %v1284_v51 = vadd.f32 %v3054_v53, %v3050_v5 }
  0xf1   : >> { %v1217_v36 = vadd.f32 %v1213_v17, %v1209_v22  ;;  %v1218_v14 = vadd.f32 %v1216_v56, %v1210_v63  ;;  %v1276_v45 = vsub.f32 %v1274_v23, %v1275_v60  ;;  %v1287_v18 = vsub.f32 0.0, %v3090_v39  ;;  %v3254_v56 = vld [vmem:[#allocation8_spill] sm:$0xff] }
  0xf2   : >> { %v1261_v38 = vmul.f32 %v3114_v7, %v1260_v1  ;;  %v1279_v44 = vadd.f32 %v1278_v55, %v1277_v26  ;;  %v1285_v8 = vmul.f32 %v3033_v62, %v1284_v51  ;;  %v1296_v4 = vmul.f32 %v3086_v3, %v3086_v3 }
  0xf3   : >> { %v3138_v52 = vmul.f32 %v3114_v7, %v1217_v36  ;;  %v3141_v41 = vmul.f32 %v3114_v7, %v1218_v14  ;;  %v1280_v0 = vadd.f32 %v1276_v45, %v2970_v37  ;;  %v1297_v5 = vmul.f32 %v3090_v39, %v3090_v39 }
  0xf4   : >> { %v1262_v53 = vadd.f32 %v1261_v38, %v1248_v9  ;;  %v1281_v61 = vadd.f32 %v1279_v44, %v2979_v11  ;;  %v1286_v43 = vadd.f32 %v2955_v25, %v1285_v8  ;;  %v1311_v17 = vsub.f32 0.0, %v3066_v12 }
  0xf5   : >> { %v1250_v15 = vmul.f32 %v3138_v52, %v3079_v19  ;;  %v1251_v49 = vmul.f32 %v1249_v59, %v3141_v41  ;;  %v1253_v42 = vmul.f32 %v3141_v41, %v3079_v19  ;;  %v1254_v37 = vmul.f32 %v1249_v59, %v3138_v52 }
  0xf6   : >> { %v1263_v57 = vmul.f32 %v1262_v53, %v3254_v56  ;;  %v1288_v39 = vmul.f32 %v3138_v52, %v3086_v3  ;;  %v1289_v11 = vmul.f32 %v1287_v18, %v3141_v41  ;;  %v1291_v25 = vmul.f32 %v3141_v41, %v3086_v3 }
  0xf7   : >> { %v1252_v33 = vsub.f32 %v1250_v15, %v1251_v49  ;;  %v1255_v46 = vadd.f32 %v1254_v37, %v1253_v42  ;;  %v1292_v6 = vmul.f32 %v1287_v18, %v3138_v52  ;;  %v1298_v50 = vadd.f32 %v1297_v5, %v1296_v4 }
  0xf8   : >> { %v1264_v47 = vadd.f32 1e-06, %v1263_v57  ;;  %v1290_v24 = vsub.f32 %v1288_v39, %v1289_v11  ;;  %v1312_v19 = vmul.f32 %v3138_v52, %v3064_v29  ;;  %v1313_v32 = vmul.f32 %v1311_v17, %v3141_v41 }
  0xf9   : >> { %v1256_v40 = vadd.f32 %v1252_v33, %v1242_v10  ;;  %v1257_v27 = vadd.f32 %v1255_v46, %v1243_v2  ;;  %v1293_v28 = vadd.f32 %v1292_v6, %v1291_v25  ;;  %v1299_v31 = vmul.f32 %v3114_v7, %v1298_v50 }
  0xfa   : >> { %1822 = vrcp.f32 %v1264_v47  ;;  %v1294_v35 = vadd.f32 %v1290_v24, %v1280_v0  ;;  %v1314_v3 = vsub.f32 %v1312_v19, %v1313_v32  ;;  %v1315_v54 = vmul.f32 %v3141_v41, %v3064_v29 }
  0xfb   : >> { %v1295_v58 = vadd.f32 %v1293_v28, %v1281_v61  ;;  %v1300_v59 = vadd.f32 %v1299_v31, %v1286_v43  ;;  %v1316_v13 = vmul.f32 %v1311_v17, %v3138_v52  ;;  %v1320_v20 = vmul.f32 %v3064_v29, %v3064_v29 }
  0xfc   : >> { %v1318_v34 = vadd.f32 %v1314_v3, %v3069_v16  ;;  %v1321_v9 = vmul.f32 %v3066_v12, %v3066_v12  ;;  %v1335_v10 = vmul.f32 %v3114_v7, %v3254_v56 }
  0xfd   : >> { %v1301_v48 = vmul.f32 %v1300_v59, %v3254_v56  ;;  %v1317_v30 = vadd.f32 %v1316_v13, %v1315_v54 }
  0xfe   : >> { %v1322_v23 = vadd.f32 %v1321_v9, %v1320_v20  ;;  %v1336_v22 = vadd.f32 1e-06, %v1335_v10 }
  0xff   : >> { %v1302_v63 = vadd.f32 1e-06, %v1301_v48  ;;  %v1319_v2 = vadd.f32 %v1317_v30, %v3072_v21 }
 0x100   : >> { %v1323_v29 = vmul.f32 %v3114_v7, %v1322_v23  ;;  %1824 = vrcp.f32 %v1336_v22 }
 0x101   : >> { %1826 = vrcp.f32 %v1302_v63 }
 0x102   : >> { %v1324_v16 = vadd.f32 %v3033_v62, %v1323_v29 }
 0x104   : >> { %v1823_v60 = vpop.eup %1822  ;;  %v1325_v12 = vmul.f32 %v1324_v16, %v3254_v56 }
 0x105   : >> { %v1266_v1 = vmul.f32 2.828427, %v1823_v60 }
 0x106   : >> { %v1326_v26 = vadd.f32 1e-06, %v1325_v12 }
 0x107   : >> { %v1267_v55 = vmul.f32 %v1266_v1, %v1256_v40  ;;  %v1270_v51 = vmul.f32 %v1266_v1, %v1257_v27 }
 0x108   : >> { %1828 = vrcp.f32 %v1326_v26 }
 0x109   : >> { %1269 = vst [vmem:[%s1268_s30] sm:$0xff] %v1267_v55  ;;  %1760 = vst [vmem:[%s1268_s30 + $0x10] sm:$0xff] %v1270_v51 }
 0x10a   : >> { %v1825_v36 = vpop.eup %1824 }
 0x10b   : >> { %v1827_v14 = vpop.eup %1826  ;;  %v1338_v21 = vmul.f32 2.828427, %v1825_v36 }
 0x10c   : >> { %v1304_v45 = vmul.f32 2.828427, %v1827_v14 }
 0x10d   : >> { %v1339_v7 = vmul.f32 %v1338_v21, %v3138_v52  ;;  %v1342_v18 = vmul.f32 %v1338_v21, %v3141_v41 }
 0x10e   : >> { %v1305_v62 = vmul.f32 %v1304_v45, %v1294_v35  ;;  %v1308_v38 = vmul.f32 %v1304_v45, %v1295_v58 }
 0x10f   : >> { %1770 = vst [vmem:[%s1268_s30 + $0x60] sm:$0xff] %v1339_v7  ;;  %1772 = vst [vmem:[%s1268_s30 + $0x70] sm:$0xff] %v1342_v18 }
 0x110   : >> { %1762 = vst [vmem:[%s1268_s30 + $0x20] sm:$0xff] %v1305_v62  ;;  %1764 = vst [vmem:[%s1268_s30 + $0x30] sm:$0xff] %v1308_v38 }
 0x111   : > { %554 = sbr.rel (!%p552_p1) target bundleno = 91 (0x5b), region = 240 }
 0x112   : >> { %v1829_v44 = vpop.eup %1828 }
 0x113   : >> { %v1328_v8 = vmul.f32 2.828427, %v1829_v44 }
 0x115   : >> { %v1329_v4 = vmul.f32 %v1328_v8, %v1318_v34  ;;  %v1332_v0 = vmul.f32 %v1328_v8, %v1319_v2 }
 0x117   : >> { %1766 = vst [vmem:[%s1268_s30 + $0x40] sm:$0xff] %v1329_v4  ;;  %1768 = vst [vmem:[%s1268_s30 + $0x50] sm:$0xff] %v1332_v0 }
 0x118   : > { %1351 = sbr.rel (!%p1935_p10) target bundleno = 296 (0x128), region = 115  ;;  %s1780_s4 = sshll.u32 (%p1935_p10), %s1916_s0, 4 }
 0x119   : > { %s1354_s7 = scalar_lea.vmem (%p1935_p10), %s3223_s3, %s1780_s4 }
 0x11e   : > { %v1412_v52 = vld [vmem:[%s2114_s22] sm:$0xff] (%p1935_p10)  ;;  %v1414_v41 = vld [vmem:[%s2114_s22 + $0x8] sm:$0xff] (%p1935_p10)  ;;  %v1416_v5 = vld [vmem:[%s2114_s22 + $0x10] sm:$0xff] (%p1935_p10) }
 0x11f   : > { %v1418_v53 = vld [vmem:[%s2114_s22 + $0x18] sm:$0xff]  ;;  %v1420_v61 = vld [vmem:[%s2114_s22 + $0x20] sm:$0xff]  ;;  %v1422_v43 = vld [vmem:[%s2114_s22 + $0x28] sm:$0xff]  ;;  %1413 = vst [vmem:[%s1354_s7] sm:$0xff] %v1412_v52 }
 0x120   : > { %1415 = vst [vmem:[%s1354_s7 + $0x8] sm:$0xff] %v1414_v41  ;;  %1417 = vst [vmem:[%s1354_s7 + $0x20] sm:$0xff] %v1416_v5  ;;  %v1424_v17 = vld [vmem:[%s2114_s22 + $0x30] sm:$0xff]  ;;  %v1426_v15 = vld [vmem:[%s2114_s22 + $0x38] sm:$0xff] }
 0x121   : > { %1419 = vst [vmem:[%s1354_s7 + $0x28] sm:$0xff] %v1418_v53  ;;  %1421 = vst [vmem:[%s1354_s7 + $0x40] sm:$0xff] %v1420_v61  ;;  %v1428_v49 = vld [vmem:[%s2114_s22 + $0x40] sm:$0xff]  ;;  %v1430_v42 = vld [vmem:[%s2114_s22 + $0x48] sm:$0xff] }
 0x122   : > { %1423 = vst [vmem:[%s1354_s7 + $0x48] sm:$0xff] %v1422_v43  ;;  %1425 = vst [vmem:[%s1354_s7 + $0x60] sm:$0xff] %v1424_v17  ;;  %v1432_v37 = vld [vmem:[%s2114_s22 + $0x50] sm:$0xff]  ;;  %v1434_v56 = vld [vmem:[%s2114_s22 + $0x58] sm:$0xff] }
 0x123   : > { %1427 = vst [vmem:[%s1354_s7 + $0x68] sm:$0xff] %v1426_v15  ;;  %1429 = vst [vmem:[%s1354_s7 + $0x80] sm:$0xff] %v1428_v49  ;;  %v1436_v57 = vld [vmem:[%s2114_s22 + $0x60] sm:$0xff]  ;;  %v1438_v39 = vld [vmem:[%s2114_s22 + $0x68] sm:$0xff] }
 0x124   : > { %1431 = vst [vmem:[%s1354_s7 + $0x88] sm:$0xff] %v1430_v42  ;;  %1433 = vst [vmem:[%s1354_s7 + $0xa0] sm:$0xff] %v1432_v37  ;;  %v1440_v11 = vld [vmem:[%s2114_s22 + $0x70] sm:$0xff]  ;;  %v1442_v25 = vld [vmem:[%s2114_s22 + $0x78] sm:$0xff] }
 0x125   : > { %1435 = vst [vmem:[%s1354_s7 + $0xa8] sm:$0xff] %v1434_v56  ;;  %1437 = vst [vmem:[%s1354_s7 + $0xc0] sm:$0xff] %v1436_v57 }
 0x126   : > { %1439 = vst [vmem:[%s1354_s7 + $0xc8] sm:$0xff] %v1438_v39  ;;  %1441 = vst [vmem:[%s1354_s7 + $0xe0] sm:$0xff] %v1440_v11 }
 0x127   : > { %1443 = vst [vmem:[%s1354_s7 + $0xe8] sm:$0xff] %v1442_v25 }
 0x128 PF: > { %p16_p2 = scmp.ge.s32.totalorder %s1919_s20, 4   ;;  %s3255_s17 = smov %s1866_s18 }
 0x129   : > { %s3256_s18 = smov %s1929_s23  ;;  %s3257_s19 = smov %s1919_s20 }
 0x12a   :  { %18 = sbr.rel (!%p16_p2) target bundleno = 17 (0x11), region = 251 }

</bundles_post_ra>
